<compile_context>
chip_gen: v6e
topology: v6e:2x2x1
jax: 0.10.0
libtpu: 0.0.40
codegen_flags: <defaults>
</compile_context>

<pallas_src>
import jax
import jax.numpy as jnp
from jax.experimental import pallas as pl
from jax.experimental.pallas import tpu as pltpu

# ----------------------------- model dims ----------------------------------
MLP_IN, MLP_HID, MLP_OUT = 64, 64, 32       # fp branch
GCN_IN, GCN_HID, GCN_OUT = 16, 32, 32       # molecular-graph branch
DIM1, DIM2, DIM3 = 32, 32, 32               # knowledge-graph branch
NUM_CLASSES = 2
NUM_REL = 8                                 # RGCNConv(..., 8)
ATT_HID = 128                               # Attention hidden size
N_MOLS = 8                                  # molecules (== fp_data rows)
# TODO(synk): gene_emb has 5414 rows in the reference module; reduced to 120
# so the dense KG adjacency fits a small-shape demo (N_KG = 128).  At the real
# size the (N, 9*N) dense adjacency no longer fits VMEM and the KG aggregation
# must become a grid over node/relation tiles (or a sparse gather).
N_GENES = 120
N_KG = N_MOLS + N_GENES                     # 128
BN_EPS = 1e-5

N_BATCHES = 2                               # "graph_dataloader" batches
MOLS_PER_BATCH = 4
NODES_PER_MOL = 6
NODES_PER_BATCH = MOLS_PER_BATCH * NODES_PER_MOL
N_GNODES = N_BATCHES * NODES_PER_BATCH      # 48 nodes, both batches merged

RG_PAD = 128                                # per-relation lane-aligned block width
NUM_BLK = NUM_REL + 1                       # 8 relations + root (identity adjacency)

# ---- bf16 "small weight" slab A: (WA_ROWS, 128), row offsets (16-aligned) ----
OFF_FP_W1 = 0       # (64, 64)
OFF_FP_W2 = 64      # (64, 32)
OFF_G_W1 = 128      # (16, 32)
OFF_G_W2 = 144      # (32, 32)
OFF_ATT_W1 = 176    # (32, 128)
OFF_LIN1_W = 208    # (32, 32)
WA_ROWS = 240

# ---- f32 bias / VPU-weight slab: (BS_ROWS, 128), one vector per row ----
ROW_FP_B1, ROW_FP_B2, ROW_G_B1, ROW_G_B2 = 0, 1, 2, 3
ROW_ATT_B1, ROW_ATT_W2 = 4, 5
ROW_RG1_B, ROW_RG2_B, ROW_LIN1_B = 6, 7, 8
ROW_L2WD, ROW_L2BD = 9, 10                   # lin2 class1-class0 weight/bias diff
BS_ROWS = 16


# ----------------------------- fused Pallas kernel --------------------------
def _dot(a, b):
    """bf16 MXU matmul with f32 accumulation."""
    return jnp.dot(a.astype(jnp.bfloat16), b.astype(jnp.bfloat16),
                   preferred_element_type=jnp.float32)


def fused_forward_kernel(
    fp_ref, gx_ref, gadj_ref, gpool_ref, gene_ref, kgadj_ref,
    wa_ref, ww_ref, bs_ref,
    out_ref, beta_ref,
):
    bf16 = jnp.bfloat16
    bs = bs_ref[...]                                          # (16, 128) f32

    # ---- fingerprint MLP branch (BN folded, eval-mode dropout = identity) ----
    fp_w1 = wa_ref[OFF_FP_W1:OFF_FP_W1 + MLP_IN, 0:MLP_HID]
    fp_w2 = wa_ref[OFF_FP_W2:OFF_FP_W2 + MLP_HID, 0:MLP_OUT]
    fp = fp_ref[...]
    fp = jnp.maximum(_dot(fp, fp_w1) + bs[ROW_FP_B1:ROW_FP_B1 + 1, 0:MLP_HID], 0.0)
    fp = jnp.maximum(_dot(fp, fp_w2) + bs[ROW_FP_B2:ROW_FP_B2 + 1, 0:MLP_OUT], 0.0)
    # fp: (N_MOLS, GCN_OUT)

    # ---- molecular-graph branch: both loader batches merged block-diagonally ----
    g_w1 = wa_ref[OFF_G_W1:OFF_G_W1 + GCN_IN, 0:GCN_HID]
    g_w2 = wa_ref[OFF_G_W2:OFF_G_W2 + GCN_HID, 0:GCN_OUT]
    adj = gadj_ref[...]                                       # (48, 48) bf16 block-diag
    h = jnp.maximum(_dot(adj, _dot(gx_ref[...], g_w1))
                    + bs[ROW_G_B1:ROW_G_B1 + 1, 0:GCN_HID], 0.0)
    h = jnp.maximum(_dot(adj, _dot(h, g_w2))
                    + bs[ROW_G_B2:ROW_G_B2 + 1, 0:GCN_OUT], 0.0)
    graph_out = _dot(gpool_ref[...], h)                       # (N_MOLS, GCN_OUT) mean pool

    # ---- attention over the length-2 stack [graph_out, fp] ----
    att_w1 = wa_ref[OFF_ATT_W1:OFF_ATT_W1 + GCN_OUT, 0:ATT_HID]
    att_b1 = bs[ROW_ATT_B1:ROW_ATT_B1 + 1, 0:ATT_HID]
    att_w2 = bs[ROW_ATT_W2:ROW_ATT_W2 + 1, 0:ATT_HID]         # Linear(128,1,bias=False)
    z = jnp.concatenate([graph_out, fp], axis=0)              # (2*N_MOLS, GCN_OUT)
    hz = jnp.tanh(_dot(z, att_w1) + att_b1)                   # (2*N_MOLS, ATT_HID)
    s = jnp.sum(hz * att_w2, axis=-1, keepdims=True)          # VPU reduce, 1 out column
    s0, s1 = s[:N_MOLS], s[N_MOLS:]
    m = jnp.maximum(s0, s1)
    e0 = jnp.exp(s0 - m)
    e1 = jnp.exp(s1 - m)
    inv = 1.0 / (e0 + e1)
    b0 = e0 * inv
    b1 = e1 * inv
    emb = b0 * graph_out + b1 * fp                            # (N_MOLS, GCN_OUT)
    beta_ref[...] = jnp.concatenate([b0, b1], axis=-1)        # (N_MOLS, 2)

    # ---- knowledge-graph branch ----
    adjk = kgadj_ref[...]                                     # (N_KG, NUM_BLK*N_KG) bf16

    def rgcn(x, w_all, bias):
        # ONE projection matmul for all 8 relations + root: w_all is
        # (fin, NUM_BLK*RG_PAD) with relation b in lanes [b*128, b*128+fout).
        hproj = _dot(x, w_all).astype(bf16)                   # (N_KG, NUM_BLK*RG_PAD)
        # Restack 128-aligned lane blocks along sublanes so row b*N_KG + j of
        # hs holds (X @ W_b)[j, :] -- matches the host adjacency column order.
        hs = jnp.concatenate(
            [hproj[:, b * RG_PAD:(b + 1) * RG_PAD] for b in range(NUM_BLK)],
            axis=0)                                           # (NUM_BLK*N_KG, RG_PAD)
        agg = jnp.dot(adjk, hs, preferred_element_type=jnp.float32)  # (N_KG, RG_PAD)
        return jnp.maximum(agg[:, :DIM1] + bias, 0.0)         # root+bias already inside

    kg = jnp.concatenate([emb, gene_ref[...]], axis=0)        # (N_KG, GCN_OUT)
    kg = rgcn(kg, ww_ref[0:GCN_OUT, :], bs[ROW_RG1_B:ROW_RG1_B + 1, 0:DIM1])
    kg = rgcn(kg, ww_ref[GCN_OUT:2 * GCN_OUT, :], bs[ROW_RG2_B:ROW_RG2_B + 1, 0:DIM2])

    lin1_w = wa_ref[OFF_LIN1_W:OFF_LIN1_W + DIM2, 0:DIM3]
    kg = jnp.maximum(_dot(kg, lin1_w) + bs[ROW_LIN1_B:ROW_LIN1_B + 1, 0:DIM3], 0.0)

    # final Linear(DIM3, 2) + log_softmax, closed 2-class form: both output
    # columns depend only on the logit difference d = y1 - y0.
    w2d = bs[ROW_L2WD:ROW_L2WD + 1, 0:DIM3]                   # W[1,:] - W[0,:]
    b2d = bs[ROW_L2BD:ROW_L2BD + 1, 0:1]                      # b[1]  - b[0]
    d = jnp.sum(kg * w2d, axis=-1, keepdims=True) + b2d       # (N_KG, 1)
    sp = jnp.maximum(d, 0.0) + jnp.log(1.0 + jnp.exp(-jnp.abs(d)))   # softplus(d)
    out0 = -sp                                                 # -softplus(d)
    out1 = d - sp                                              # -softplus(-d)
    out_ref[...] = jnp.concatenate([out0, out1], axis=-1)      # (N_KG, 2)


# ----------------------------- pallas_call wrapper ---------------------------
def _full_spec(shape):
    nd = len(shape)
    return pl.BlockSpec(tuple(shape), lambda i, _nd=nd: (0,) * _nd)


def forward(params, fp_data, gx, gadj, gpool, kg_adj):
    args = (fp_data, gx, gadj, gpool, params['gene_emb'], kg_adj,
            params['wA'], params['wW'], params['bias'])
    out_shapes = (jax.ShapeDtypeStruct((N_KG, NUM_CLASSES), jnp.float32),
                  jax.ShapeDtypeStruct((N_MOLS, 2), jnp.float32))
    output, beta = pl.pallas_call(
        fused_forward_kernel,
        grid=(1,),
        in_specs=[_full_spec(a.shape) for a in args],
        out_specs=(_full_spec((N_KG, NUM_CLASSES)), _full_spec((N_MOLS, 2))),
        out_shape=out_shapes,
        compiler_params=pltpu.CompilerParams(dimension_semantics=("arbitrary",)),
    )(*args)
    att = beta.reshape(N_MOLS, 2, 1)                           # matches torch (N, 2, 1)
    return output, att


# ----------------------------- host-side glue (plain JAX) --------------------
def build_gcn_adj(edge_index, num_nodes):
    """Symmetric-normalized adjacency with self-loops: D^-1/2 (A+I) D^-1/2."""
    src, dst = edge_index[0], edge_index[1]
    a = jnp.zeros((num_nodes, num_nodes), jnp.float32).at[dst, src].add(1.0)
    a = a + jnp.eye(num_nodes, dtype=jnp.float32)
    deg = a.sum(axis=1)
    dinv = jnp.where(deg > 0, 1.0 / jnp.sqrt(deg), 0.0)
    return dinv[:, None] * a * dinv[None, :]


def build_rgcn_adj_packed(edge_index, edge_type, num_nodes, num_rel):
    """Per-relation mean-normalized adjacency + identity (root) block, packed
    to (N, (R+1)*N) with column index b*N + j, matching the kernel's hs rows."""
    src, dst = edge_index[0], edge_index[1]
    a = (jnp.zeros((num_rel, num_nodes, num_nodes), jnp.float32)
         .at[edge_type, dst, src].add(1.0))
    cnt = a.sum(axis=2, keepdims=True)
    a = jnp.where(cnt > 0, a / jnp.maximum(cnt, 1.0), 0.0)
    a_ext = jnp.concatenate([a, jnp.eye(num_nodes, dtype=jnp.float32)[None]], axis=0)
    return a_ext.transpose(1, 0, 2).reshape(num_nodes, (num_rel + 1) * num_nodes)


def pool_matrix(batch, num_graphs, num_nodes):
    """global_mean_pool as a (num_graphs, num_nodes) averaging matrix."""
    del num_nodes
    onehot = (batch[None, :] == jnp.arange(num_graphs)[:, None]).astype(jnp.float32)
    cnt = onehot.sum(axis=1, keepdims=True)
    return onehot / jnp.maximum(cnt, 1.0)


def block_diag2(a, b):
    r1, c1 = a.shape
    r2, c2 = b.shape
    top = jnp.concatenate([a, jnp.zeros((r1, c2), a.dtype)], axis=1)
    bot = jnp.concatenate([jnp.zeros((r2, c1), b.dtype), b], axis=1)
    return jnp.concatenate([top, bot], axis=0)


def init_params(key):
    ks = iter(jax.random.split(key, 40))
    bn_scale = 1.0 / jnp.sqrt(1.0 + BN_EPS)   # eval-mode BN folded into W/b

    def dense(fin, fout, bias=True, bn=False):
        w = jax.random.normal(next(ks), (fin, fout), jnp.float32) * 0.1
        b = (jax.random.normal(next(ks), (fout,), jnp.float32) * 0.1
             if bias else jnp.zeros((fout,), jnp.float32))
        if bn:
            w, b = w * bn_scale, b * bn_scale
        return w, b

    fp_w1, fp_b1 = dense(MLP_IN, MLP_HID, bn=True)
    fp_w2, fp_b2 = dense(MLP_HID, MLP_OUT, bn=True)
    g_w1, g_b1 = dense(GCN_IN, GCN_HID, bn=True)
    g_w2, g_b2 = dense(GCN_HID, GCN_OUT, bn=True)
    att_w1, att_b1 = dense(GCN_OUT, ATT_HID)
    att_w2, _ = dense(ATT_HID, 1, bias=False)         # (128, 1), no bias
    lin1_w, lin1_b = dense(DIM2, DIM3, bn=True)
    lin2_w, lin2_b = dense(DIM3, NUM_CLASSES)

    gene_emb = jax.random.normal(next(ks), (N_GENES, GCN_OUT), jnp.float32)

    def rgcn_weights(fin, fout):
        wr = jax.random.normal(next(ks), (NUM_REL, fin, fout), jnp.float32) * 0.1 * bn_scale
        root, b = dense(fin, fout, bn=True)
        return wr, root, b

    rg1_w, rg1_root, rg1_b = rgcn_weights(GCN_OUT, DIM1)
    rg2_w, rg2_root, rg2_b = rgcn_weights(DIM1, DIM2)

    # ---- slab A: small bf16 MXU weights, one 128-lane-wide slab ----
    wa = jnp.zeros((WA_ROWS, 128), jnp.float32)

    def put(slab, r, w):
        return slab.at[r:r + w.shape[0], 0:w.shape[1]].set(w)

    wa = put(wa, OFF_FP_W1, fp_w1)
    wa = put(wa, OFF_FP_W2, fp_w2)
    wa = put(wa, OFF_G_W1, g_w1)
    wa = put(wa, OFF_G_W2, g_w2)
    wa = put(wa, OFF_ATT_W1, att_w1)
    wa = put(wa, OFF_LIN1_W, lin1_w)
    wa = wa.astype(jnp.bfloat16)

    # ---- slab W: RGCN relation + root weights in zero-padded 128-lane blocks ----
    def pack_rgcn(wr, root):
        slab = jnp.zeros((wr.shape[1], NUM_BLK * RG_PAD), jnp.float32)
        for b in range(NUM_REL):
            slab = slab.at[:, b * RG_PAD:b * RG_PAD + wr.shape[2]].set(wr[b])
        slab = slab.at[:, NUM_REL * RG_PAD:NUM_REL * RG_PAD + root.shape[1]].set(root)
        return slab

    ww = jnp.concatenate([pack_rgcn(rg1_w, rg1_root),
                          pack_rgcn(rg2_w, rg2_root)], axis=0).astype(jnp.bfloat16)

    # ---- bias / VPU-weight slab (f32) ----
    bs = jnp.zeros((BS_ROWS, 128), jnp.float32)

    def putrow(slab, r, v):
        return slab.at[r, 0:v.shape[0]].set(v)

    bs = putrow(bs, ROW_FP_B1, fp_b1)
    bs = putrow(bs, ROW_FP_B2, fp_b2)
    bs = putrow(bs, ROW_G_B1, g_b1)
    bs = putrow(bs, ROW_G_B2, g_b2)
    bs = putrow(bs, ROW_ATT_B1, att_b1)
    bs = putrow(bs, ROW_ATT_W2, att_w2[:, 0])
    bs = putrow(bs, ROW_RG1_B, rg1_b)
    bs = putrow(bs, ROW_RG2_B, rg2_b)
    bs = putrow(bs, ROW_LIN1_B, lin1_b)
    bs = putrow(bs, ROW_L2WD, lin2_w[:, 1] - lin2_w[:, 0])
    bs = putrow(bs, ROW_L2BD, (lin2_b[1] - lin2_b[0])[None])

    return {'wA': wa, 'wW': ww, 'bias': bs, 'gene_emb': gene_emb}


def make_graph_batch(key, n_mols, nodes_per_mol):
    n_nodes = n_mols * nodes_per_mol
    x = jax.random.normal(key, (n_nodes, GCN_IN), jnp.float32)
    src, dst = [], []
    for m in range(n_mols):
        off = m * nodes_per_mol
        for i in range(nodes_per_mol - 1):
            src += [off + i, off + i + 1]
            dst += [off + i + 1, off + i]
    edge_index = jnp.array([src, dst], dtype=jnp.int32)
    batch = jnp.repeat(jnp.arange(n_mols, dtype=jnp.int32), nodes_per_mol)
    return x, edge_index, batch, n_mols


if __name__ == "__main__":
    key = jax.random.PRNGKey(0)
    k_par, k_fp, k_g1, k_g2, k_s, k_d, k_t = jax.random.split(key, 7)

    params = init_params(k_par)

    # fingerprint features for the 8 molecules
    fp_data = jax.random.normal(k_fp, (N_MOLS, MLP_IN), jnp.float32)

    # "graph_dataloader": two batches of 4 molecules x 6 nodes, merged into one
    # block-diagonal problem (mathematically identical, half the matmul issues)
    batches = [make_graph_batch(k_g1, MOLS_PER_BATCH, NODES_PER_MOL),
               make_graph_batch(k_g2, MOLS_PER_BATCH, NODES_PER_MOL)]
    gx = jnp.concatenate([b[0] for b in batches], axis=0)                   # (48, 16)
    adjs = [build_gcn_adj(b[1], NODES_PER_BATCH) for b in batches]
    gadj = block_diag2(adjs[0], adjs[1]).astype(jnp.bfloat16)               # (48, 48)
    pools = [pool_matrix(b[2], b[3], NODES_PER_BATCH) for b in batches]
    gpool = block_diag2(pools[0], pools[1]).astype(jnp.bfloat16)            # (8, 48)

    # knowledge-graph edges over N_KG = 8 molecules + 120 genes = 128 nodes
    E_KG = 512
    kg_src = jax.random.randint(k_s, (E_KG,), 0, N_KG, dtype=jnp.int32)
    kg_dst = jax.random.randint(k_d, (E_KG,), 0, N_KG, dtype=jnp.int32)
    kg_edge_index = jnp.stack([kg_src, kg_dst], axis=0)
    kg_edge_type = jax.random.randint(k_t, (E_KG,), 0, NUM_REL, dtype=jnp.int32)
    kg_adj = build_rgcn_adj_packed(kg_edge_index, kg_edge_type,
                                   N_KG, NUM_REL).astype(jnp.bfloat16)      # (128, 1152)

    output, att = forward(params, fp_data, gx, gadj, gpool, kg_adj)
    jax.block_until_ready((output, att))

    assert output.shape == (N_KG, NUM_CLASSES)
    assert att.shape == (N_MOLS, 2, 1)
    print("KERNEL_OK")
</pallas_src>

<mosaic_0001>
module attributes {stable_mosaic.version = 11 : i64} {
  func.func @fused_forward_kernel(%arg0: i32, %arg1: memref<8x64xf32, #tpu.memory_space<vmem>>, %arg2: memref<48x16xf32, #tpu.memory_space<vmem>>, %arg3: memref<48x48xbf16, #tpu.memory_space<vmem>>, %arg4: memref<8x48xbf16, #tpu.memory_space<vmem>>, %arg5: memref<120x32xf32, #tpu.memory_space<vmem>>, %arg6: memref<128x1152xbf16, #tpu.memory_space<vmem>>, %arg7: memref<240x128xbf16, #tpu.memory_space<vmem>>, %arg8: memref<64x1152xbf16, #tpu.memory_space<vmem>>, %arg9: memref<16x128xf32, #tpu.memory_space<vmem>>, %arg10: memref<128x2xf32, #tpu.memory_space<vmem>>, %arg11: memref<8x2xf32, #tpu.memory_space<vmem>>) attributes {dimension_semantics = [#tpu.dimension_semantics<arbitrary>], iteration_bounds = array<i64: 1>, scalar_prefetch = 0 : i64, scratch_operands = 0 : i64, tpu.core_type = #tpu.core_type<tc>, window_params = [{pipeline_mode = #tpu.pipeline_mode<synchronous>, transform_indices = @transform_0, window_bounds = array<i64: 8, 64>}, {pipeline_mode = #tpu.pipeline_mode<synchronous>, transform_indices = @transform_1, window_bounds = array<i64: 48, 16>}, {pipeline_mode = #tpu.pipeline_mode<synchronous>, transform_indices = @transform_2, window_bounds = array<i64: 48, 48>}, {pipeline_mode = #tpu.pipeline_mode<synchronous>, transform_indices = @transform_3, window_bounds = array<i64: 8, 48>}, {pipeline_mode = #tpu.pipeline_mode<synchronous>, transform_indices = @transform_4, window_bounds = array<i64: 120, 32>}, {pipeline_mode = #tpu.pipeline_mode<synchronous>, transform_indices = @transform_5, window_bounds = array<i64: 128, 1152>}, {pipeline_mode = #tpu.pipeline_mode<synchronous>, transform_indices = @transform_6, window_bounds = array<i64: 240, 128>}, {pipeline_mode = #tpu.pipeline_mode<synchronous>, transform_indices = @transform_7, window_bounds = array<i64: 64, 1152>}, {pipeline_mode = #tpu.pipeline_mode<synchronous>, transform_indices = @transform_8, window_bounds = array<i64: 16, 128>}, {pipeline_mode = #tpu.pipeline_mode<synchronous>, transform_indices = @transform_9, window_bounds = array<i64: 128, 2>}, {pipeline_mode = #tpu.pipeline_mode<synchronous>, transform_indices = @transform_10, window_bounds = array<i64: 8, 2>}]} {
    %c0 = arith.constant 0 : index
    %c0_0 = arith.constant 0 : index
    %0 = vector.load %arg9[%c0, %c0_0] : memref<16x128xf32, #tpu.memory_space<vmem>>, vector<16x128xf32>
    %c0_1 = arith.constant 0 : index
    %c0_2 = arith.constant 0 : index
    %1 = vector.load %arg7[%c0_1, %c0_2] : memref<240x128xbf16, #tpu.memory_space<vmem>>, vector<64x64xbf16>
    %c64 = arith.constant 64 : index
    %c0_3 = arith.constant 0 : index
    %2 = vector.load %arg7[%c64, %c0_3] : memref<240x128xbf16, #tpu.memory_space<vmem>>, vector<64x32xbf16>
    %c0_4 = arith.constant 0 : index
    %c0_5 = arith.constant 0 : index
    %3 = vector.load %arg1[%c0_4, %c0_5] : memref<8x64xf32, #tpu.memory_space<vmem>>, vector<8x64xf32>
    %4 = arith.truncf %3 : vector<8x64xf32> to vector<8x64xbf16>
    %cst = arith.constant dense<0.000000e+00> : vector<8x64xf32>
    %5 = tpu.matmul %4, %1, %cst {dimension_numbers = #tpu.dot_dimension_numbers<[1], [0], [0], [1], [0, 0, 1, 1], [], []>} : vector<8x64xbf16>, vector<64x64xbf16>, vector<8x64xf32> -> vector<8x64xf32>
    %6 = vector.extract_strided_slice %0 {offsets = [0, 0], sizes = [1, 64], strides = [1, 1]} : vector<16x128xf32> to vector<1x64xf32>
    %7 = vector.broadcast %6 : vector<1x64xf32> to vector<8x64xf32>
    %8 = arith.addf %5, %7 : vector<8x64xf32>
    %cst_6 = arith.constant 0.000000e+00 : f32
    %9 = vector.broadcast %cst_6 : f32 to vector<8x64xf32>
    %10 = arith.maximumf %8, %9 : vector<8x64xf32>
    %11 = arith.truncf %10 : vector<8x64xf32> to vector<8x64xbf16>
    %cst_7 = arith.constant dense<0.000000e+00> : vector<8x32xf32>
    %12 = tpu.matmul %11, %2, %cst_7 {dimension_numbers = #tpu.dot_dimension_numbers<[1], [0], [0], [1], [0, 0, 1, 1], [], []>} : vector<8x64xbf16>, vector<64x32xbf16>, vector<8x32xf32> -> vector<8x32xf32>
    %13 = vector.extract_strided_slice %0 {offsets = [1, 0], sizes = [1, 32], strides = [1, 1]} : vector<16x128xf32> to vector<1x32xf32>
    %14 = vector.broadcast %13 : vector<1x32xf32> to vector<8x32xf32>
    %15 = arith.addf %12, %14 : vector<8x32xf32>
    %cst_8 = arith.constant 0.000000e+00 : f32
    %16 = vector.broadcast %cst_8 : f32 to vector<8x32xf32>
    %17 = arith.maximumf %15, %16 : vector<8x32xf32>
    %c128 = arith.constant 128 : index
    %c0_9 = arith.constant 0 : index
    %18 = vector.load %arg7[%c128, %c0_9] : memref<240x128xbf16, #tpu.memory_space<vmem>>, vector<16x32xbf16>
    %c144 = arith.constant 144 : index
    %c0_10 = arith.constant 0 : index
    %19 = vector.load %arg7[%c144, %c0_10] : memref<240x128xbf16, #tpu.memory_space<vmem>>, vector<32x32xbf16>
    %c0_11 = arith.constant 0 : index
    %c0_12 = arith.constant 0 : index
    %20 = vector.load %arg3[%c0_11, %c0_12] : memref<48x48xbf16, #tpu.memory_space<vmem>>, vector<48x48xbf16>
    %c0_13 = arith.constant 0 : index
    %c0_14 = arith.constant 0 : index
    %21 = vector.load %arg2[%c0_13, %c0_14] : memref<48x16xf32, #tpu.memory_space<vmem>>, vector<48x16xf32>
    %22 = arith.truncf %21 : vector<48x16xf32> to vector<48x16xbf16>
    %cst_15 = arith.constant dense<0.000000e+00> : vector<48x32xf32>
    %23 = tpu.matmul %22, %18, %cst_15 {dimension_numbers = #tpu.dot_dimension_numbers<[1], [0], [0], [1], [0, 0, 1, 1], [], []>} : vector<48x16xbf16>, vector<16x32xbf16>, vector<48x32xf32> -> vector<48x32xf32>
    %24 = arith.truncf %23 : vector<48x32xf32> to vector<48x32xbf16>
    %cst_16 = arith.constant dense<0.000000e+00> : vector<48x32xf32>
    %25 = tpu.matmul %20, %24, %cst_16 {dimension_numbers = #tpu.dot_dimension_numbers<[1], [0], [0], [1], [0, 0, 1, 1], [], []>} : vector<48x48xbf16>, vector<48x32xbf16>, vector<48x32xf32> -> vector<48x32xf32>
    %26 = vector.extract_strided_slice %0 {offsets = [2, 0], sizes = [1, 32], strides = [1, 1]} : vector<16x128xf32> to vector<1x32xf32>
    %27 = vector.broadcast %26 : vector<1x32xf32> to vector<48x32xf32>
    %28 = arith.addf %25, %27 : vector<48x32xf32>
    %cst_17 = arith.constant 0.000000e+00 : f32
    %29 = vector.broadcast %cst_17 : f32 to vector<48x32xf32>
    %30 = arith.maximumf %28, %29 : vector<48x32xf32>
    %31 = arith.truncf %30 : vector<48x32xf32> to vector<48x32xbf16>
    %cst_18 = arith.constant dense<0.000000e+00> : vector<48x32xf32>
    %32 = tpu.matmul %31, %19, %cst_18 {dimension_numbers = #tpu.dot_dimension_numbers<[1], [0], [0], [1], [0, 0, 1, 1], [], []>} : vector<48x32xbf16>, vector<32x32xbf16>, vector<48x32xf32> -> vector<48x32xf32>
    %33 = arith.truncf %32 : vector<48x32xf32> to vector<48x32xbf16>
    %cst_19 = arith.constant dense<0.000000e+00> : vector<48x32xf32>
    %34 = tpu.matmul %20, %33, %cst_19 {dimension_numbers = #tpu.dot_dimension_numbers<[1], [0], [0], [1], [0, 0, 1, 1], [], []>} : vector<48x48xbf16>, vector<48x32xbf16>, vector<48x32xf32> -> vector<48x32xf32>
    %35 = vector.extract_strided_slice %0 {offsets = [3, 0], sizes = [1, 32], strides = [1, 1]} : vector<16x128xf32> to vector<1x32xf32>
    %36 = vector.broadcast %35 : vector<1x32xf32> to vector<48x32xf32>
    %37 = arith.addf %34, %36 : vector<48x32xf32>
    %cst_20 = arith.constant 0.000000e+00 : f32
    %38 = vector.broadcast %cst_20 : f32 to vector<48x32xf32>
    %39 = arith.maximumf %37, %38 : vector<48x32xf32>
    %c0_21 = arith.constant 0 : index
    %c0_22 = arith.constant 0 : index
    %40 = vector.load %arg4[%c0_21, %c0_22] : memref<8x48xbf16, #tpu.memory_space<vmem>>, vector<8x48xbf16>
    %41 = arith.truncf %39 : vector<48x32xf32> to vector<48x32xbf16>
    %cst_23 = arith.constant dense<0.000000e+00> : vector<8x32xf32>
    %42 = tpu.matmul %40, %41, %cst_23 {dimension_numbers = #tpu.dot_dimension_numbers<[1], [0], [0], [1], [0, 0, 1, 1], [], []>} : vector<8x48xbf16>, vector<48x32xbf16>, vector<8x32xf32> -> vector<8x32xf32>
    %c176 = arith.constant 176 : index
    %c0_24 = arith.constant 0 : index
    %43 = vector.load %arg7[%c176, %c0_24] : memref<240x128xbf16, #tpu.memory_space<vmem>>, vector<32x128xbf16>
    %44 = vector.extract_strided_slice %0 {offsets = [4, 0], sizes = [1, 128], strides = [1, 1]} : vector<16x128xf32> to vector<1x128xf32>
    %45 = vector.extract_strided_slice %0 {offsets = [5, 0], sizes = [1, 128], strides = [1, 1]} : vector<16x128xf32> to vector<1x128xf32>
    %46 = tpu.concatenate %42, %17 in 0 : vector<8x32xf32>, vector<8x32xf32> -> vector<16x32xf32>
    %47 = arith.truncf %46 : vector<16x32xf32> to vector<16x32xbf16>
    %cst_25 = arith.constant dense<0.000000e+00> : vector<16x128xf32>
    %48 = tpu.matmul %47, %43, %cst_25 {dimension_numbers = #tpu.dot_dimension_numbers<[1], [0], [0], [1], [0, 0, 1, 1], [], []>} : vector<16x32xbf16>, vector<32x128xbf16>, vector<16x128xf32> -> vector<16x128xf32>
    %49 = vector.broadcast %44 : vector<1x128xf32> to vector<16x128xf32>
    %50 = arith.addf %48, %49 : vector<16x128xf32>
    %51 = math.tanh %50 : vector<16x128xf32>
    %52 = vector.broadcast %45 : vector<1x128xf32> to vector<16x128xf32>
    %53 = arith.mulf %51, %52 : vector<16x128xf32>
    %cst_26 = arith.constant dense<0.000000e+00> : vector<16xf32>
    %54 = vector.multi_reduction <add>, %53, %cst_26 [1] : vector<16x128xf32> to vector<16xf32>
    %55 = vector.shape_cast %54 : vector<16xf32> to vector<16x1xf32>
    %56 = vector.extract_strided_slice %55 {offsets = [0, 0], sizes = [8, 1], strides = [1, 1]} : vector<16x1xf32> to vector<8x1xf32>
    %57 = vector.extract_strided_slice %55 {offsets = [8, 0], sizes = [8, 1], strides = [1, 1]} : vector<16x1xf32> to vector<8x1xf32>
    %58 = arith.maximumf %56, %57 : vector<8x1xf32>
    %59 = arith.subf %56, %58 : vector<8x1xf32>
    %60 = math.exp %59 : vector<8x1xf32>
    %61 = arith.subf %57, %58 : vector<8x1xf32>
    %62 = math.exp %61 : vector<8x1xf32>
    %63 = arith.addf %60, %62 : vector<8x1xf32>
    %cst_27 = arith.constant 1.000000e+00 : f32
    %64 = vector.broadcast %cst_27 : f32 to vector<8x1xf32>
    %65 = arith.divf %64, %63 : vector<8x1xf32>
    %66 = arith.mulf %60, %65 : vector<8x1xf32>
    %67 = arith.mulf %62, %65 : vector<8x1xf32>
    %68 = vector.broadcast %66 : vector<8x1xf32> to vector<8x32xf32>
    %69 = arith.mulf %68, %42 : vector<8x32xf32>
    %70 = vector.broadcast %67 : vector<8x1xf32> to vector<8x32xf32>
    %71 = arith.mulf %70, %17 : vector<8x32xf32>
    %72 = arith.addf %69, %71 : vector<8x32xf32>
    %73 = tpu.concatenate %66, %67 in 1 : vector<8x1xf32>, vector<8x1xf32> -> vector<8x2xf32>
    %c0_28 = arith.constant 0 : index
    %c0_29 = arith.constant 0 : index
    %74 = vector.load %arg11[%c0_28, %c0_29] : memref<8x2xf32, #tpu.memory_space<vmem>>, vector<8x2xf32>
    tpu.vector_store %arg11[%c0_28, %c0_29], %73 {strides = array<i32>} : memref<8x2xf32, #tpu.memory_space<vmem>>, vector<8x2xf32>,
    %c0_30 = arith.constant 0 : index
    %c0_31 = arith.constant 0 : index
    %75 = vector.load %arg6[%c0_30, %c0_31] : memref<128x1152xbf16, #tpu.memory_space<vmem>>, vector<128x1152xbf16>
    %c0_32 = arith.constant 0 : index
    %c0_33 = arith.constant 0 : index
    %76 = vector.load %arg5[%c0_32, %c0_33] : memref<120x32xf32, #tpu.memory_space<vmem>>, vector<120x32xf32>
    %77 = tpu.concatenate %72, %76 in 0 : vector<8x32xf32>, vector<120x32xf32> -> vector<128x32xf32>
    %c0_34 = arith.constant 0 : index
    %c0_35 = arith.constant 0 : index
    %78 = vector.load %arg8[%c0_34, %c0_35] : memref<64x1152xbf16, #tpu.memory_space<vmem>>, vector<32x1152xbf16>
    %79 = vector.extract_strided_slice %0 {offsets = [6, 0], sizes = [1, 32], strides = [1, 1]} : vector<16x128xf32> to vector<1x32xf32>
    %80 = arith.truncf %77 : vector<128x32xf32> to vector<128x32xbf16>
    %cst_36 = arith.constant dense<0.000000e+00> : vector<128x1152xf32>
    %81 = tpu.matmul %80, %78, %cst_36 {dimension_numbers = #tpu.dot_dimension_numbers<[1], [0], [0], [1], [0, 0, 1, 1], [], []>} : vector<128x32xbf16>, vector<32x1152xbf16>, vector<128x1152xf32> -> vector<128x1152xf32>
    %82 = arith.truncf %81 : vector<128x1152xf32> to vector<128x1152xbf16>
    %83 = vector.extract_strided_slice %82 {offsets = [0, 0], sizes = [128, 128], strides = [1, 1]} : vector<128x1152xbf16> to vector<128x128xbf16>
    %84 = vector.extract_strided_slice %82 {offsets = [0, 128], sizes = [128, 128], strides = [1, 1]} : vector<128x1152xbf16> to vector<128x128xbf16>
    %85 = vector.extract_strided_slice %82 {offsets = [0, 256], sizes = [128, 128], strides = [1, 1]} : vector<128x1152xbf16> to vector<128x128xbf16>
    %86 = vector.extract_strided_slice %82 {offsets = [0, 384], sizes = [128, 128], strides = [1, 1]} : vector<128x1152xbf16> to vector<128x128xbf16>
    %87 = vector.extract_strided_slice %82 {offsets = [0, 512], sizes = [128, 128], strides = [1, 1]} : vector<128x1152xbf16> to vector<128x128xbf16>
    %88 = vector.extract_strided_slice %82 {offsets = [0, 640], sizes = [128, 128], strides = [1, 1]} : vector<128x1152xbf16> to vector<128x128xbf16>
    %89 = vector.extract_strided_slice %82 {offsets = [0, 768], sizes = [128, 128], strides = [1, 1]} : vector<128x1152xbf16> to vector<128x128xbf16>
    %90 = vector.extract_strided_slice %82 {offsets = [0, 896], sizes = [128, 128], strides = [1, 1]} : vector<128x1152xbf16> to vector<128x128xbf16>
    %91 = vector.extract_strided_slice %82 {offsets = [0, 1024], sizes = [128, 128], strides = [1, 1]} : vector<128x1152xbf16> to vector<128x128xbf16>
    %92 = tpu.concatenate %83, %84, %85, %86, %87, %88, %89, %90, %91 in 0 : vector<128x128xbf16>, vector<128x128xbf16>, vector<128x128xbf16>, vector<128x128xbf16>, vector<128x128xbf16>, vector<128x128xbf16>, vector<128x128xbf16>, vector<128x128xbf16>, vector<128x128xbf16> -> vector<1152x128xbf16>
    %cst_37 = arith.constant dense<0.000000e+00> : vector<128x128xf32>
    %93 = tpu.matmul %75, %92, %cst_37 {dimension_numbers = #tpu.dot_dimension_numbers<[1], [0], [0], [1], [0, 0, 1, 1], [], []>} : vector<128x1152xbf16>, vector<1152x128xbf16>, vector<128x128xf32> -> vector<128x128xf32>
    %94 = vector.extract_strided_slice %93 {offsets = [0, 0], sizes = [128, 32], strides = [1, 1]} : vector<128x128xf32> to vector<128x32xf32>
    %95 = vector.broadcast %79 : vector<1x32xf32> to vector<128x32xf32>
    %96 = arith.addf %94, %95 : vector<128x32xf32>
    %cst_38 = arith.constant 0.000000e+00 : f32
    %97 = vector.broadcast %cst_38 : f32 to vector<128x32xf32>
    %98 = arith.maximumf %96, %97 : vector<128x32xf32>
    %c32 = arith.constant 32 : index
    %c0_39 = arith.constant 0 : index
    %99 = vector.load %arg8[%c32, %c0_39] : memref<64x1152xbf16, #tpu.memory_space<vmem>>, vector<32x1152xbf16>
    %100 = vector.extract_strided_slice %0 {offsets = [7, 0], sizes = [1, 32], strides = [1, 1]} : vector<16x128xf32> to vector<1x32xf32>
    %101 = arith.truncf %98 : vector<128x32xf32> to vector<128x32xbf16>
    %cst_40 = arith.constant dense<0.000000e+00> : vector<128x1152xf32>
    %102 = tpu.matmul %101, %99, %cst_40 {dimension_numbers = #tpu.dot_dimension_numbers<[1], [0], [0], [1], [0, 0, 1, 1], [], []>} : vector<128x32xbf16>, vector<32x1152xbf16>, vector<128x1152xf32> -> vector<128x1152xf32>
    %103 = arith.truncf %102 : vector<128x1152xf32> to vector<128x1152xbf16>
    %104 = vector.extract_strided_slice %103 {offsets = [0, 0], sizes = [128, 128], strides = [1, 1]} : vector<128x1152xbf16> to vector<128x128xbf16>
    %105 = vector.extract_strided_slice %103 {offsets = [0, 128], sizes = [128, 128], strides = [1, 1]} : vector<128x1152xbf16> to vector<128x128xbf16>
    %106 = vector.extract_strided_slice %103 {offsets = [0, 256], sizes = [128, 128], strides = [1, 1]} : vector<128x1152xbf16> to vector<128x128xbf16>
    %107 = vector.extract_strided_slice %103 {offsets = [0, 384], sizes = [128, 128], strides = [1, 1]} : vector<128x1152xbf16> to vector<128x128xbf16>
    %108 = vector.extract_strided_slice %103 {offsets = [0, 512], sizes = [128, 128], strides = [1, 1]} : vector<128x1152xbf16> to vector<128x128xbf16>
    %109 = vector.extract_strided_slice %103 {offsets = [0, 640], sizes = [128, 128], strides = [1, 1]} : vector<128x1152xbf16> to vector<128x128xbf16>
    %110 = vector.extract_strided_slice %103 {offsets = [0, 768], sizes = [128, 128], strides = [1, 1]} : vector<128x1152xbf16> to vector<128x128xbf16>
    %111 = vector.extract_strided_slice %103 {offsets = [0, 896], sizes = [128, 128], strides = [1, 1]} : vector<128x1152xbf16> to vector<128x128xbf16>
    %112 = vector.extract_strided_slice %103 {offsets = [0, 1024], sizes = [128, 128], strides = [1, 1]} : vector<128x1152xbf16> to vector<128x128xbf16>
    %113 = tpu.concatenate %104, %105, %106, %107, %108, %109, %110, %111, %112 in 0 : vector<128x128xbf16>, vector<128x128xbf16>, vector<128x128xbf16>, vector<128x128xbf16>, vector<128x128xbf16>, vector<128x128xbf16>, vector<128x128xbf16>, vector<128x128xbf16>, vector<128x128xbf16> -> vector<1152x128xbf16>
    %cst_41 = arith.constant dense<0.000000e+00> : vector<128x128xf32>
    %114 = tpu.matmul %75, %113, %cst_41 {dimension_numbers = #tpu.dot_dimension_numbers<[1], [0], [0], [1], [0, 0, 1, 1], [], []>} : vector<128x1152xbf16>, vector<1152x128xbf16>, vector<128x128xf32> -> vector<128x128xf32>
    %115 = vector.extract_strided_slice %114 {offsets = [0, 0], sizes = [128, 32], strides = [1, 1]} : vector<128x128xf32> to vector<128x32xf32>
    %116 = vector.broadcast %100 : vector<1x32xf32> to vector<128x32xf32>
    %117 = arith.addf %115, %116 : vector<128x32xf32>
    %cst_42 = arith.constant 0.000000e+00 : f32
    %118 = vector.broadcast %cst_42 : f32 to vector<128x32xf32>
    %119 = arith.maximumf %117, %118 : vector<128x32xf32>
    %c208 = arith.constant 208 : index
    %c0_43 = arith.constant 0 : index
    %120 = vector.load %arg7[%c208, %c0_43] : memref<240x128xbf16, #tpu.memory_space<vmem>>, vector<32x32xbf16>
    %121 = arith.truncf %119 : vector<128x32xf32> to vector<128x32xbf16>
    %cst_44 = arith.constant dense<0.000000e+00> : vector<128x32xf32>
    %122 = tpu.matmul %121, %120, %cst_44 {dimension_numbers = #tpu.dot_dimension_numbers<[1], [0], [0], [1], [0, 0, 1, 1], [], []>} : vector<128x32xbf16>, vector<32x32xbf16>, vector<128x32xf32> -> vector<128x32xf32>
    %123 = vector.extract_strided_slice %0 {offsets = [8, 0], sizes = [1, 32], strides = [1, 1]} : vector<16x128xf32> to vector<1x32xf32>
    %124 = vector.broadcast %123 : vector<1x32xf32> to vector<128x32xf32>
    %125 = arith.addf %122, %124 : vector<128x32xf32>
    %cst_45 = arith.constant 0.000000e+00 : f32
    %126 = vector.broadcast %cst_45 : f32 to vector<128x32xf32>
    %127 = arith.maximumf %125, %126 : vector<128x32xf32>
    %128 = vector.extract_strided_slice %0 {offsets = [9, 0], sizes = [1, 32], strides = [1, 1]} : vector<16x128xf32> to vector<1x32xf32>
    %129 = vector.extract_strided_slice %0 {offsets = [10, 0], sizes = [1, 1], strides = [1, 1]} : vector<16x128xf32> to vector<1x1xf32>
    %130 = vector.broadcast %128 : vector<1x32xf32> to vector<128x32xf32>
    %131 = arith.mulf %127, %130 : vector<128x32xf32>
    %cst_46 = arith.constant dense<0.000000e+00> : vector<128xf32>
    %132 = vector.multi_reduction <add>, %131, %cst_46 [1] : vector<128x32xf32> to vector<128xf32>
    %133 = vector.shape_cast %132 : vector<128xf32> to vector<128x1xf32>
    %134 = vector.broadcast %129 : vector<1x1xf32> to vector<128x1xf32>
    %135 = arith.addf %133, %134 : vector<128x1xf32>
    %cst_47 = arith.constant 0.000000e+00 : f32
    %136 = vector.broadcast %cst_47 : f32 to vector<128x1xf32>
    %137 = arith.maximumf %135, %136 : vector<128x1xf32>
    %138 = math.absf %135 : vector<128x1xf32>
    %cst_48 = arith.constant 0.000000e+00 : f32
    %139 = vector.broadcast %cst_48 : f32 to vector<128x1xf32>
    %140 = arith.subf %139, %138 : vector<128x1xf32>
    %141 = math.exp %140 : vector<128x1xf32>
    %cst_49 = arith.constant 1.000000e+00 : f32
    %142 = vector.broadcast %cst_49 : f32 to vector<128x1xf32>
    %143 = arith.addf %142, %141 : vector<128x1xf32>
    %144 = math.log %143 : vector<128x1xf32>
    %145 = arith.addf %137, %144 : vector<128x1xf32>
    %cst_50 = arith.constant 0.000000e+00 : f32
    %146 = vector.broadcast %cst_50 : f32 to vector<128x1xf32>
    %147 = arith.subf %146, %145 : vector<128x1xf32>
    %148 = arith.subf %135, %145 : vector<128x1xf32>
    %149 = tpu.concatenate %147, %148 in 1 : vector<128x1xf32>, vector<128x1xf32> -> vector<128x2xf32>
    %c0_51 = arith.constant 0 : index
    %c0_52 = arith.constant 0 : index
    %150 = vector.load %arg10[%c0_51, %c0_52] : memref<128x2xf32, #tpu.memory_space<vmem>>, vector<128x2xf32>
    tpu.vector_store %arg10[%c0_51, %c0_52], %149 {strides = array<i32>} : memref<128x2xf32, #tpu.memory_space<vmem>>, vector<128x2xf32>,
    return
  }
  func.func @transform_0(%arg0: i32) -> (i32, i32) {
    %c0_i32 = arith.constant 0 : i32
    %c0_i32_0 = arith.constant 0 : i32
    %c0_i32_1 = arith.constant 0 : i32
    return %c0_i32, %c0_i32_0 : i32, i32
  }
  func.func @transform_1(%arg0: i32) -> (i32, i32) {
    %c0_i32 = arith.constant 0 : i32
    %c0_i32_0 = arith.constant 0 : i32
    %c0_i32_1 = arith.constant 0 : i32
    return %c0_i32, %c0_i32_0 : i32, i32
  }
  func.func @transform_2(%arg0: i32) -> (i32, i32) {
    %c0_i32 = arith.constant 0 : i32
    %c0_i32_0 = arith.constant 0 : i32
    %c0_i32_1 = arith.constant 0 : i32
    return %c0_i32, %c0_i32_0 : i32, i32
  }
  func.func @transform_3(%arg0: i32) -> (i32, i32) {
    %c0_i32 = arith.constant 0 : i32
    %c0_i32_0 = arith.constant 0 : i32
    %c0_i32_1 = arith.constant 0 : i32
    return %c0_i32, %c0_i32_0 : i32, i32
  }
  func.func @transform_4(%arg0: i32) -> (i32, i32) {
    %c0_i32 = arith.constant 0 : i32
    %c0_i32_0 = arith.constant 0 : i32
    %c0_i32_1 = arith.constant 0 : i32
    return %c0_i32, %c0_i32_0 : i32, i32
  }
  func.func @transform_5(%arg0: i32) -> (i32, i32) {
    %c0_i32 = arith.constant 0 : i32
    %c0_i32_0 = arith.constant 0 : i32
    %c0_i32_1 = arith.constant 0 : i32
    return %c0_i32, %c0_i32_0 : i32, i32
  }
  func.func @transform_6(%arg0: i32) -> (i32, i32) {
    %c0_i32 = arith.constant 0 : i32
    %c0_i32_0 = arith.constant 0 : i32
    %c0_i32_1 = arith.constant 0 : i32
    return %c0_i32, %c0_i32_0 : i32, i32
  }
  func.func @transform_7(%arg0: i32) -> (i32, i32) {
    %c0_i32 = arith.constant 0 : i32
    %c0_i32_0 = arith.constant 0 : i32
    %c0_i32_1 = arith.constant 0 : i32
    return %c0_i32, %c0_i32_0 : i32, i32
  }
  func.func @transform_8(%arg0: i32) -> (i32, i32) {
    %c0_i32 = arith.constant 0 : i32
    %c0_i32_0 = arith.constant 0 : i32
    %c0_i32_1 = arith.constant 0 : i32
    return %c0_i32, %c0_i32_0 : i32, i32
  }
  func.func @transform_9(%arg0: i32) -> (i32, i32) {
    %c0_i32 = arith.constant 0 : i32
    %c0_i32_0 = arith.constant 0 : i32
    %c0_i32_1 = arith.constant 0 : i32
    return %c0_i32, %c0_i32_0 : i32, i32
  }
  func.func @transform_10(%arg0: i32) -> (i32, i32) {
    %c0_i32 = arith.constant 0 : i32
    %c0_i32_0 = arith.constant 0 : i32
    %c0_i32_1 = arith.constant 0 : i32
    return %c0_i32, %c0_i32_0 : i32, i32
  }
}

</mosaic_0001>

<bundles_post_ra>
// kernel: tpu_custom_call.1
= control target key start
LH: loop header
LB: loop body
LE: loop exit
PB: predicated region body
PF: predicated region fallthrough
CT: control target
= control target key end

     0   :  { %16 = vsyncpa [#allocation3], 0  ;;  %s7738_s0 = inlined_call_operand.vmem [shape: f32[8,64], index: 0, kind: input, shape index: {}]   ;;  %s7739_s1 = inlined_call_operand.vmem [shape: f32[48,16], index: 1, kind: input, shape index: {}]   ;;  %s7740_s2 = inlined_call_operand.vmem [shape: bf16[48,48], index: 2, kind: input, shape index: {}]   ;;  %s7741_s3 = inlined_call_operand.vmem [shape: bf16[8,48], index: 3, kind: input, shape index: {}]   ;;  %s7742_s4 = inlined_call_operand.vmem [shape: f32[120,32], index: 4, kind: input, shape index: {}]   ;;  %s7743_s5 = inlined_call_operand.hbm [shape: bf16[128,1152], index: 5, kind: input, shape index: {}]   ;;  %s7744_s6 = inlined_call_operand.vmem [shape: bf16[240,128], index: 6, kind: input, shape index: {}]   ;;  %s7745_s7 = inlined_call_operand.hbm [shape: bf16[64,1152], index: 7, kind: input, shape index: {}]   ;;  %s7746_s8 = inlined_call_operand.vmem [shape: f32[16,128], index: 8, kind: input, shape index: {}]   ;;  %s7747_s9 = inlined_call_operand.vmem [shape: f32[128,2], index: 9, kind: output, shape index: {0}]   ;;  %s7748_s10 = inlined_call_operand.vmem [shape: f32[8,2], index: 10, kind: output, shape index: {1}]  }
   0x1   :  { %17 = vsyncpa [#allocation5], 0  ;;  %s5733_s13 = smov [#allocation2]  }
   0x2   :  { %s33_s14 = sshll.u32 %s5733_s13, 4  ;;  %s34_s14 = int_to_ptr.vmem [resolvable:$true] %s33_s14 }
   0x3   :  { %s5697_s15 = scalar_lea.vmem %s34_s14, 9216  ;;  %p5702_p1 = scmp.lt.s32.totalorder %s34_s14, %s34_s14 }
   0x4   :  { %p5698_p0 = scmp.ne.s32.totalorder %s34_s14, %s5697_s15  ;;  %p5703_p2 = scmp.lt.s32.totalorder %s5697_s15, %s5697_s15 }
   0x6   :  { %p5704_p3 = por %p5703_p2, %p5702_p1 }
   0x8   :  { %p5705_p4 = pnand %p5704_p3, %p5698_p0 }
   0xa   :  { %5708 = shalt.err (!%p5705_p4)
}
   0xb   :  { %s5734_s16 = smov 576   ;;  %s5735_s17 = smov 36  }
   0xc   :  { %39 = dma.hbm_to_vmem [thread:$0]  %s7743_s5, 9216, %s34_s14, [#allocation3], %s5734_s16, %s5734_s16, %s5735_s17  }
   0xd   :  { %s5736_s20 = smov [#allocation4]  }
   0xe   :  { %s47_s21 = sshll.u32 %s5736_s20, 4  ;;  %s48_s21 = int_to_ptr.vmem [resolvable:$true] %s47_s21 }
   0xf   :  { %s5717_s22 = scalar_lea.vmem %s48_s21, 4608  ;;  %p5722_p6 = scmp.lt.s32.totalorder %s48_s21, %s48_s21 }
  0x10   :  { %p5718_p5 = scmp.ne.s32.totalorder %s48_s21, %s5717_s22  ;;  %p5723_p7 = scmp.lt.s32.totalorder %s5717_s22, %s5717_s22 }
  0x12   :  { %p5724_p8 = por %p5723_p7, %p5722_p6 }
  0x14   :  { %p5725_p9 = pnand %p5724_p8, %p5718_p5 }
  0x16   :  { %5728 = shalt.err (!%p5725_p9)
}
  0x17   :  { %53 = dma.hbm_to_vmem [thread:$0]  %s7745_s7, 4608, %s48_s21, [#allocation5], %s5734_s16, %s5734_s16, %s5735_s17  }
  0x18   :  { %5729 = dma.done.wait [#allocation3], 9216  }
  0x19   :  { %5730 = vsyncadd [#allocation3], 4294958080 }
  0x1a   :  { %5731 = dma.done.wait [#allocation5], 4608  }
  0x1b   :  { %5732 = vsyncadd [#allocation5], 4294962688  ;;  %v5737_v0 = vmov 0.0   ;;  %vm5738_vm0 = vmmov 0   ;;  %v5367_v1 = vld [vmem:[%s7744_s6 + $0x18] sm:$0xff]   ;;  %v5368_v2 = vld [vmem:[%s7744_s6 + $0x10] sm:$0xff]   ;;  %v83_v15 = vlaneseq }
  0x1c   :  { %5125 = vmatprep.subr.bf16.mxu0 %v5737_v0  ;;  %5133 = vmatprep.mubr.msk.bf16.mxu0 %vm5738_vm0, %v5737_v0  ;;  %v5371_v3 = vld [vmem:[%s7744_s6 + $0x38] sm:$0xff]   ;;  %v5369_v4 = vld [vmem:[%s7744_s6 + $0x8] sm:$0xff]   ;;  %v5372_v5 = vld [vmem:[%s7744_s6 + $0x30] sm:$0xff]   ;;  %vm111_vm1 = vcmask 523264   ;;  %vm256_vm2 = vcmask 130048   ;;  %vm345_vm3 = vcmask 392192  }
  0x1d   :  { %5137 = vmatprep.subr.bf16.mxu1 %v5737_v0  ;;  %5145 = vmatprep.mubr.msk.bf16.mxu1 %vm5738_vm0, %v5737_v0  ;;  %v5370_v6 = vld [vmem:[%s7744_s6] sm:$0xff]   ;;  %v5373_v9 = vld [vmem:[%s7744_s6 + $0x28] sm:$0xff]   ;;  %v5859_v16 = vshrl.u32 %v83_v15, 7  ;;  %v243_v27 = vld [vmem:[%s7739_s1 + $0x10] sm:$0xff]  ;;  %vm433_vm4 = vcmask 261120   ;;  %vm709_vm5 = vcmask 7168  }
  0x1e   :  { %5126 = vmatpush3.bf16.msra.mxu0 %v5367_v1  ;;  %5138 = vmatpush3.bf16.msra.mxu1 %v5371_v3  ;;  %v81_v7 = vld [vmem:[%s7738_s0] sm:$0xff]  ;;  %v242_v13 = vld [vmem:[%s7739_s1 + $0x8] sm:$0xff]  ;;  %v244_v28 = vld [vmem:[%s7739_s1 + $0x18] sm:$0xff]  ;;  %vm711_vm6 = vcmask 15360  }
  0x1f   :  { %5127 = vmatprep.subr.bf16.mxu0 %v5737_v0  ;;  %5139 = vmatprep.subr.bf16.mxu1 %v5737_v0  ;;  %v82_v8 = vpack.c.bf16 %v81_v7, %v81_v7  ;;  %v5374_v10 = vld [vmem:[%s7744_s6 + $0x20] sm:$0xff]   ;;  %7791 = vst [vmem:[#allocation8_spill] sm:$0xff] %v5859_v16  ;;  %v7751_v17 = vsub.s32 0, %v5859_v16  ;;  %v248_v29 = vpack.c.bf16 %v244_v28, %v243_v27  ;;  %v246_v31 = vld [vmem:[%s7739_s1 + $0x28] sm:$0xff]  ;;  %v5918_v54 = vld [vmem:[%s7740_s2 + $0x10] sm:$0xff]   ;;  %v7749_v57 = vsub.s32 2, %v5859_v16 }
  0x20   :  { %v5375_v11 = vld [vmem:[%s7744_s6 + $0x40] sm:$0xff]   ;;  %v5909_v53 = vld [vmem:[%s7740_s2 + $0x8] sm:$0xff]   ;;  %v5379_v55 = vld [vmem:[%s7744_s6 + $0x50] sm:$0xff]  }
  0x21   :  { %v241_v12 = vld [vmem:[%s7739_s1] sm:$0xff]  ;;  %v5380_v56 = vld [vmem:[%s7744_s6 + $0x48] sm:$0xff]  }
  0x22   :  { %5128 = vmatpush3.bf16.msra.mxu0 %v5368_v2  ;;  %5140 = vmatpush3.bf16.msra.mxu1 %v5372_v5  ;;  %v247_v14 = vpack.c.bf16 %v242_v13, %v241_v12  ;;  %v5865_v18 = vld [vmem:[%s7746_s8] sm:$0xff] }
  0x23   :  { %5129 = vmatprep.subr.bf16.mxu0 %v5737_v0  ;;  %5141 = vmatprep.subr.bf16.mxu1 %v5737_v0  ;;  %v86_v19 = vrot.slane %v5865_v18, %v7751_v17  ;;  %v245_v30 = vld [vmem:[%s7739_s1 + $0x20] sm:$0xff]  ;;  %v329_v58 = vrot.slane %v5865_v18, %v7749_v57 }
  0x24   :  { %v249_v32 = vpack.c.bf16 %v246_v31, %v245_v30  ;;  %v5899_v52 = vld [vmem:[%s7740_s2] sm:$0xff]  }
  0x26   :  { %5130 = vmatpush3.bf16.msra.mxu0 %v5369_v4  ;;  %5142 = vmatpush3.bf16.msra.mxu1 %v5373_v9 }
  0x27   :  { %5131 = vmatprep.subr.bf16.mxu0 %v5737_v0  ;;  %5143 = vmatprep.subr.bf16.mxu1 %v5737_v0 }
  0x2a   :  { %5132 = vmatpush3.bf16.msra.mxu0 %v5370_v6  ;;  %5144 = vmatpush3.bf16.msra.mxu1 %v5374_v10 }
  0x2b   :  { %5149 = vmatprep.subr.bf16.mxu0 %v5737_v0  ;;  %5357 = vmatprep.subr.bf16.mxu1 %v5737_v0 }
  0x2d   :  { %5134 = vmatmul.mubr.msk.bf16.vlgmr.msra.gmra.mxu0 %vm111_vm1, %v82_v8 }
  0x2e   :  { %5151 = vmatprep.mubr.msk.bf16.mxu0 %vm5738_vm0, %v5737_v0  ;;  %5150 = vmatpush3.bf16.msra.mxu0 %v5375_v11 }
  0x2f   :  { %5181 = vmatprep.subr.bf16.mxu0 %v5737_v0 }
  0x35   :  { %5152 = vmatmul.mubr.msk.bf16.vlgmr.msra.gmra.mxu0 %vm256_vm2, %v247_v14 }
  0x36   :  { %5185 = vmatprep.mubr.msk.bf16.mxu0 %vm5738_vm0, %v5737_v0  ;;  %5182 = vmatpush3.bf16.msra.mxu0 %v5379_v55 }
  0x37   :  { %5183 = vmatprep.subr.bf16.mxu0 %v5737_v0 }
  0x3a   :  { %5184 = vmatpush3.bf16.msra.mxu0 %v5380_v56 }
  0x3b   :  { %5215 = vmatprep.subr.bf16.mxu0 %v5737_v0 }
  0xed   :  { %v149_v20 = vpop.f32.mrf.mxu0 }
  0xee   :  { %v150_v21 = vadd.f32 %v149_v20, %v86_v19 }
  0xef   :  { %v5135_v22 = vpop.f32.mrf.mxu0 }
  0xf0   :  { %v155_v23 = vmax.f32 %v150_v21, 0.0 }
  0xf1   :  { %v152_v24 = vpop.f32.mrf.mxu0 }
  0xf2   :  { %v156_v25 = vpack.c.bf16 %v155_v23, %v155_v23 }
  0xf3   :  { %v5136_v26 = vpop.f32.mrf.mxu0 }
  0xf4   :  { %5146 = vmatmul.mubr.msk.bf16.vlgmr.msra.gmra.mxu1 %vm111_vm1, %v156_v25 }
  0xf5   :  { %5358 = vmatpush3.bf16.msra.mxu1 %v5375_v11  ;;  %5155 = vmatprep.mubr.msk.bf16.mxu1 %vm5738_vm0, %v5737_v0  ;;  %v300_v33 = vpop.f32.mrf.mxu0 }
  0xf6   :  { %5163 = vmatprep.subr.bf16.mxu1 %v5737_v0 }
  0xf7   :  { %v5153_v34 = vpop.f32.mrf.mxu0 }
  0xf9   :  { %v303_v35 = vpop.f32.mrf.mxu0 }
  0xfa   :  { %v323_v36 = vpack.c.bf16 %v303_v35, %v300_v33 }
  0xfb   :  { %v5154_v37 = vpop.f32.mrf.mxu0 }
  0xfc   :  { %5156 = vmatmul.mubr.msk.bf16.vlgmr.msra.gmra.mxu1 %vm256_vm2, %v248_v29 }
  0xfd   :  { %5159 = vmatprep.mubr.msk.bf16.mxu1 %vm5738_vm0, %v5737_v0 }
 0x104   :  { %5160 = vmatmul.mubr.msk.bf16.gmra.mxu1 %vm256_vm2, %v249_v32 }
 0x105   :  { %5169 = vmatprep.mubr.msk.bf16.mxu1 %vm5738_vm0, %v5737_v0 }
 0x1b4   :  { %v5892_v38 = vpop.f32.mrf.mxu1 }
 0x1b6   :  { %v5147_v39 = vpop.f32.mrf.mxu1 }
 0x1b8   :  { %v225_v40 = vpop.f32.mrf.mxu1 }
 0x1ba   :  { %v5148_v41 = vpop.f32.mrf.mxu1 }
 0x1bc   :  { %v308_v42 = vpop.f32.mrf.mxu1 }
 0x1be   :  { %v5157_v43 = vpop.f32.mrf.mxu1 }
 0x1c0   :  { %v311_v44 = vpop.f32.mrf.mxu1 }
 0x1c1   :  { %v324_v51 = vpack.c.bf16 %v311_v44, %v308_v42  ;;  %v5381_v42 = vld [vmem:[%s7744_s6 + $0x60] sm:$0xff]  }
 0x1c2   :  { %v5158_v45 = vpop.f32.mrf.mxu1 }
 0x1c4   :  { %v316_v46 = vpop.f32.mrf.mxu1 }
 0x1c6   :  { %v5161_v47 = vpop.f32.mrf.mxu1 }
 0x1c8   :  { %v319_v48 = vpop.f32.mrf.mxu1 }
 0x1c9   :  { %v325_v49 = vpack.c.bf16 %v319_v48, %v316_v46 }
 0x1ca   :  { %v5162_v50 = vpop.f32.mrf.mxu1 }
 0x1cb   :  { %5164 = vmatpush3.bf16.msra.mxu1 %v325_v49  ;;  %v505_v50 = vsub.s32 3, %v5859_v16 }
 0x1cc   :  { %5165 = vmatprep.subr.bf16.mxu1 %v5737_v0 }
 0x1cf   :  { %5166 = vmatpush3.bf16.msra.mxu1 %v324_v51 }
 0x1d0   :  { %5167 = vmatprep.subr.bf16.mxu1 %v5737_v0 }
 0x1d3   :  { %5168 = vmatpush3.bf16.msra.mxu1 %v323_v36 }
 0x1d4   :  { %5197 = vmatprep.subr.bf16.mxu1 %v5737_v0 }
 0x1d6   :  { %5170 = vmatmul.mubr.msk.bf16.vlgmr.msra.gmra.mxu1 %vm345_vm3, %v5899_v52 }
 0x1d7   :  { %5173 = vmatprep.mubr.msk.bf16.mxu1 %vm5738_vm0, %v5737_v0 }
 0x1de   :  { %5174 = vmatmul.mubr.msk.bf16.gmra.mxu1 %vm345_vm3, %v5909_v53 }
 0x1df   :  { %5177 = vmatprep.mubr.msk.bf16.mxu1 %vm5738_vm0, %v5737_v0 }
 0x1e6   :  { %5178 = vmatmul.mubr.msk.bf16.gmra.mxu1 %vm345_vm3, %v5918_v54 }
 0x1e7   :  { %5203 = vmatprep.mubr.msk.bf16.mxu1 %vm5738_vm0, %v5737_v0 }
 0x296   :  { %v389_v59 = vpop.f32.mrf.mxu1 }
 0x297   :  { %v390_v61 = vadd.f32 %v389_v59, %v329_v58 }
 0x298   :  { %v5171_v60 = vpop.f32.mrf.mxu1 }
 0x299   :  { %v412_v2 = vmax.f32 %v390_v61, 0.0 }
 0x29a   :  { %v392_v62 = vpop.f32.mrf.mxu1 }
 0x29b   :  { %v393_v63 = vadd.f32 %v392_v62, %v329_v58 }
 0x29c   :  { %v5172_v1 = vpop.f32.mrf.mxu1 }
 0x29d   :  { %v413_v3 = vmax.f32 %v393_v63, 0.0 }
 0x29e   :  { %v397_v4 = vpop.f32.mrf.mxu1 }
 0x29f   :  { %v418_v5 = vpack.c.bf16 %v413_v3, %v412_v2  ;;  %v398_v7 = vadd.f32 %v397_v4, %v329_v58 }
 0x2a0   :  { %v5175_v6 = vpop.f32.mrf.mxu1 }
 0x2a1   :  { %5186 = vmatmul.mubr.msk.bf16.vlgmr.msra.gmra.mxu0 %vm433_vm4, %v418_v5  ;;  %v414_v11 = vmax.f32 %v398_v7, 0.0 }
 0x2a2   :  { %v400_v8 = vpop.f32.mrf.mxu1  ;;  %5189 = vmatprep.mubr.msk.bf16.mxu0 %vm5738_vm0, %v5737_v0 }
 0x2a3   :  { %v401_v9 = vadd.f32 %v400_v8, %v329_v58 }
 0x2a4   :  { %v5176_v10 = vpop.f32.mrf.mxu1 }
 0x2a5   :  { %v415_v12 = vmax.f32 %v401_v9, 0.0  ;;  %v570_v10 = vld [vmem:[%s7741_s3] sm:$0xf] }
 0x2a6   :  { %v405_v13 = vpop.f32.mrf.mxu1 }
 0x2a7   :  { %v419_v14 = vpack.c.bf16 %v415_v12, %v414_v11  ;;  %v406_v19 = vadd.f32 %v405_v13, %v329_v58  ;;  %v5382_v11 = vld [vmem:[%s7744_s6 + $0x58] sm:$0xff]   ;;  %v7750_v12 = vsub.s32 1, %v5859_v16 }
 0x2a8   :  { %v5179_v15 = vpop.f32.mrf.mxu1 }
 0x2a9   :  { %5190 = vmatmul.mubr.msk.bf16.gmra.mxu0 %vm433_vm4, %v419_v14  ;;  %v416_v23 = vmax.f32 %v406_v19, 0.0  ;;  %v160_v13 = vrot.slane %v5865_v18, %v7750_v12 }
 0x2aa   :  { %v408_v20 = vpop.f32.mrf.mxu1  ;;  %5193 = vmatprep.mubr.msk.bf16.mxu0 %vm5738_vm0, %v5737_v0 }
 0x2ab   :  { %v409_v21 = vadd.f32 %v408_v20, %v329_v58 }
 0x2ac   :  { %v5180_v22 = vpop.f32.mrf.mxu1 }
 0x2ad   :  { %v417_v24 = vmax.f32 %v409_v21, 0.0 }
 0x2af   :  { %v420_v25 = vpack.c.bf16 %v417_v24, %v416_v23  ;;  %v624_v23 = vsub.s32 4, %v5859_v16 }
 0x2b1   :  { %5194 = vmatmul.mubr.msk.bf16.gmra.mxu0 %vm433_vm4, %v420_v25  ;;  %v625_v24 = vrot.slane %v5865_v18, %v624_v23  ;;  %v800_v23 = vld [vmem:[%s7742_s4 + $0x38] sm:$0xff] }
 0x2b2   :  { %5221 = vmatprep.mubr.msk.bf16.mxu0 %vm5738_vm0, %v5737_v0 }
 0x361   :  { %v477_v26 = vpop.f32.mrf.mxu0 }
 0x363   :  { %v5187_v27 = vpop.f32.mrf.mxu0 }
 0x365   :  { %v480_v28 = vpop.f32.mrf.mxu0 }
 0x366   :  { %v500_v41 = vpack.c.bf16 %v480_v28, %v477_v26 }
 0x367   :  { %v5188_v29 = vpop.f32.mrf.mxu0 }
 0x369   :  { %v485_v30 = vpop.f32.mrf.mxu0 }
 0x36b   :  { %v5191_v31 = vpop.f32.mrf.mxu0 }
 0x36d   :  { %v488_v32 = vpop.f32.mrf.mxu0 }
 0x36e   :  { %v501_v40 = vpack.c.bf16 %v488_v32, %v485_v30  ;;  %v686_v30 = vsub.s32 5, %v5859_v16 }
 0x36f   :  { %v5192_v33 = vpop.f32.mrf.mxu0 }
 0x370   :  { %v687_v31 = vrot.slane %v5865_v18, %v686_v30 }
 0x371   :  { %v493_v34 = vpop.f32.mrf.mxu0 }
 0x373   :  { %v5195_v35 = vpop.f32.mrf.mxu0 }
 0x375   :  { %v496_v36 = vpop.f32.mrf.mxu0 }
 0x376   :  { %v502_v37 = vpack.c.bf16 %v496_v36, %v493_v34  ;;  %v5385_v36 = vld [vmem:[#allocation4 + $0x4c] ss:$36 sps:$4 sm:$0xff]  }
 0x377   :  { %v5196_v39 = vpop.f32.mrf.mxu0 }
 0x378   :  { %5198 = vmatpush3.bf16.msra.mxu1 %v502_v37  ;;  %v5388_v37 = vld [vmem:[#allocation4 + $0x54] ss:$36 sps:$4 sm:$0xff]   ;;  %v5383_v39 = vld [vmem:[#allocation4 + $0x48] ss:$36 sps:$4 sm:$0xff]  }
 0x379   :  { %5199 = vmatprep.subr.bf16.mxu1 %v5737_v0 }
 0x37c   :  { %5200 = vmatpush3.bf16.msra.mxu1 %v501_v40  ;;  %v5386_v40 = vld [vmem:[#allocation4 + $0x50] ss:$36 sps:$4 sm:$0xff]  }
 0x37d   :  { %5201 = vmatprep.subr.bf16.mxu1 %v5737_v0 }
 0x380   :  { %5202 = vmatpush3.bf16.msra.mxu1 %v500_v41  ;;  %v5389_v41 = vld [vmem:[#allocation4] ss:$36 sps:$4 sm:$0xff]  }
 0x381   :  { %5225 = vmatprep.subr.bf16.mxu1 %v5737_v0 }
 0x383   :  { %5204 = vmatmul.mubr.msk.bf16.vlgmr.msra.gmra.mxu1 %vm345_vm3, %v5899_v52 }
 0x384   :  { %5207 = vmatprep.mubr.msk.bf16.mxu1 %vm5738_vm0, %v5737_v0  ;;  %5226 = vmatpush3.bf16.msra.mxu1 %v5381_v42  ;;  %v5391_v42 = vld [vmem:[#allocation4 + $0x4] ss:$36 sps:$4 sm:$0xff]  }
 0x385   :  { %5227 = vmatprep.subr.bf16.mxu1 %v5737_v0 }
 0x388   :  { %5228 = vmatpush3.bf16.msra.mxu1 %v5382_v11  ;;  %v5404_v11 = vld [vmem:[#allocation4 + $0x18] ss:$36 sps:$4 sm:$0xff]  }
 0x389   :  { %1077 = vmatprep.subr.bf16.mxu1 %v5388_v37 }
 0x38b   :  { %5208 = vmatmul.mubr.msk.bf16.gmra.mxu1 %vm345_vm3, %v5909_v53  ;;  %v506_v53 = vrot.slane %v5865_v18, %v505_v50  ;;  %v7752_v18 = vmov 0  }
 0x38c   :  { %5211 = vmatprep.mubr.msk.bf16.mxu1 %vm5738_vm0, %v5737_v0 }
 0x393   :  { %5212 = vmatmul.mubr.msk.bf16.gmra.mxu1 %vm345_vm3, %v5918_v54 }
 0x394   :  { %5229 = vmatprep.mubr.msk.bf16.mxu1 %vm5738_vm0, %v5737_v0 }
 0x443   :  { %v541_v43 = vpop.f32.mrf.mxu1 }
 0x444   :  { %v542_v4 = vadd.f32 %v541_v43, %v506_v53  ;;  %v5392_v43 = vld [vmem:[#allocation4 + $0x8] ss:$36 sps:$4 sm:$0xff]  }
 0x445   :  { %v5205_v44 = vpop.f32.mrf.mxu1 }
 0x446   :  { %v564_v8 = vmax.f32 %v542_v4, 0.0  ;;  %v5394_v44 = vld [vmem:[#allocation4 + $0xc] ss:$36 sps:$4 sm:$0xff]   ;;  %v5395_v4 = vld [vmem:[#allocation4 + $0x58] ss:$36 sps:$4 sm:$0xff]  }
 0x447   :  { %v544_v45 = vpop.f32.mrf.mxu1 }
 0x448   :  { %v545_v1 = vadd.f32 %v544_v45, %v506_v53  ;;  %v5397_v45 = vld [vmem:[#allocation4 + $0x5c] ss:$36 sps:$4 sm:$0xff]  }
 0x449   :  { %v5206_v46 = vpop.f32.mrf.mxu1 }
 0x44a   :  { %v565_v6 = vmax.f32 %v545_v1, 0.0  ;;  %v5400_v46 = vld [vmem:[#allocation4 + $0x64] ss:$36 sps:$4 sm:$0xff]  }
 0x44b   :  { %v549_v47 = vpop.f32.mrf.mxu1  ;;  %v793_v1 = vld [vmem:[%s7742_s4] sm:$0xff] }
 0x44c   :  { %v550_v61 = vadd.f32 %v549_v47, %v506_v53  ;;  %v571_v9 = vpack.c.bf16 %v565_v6, %v564_v8  ;;  %v5403_v6 = vld [vmem:[#allocation4 + $0x14] ss:$36 sps:$4 sm:$0xff]   ;;  %v794_v8 = vld [vmem:[%s7742_s4 + $0x8] sm:$0xff] }
 0x44d   :  { %v5209_v48 = vpop.f32.mrf.mxu1 }
 0x44e   :  { %v566_v5 = vmax.f32 %v550_v61, 0.0 }
 0x44f   :  { %v552_v49 = vpop.f32.mrf.mxu1 }
 0x450   :  { %v553_v58 = vadd.f32 %v552_v49, %v506_v53 }
 0x451   :  { %v5210_v51 = vpop.f32.mrf.mxu1 }
 0x452   :  { %v567_v2 = vmax.f32 %v553_v58, 0.0 }
 0x453   :  { %v557_v52 = vpop.f32.mrf.mxu1 }
 0x454   :  { %v558_v55 = vadd.f32 %v557_v52, %v506_v53  ;;  %v572_v7 = vpack.c.bf16 %v567_v2, %v566_v5  ;;  %v5398_v5 = vld [vmem:[#allocation4 + $0x60] ss:$36 sps:$4 sm:$0xff]  }
 0x455   :  { %v5213_v54 = vpop.f32.mrf.mxu1 }
 0x456   :  { %v568_v62 = vmax.f32 %v558_v55, 0.0 }
 0x457   :  { %v560_v56 = vpop.f32.mrf.mxu1 }
 0x458   :  { %v561_v59 = vadd.f32 %v560_v56, %v506_v53 }
 0x459   :  { %v5214_v60 = vpop.f32.mrf.mxu1 }
 0x45a   :  { %v569_v63 = vmax.f32 %v561_v59, 0.0 }
 0x45c   :  { %v573_v3 = vpack.c.bf16 %v569_v63, %v568_v62 }
 0x45e   :  { %5216 = vmatpush3.bf16.msra.mxu0 %v573_v3 }
 0x45f   :  { %5217 = vmatprep.subr.bf16.mxu0 %v5737_v0 }
 0x462   :  { %5218 = vmatpush3.bf16.msra.mxu0 %v572_v7  ;;  %v5406_v7 = vld [vmem:[#allocation4 + $0x1c] ss:$36 sps:$4 sm:$0xff]  }
 0x463   :  { %5219 = vmatprep.subr.bf16.mxu0 %v5737_v0  ;;  %v5980_v0 = vadd.f32 %v5892_v38, %v160_v13  ;;  %v5407_v13 = vld [vmem:[#allocation4 + $0x68] ss:$36 sps:$4 sm:$0xff]  }
 0x465   :  { %v228_v14 = vmax.f32 %v5980_v0, 0.0 }
 0x466   :  { %5220 = vmatpush3.bf16.msra.mxu0 %v571_v9  ;;  %v795_v9 = vld [vmem:[%s7742_s4 + $0x10] sm:$0xff] }
 0x467   :  { %964 = vmatprep.subr.bf16.mxu0 %v5385_v36  ;;  %v6020_v0 = vpack.c.bf16 %v795_v9, %v794_v8  ;;  %v5414_v36 = vld [vmem:[#allocation2 + $0xc] ss:$36 sps:$4 sm:$0xff]  }
 0x469   :  { %5222 = vmatmul.mubr.msk.bf16.vlgmr.msra.gmra.mxu0 %vm345_vm3, %v570_v10  ;;  %v5401_v10 = vld [vmem:[#allocation4 + $0x10] ss:$36 sps:$4 sm:$0xff]  }
 0x46a   :  { %965 = vmatpush1.bf16.msra.mxu0 %v5383_v39  ;;  %984 = vmatprep.mubr.bf16.mxu0 %v7752_v18 }
 0x46b   :  { %966 = vmatprep.subr.bf16.mxu0 %v5391_v42 }
 0x46e   :  { %967 = vmatpush1.bf16.msra.mxu0 %v5389_v41 }
 0x46f   :  { %1190 = vmatprep.subr.bf16.mxu0 %v5397_v45 }
 0x529   :  { %v5983_v15 = vpop.f32.mrf.mxu0 }
 0x52a   :  { %v621_v19 = vpack.c.bf16 %v228_v14, %v5983_v15 }
 0x52b   :  { %v5223_v20 = vpop.f32.mrf.mxu0 }
 0x52c   :  { %5230 = vmatmul.mubr.msk.bf16.vlgmr.msra.gmra.mxu1 %vm433_vm4, %v621_v19  ;;  %v798_v20 = vld [vmem:[%s7742_s4 + $0x28] sm:$0xff] }
 0x52d   :  { %v614_v21 = vpop.f32.mrf.mxu0  ;;  %1078 = vmatpush1.bf16.msra.mxu1 %v5386_v40  ;;  %1097 = vmatprep.mubr.bf16.mxu1 %v7752_v18 }
 0x52e   :  { %1079 = vmatprep.subr.bf16.mxu1 %v5394_v44  ;;  %v799_v21 = vld [vmem:[%s7742_s4 + $0x30] sm:$0xff] }
 0x52f   :  { %v5224_v22 = vpop.f32.mrf.mxu0 }
 0x530   :  { %v6048_v22 = vpack.c.bf16 %v799_v21, %v798_v20 }
 0x531   :  { %1080 = vmatpush1.bf16.msra.mxu1 %v5392_v43 }
 0x532   :  { %1303 = vmatprep.subr.bf16.mxu1 %v5400_v46 }
 0x5ec   :  { %v675_v25 = vpop.f32.mrf.mxu1 }
 0x5ed   :  { %v676_v38 = vadd.f32 %v675_v25, %v625_v24 }
 0x5ee   :  { %v5231_v26 = vpop.f32.mrf.mxu1 }
 0x5ef   :  { %5541 = vtanh.f32 %v676_v38  ;;  %v802_v38 = vld [vmem:[%s7742_s4 + $0x48] sm:$0xff]  ;;  %v803_v26 = vld [vmem:[%s7742_s4 + $0x50] sm:$0xff] }
 0x5f0   :  { %v678_v27 = vpop.f32.mrf.mxu1 }
 0x5f1   :  { %v679_v28 = vadd.f32 %v678_v27, %v625_v24  ;;  %v801_v24 = vld [vmem:[%s7742_s4 + $0x40] sm:$0xff]  ;;  %v833_v27 = vpack.c.bf16 %v803_v26, %v802_v38 }
 0x5f2   :  { %v5232_v29 = vpop.f32.mrf.mxu1  ;;  %v6062_v25 = vpack.c.bf16 %v801_v24, %v800_v23 }
 0x5f3   :  { %5543 = vtanh.f32 %v679_v28  ;;  %v804_v28 = vld [vmem:[%s7742_s4 + $0x58] sm:$0xff]  ;;  %v805_v29 = vld [vmem:[%s7742_s4 + $0x60] sm:$0xff] }
 0x5f4   :  { %v834_v30 = vpack.c.bf16 %v805_v29, %v804_v28 }
 0x5fc   :  { %v5542_v32 = vpop.eup %5541 }
 0x5fd   :  { %v688_v33 = vmul.f32 %v5542_v32, %v687_v31  ;;  %v807_v32 = vld [vmem:[%s7742_s4 + $0x70] sm:$0xff] }
 0x5ff   :  { %690 = vadd.xlane.f32.xlu0 %v688_v33 }
 0x600   :  { %v5544_v34 = vpop.eup %5543 }
 0x601   :  { %v689_v35 = vmul.f32 %v5544_v34, %v687_v31  ;;  %v806_v31 = vld [vmem:[%s7742_s4 + $0x68] sm:$0xff]  ;;  %v5408_v34 = vld [vmem:[#allocation4 + $0x20] ss:$36 sps:$4 sm:$0xff]  }
 0x602   :  { %v835_v33 = vpack.c.bf16 %v807_v32, %v806_v31 }
 0x603   :  { %692 = vadd.xlane.f32.xlu0 %v689_v35  ;;  %v5411_v35 = vld [vmem:[#allocation2 + $0x4] ss:$36 sps:$4 sm:$0xff]  }
 0x688   :  { %v691_v47 = vpop.xlane.xlu0 %690 }
 0x68c   :  { %v693_v48 = vpop.xlane.xlu0 %692 }
 0x68d   :  { %v694_v49 = vmax.f32 %v691_v47, %v693_v48 }
 0x68f   :  { %v695_v50 = vsub.f32 %v691_v47, %v694_v49  ;;  %v698_v51 = vsub.f32 %v693_v48, %v694_v49 }
 0x691   :  { %v696_v52 = vmul.f32 1.442695, %v695_v50  ;;  %v699_v53 = vmul.f32 1.442695, %v698_v51 }
 0x693   :  { %5545 = vpow2.f32 %v696_v52 }
 0x694   :  { %5547 = vpow2.f32 %v699_v53 }
 0x6a0   :  { %v5546_v54 = vpop.eup %5545 }
 0x6a1   :  { %v5548_v55 = vpop.eup %5547 }
 0x6a2   :  { %v701_v56 = vadd.f32 %v5548_v55, %v5546_v54 }
 0x6a4   :  { %5549 = vrcp.f32 %v701_v56 }
 0x6b1   :  { %v5550_v58 = vpop.eup %5549 }
 0x6b2   :  { %v705_v59 = vmul.f32 %v5550_v58, %v5548_v55  ;;  %v704_v60 = vmul.f32 %v5550_v58, %v5546_v54 }
 0x6b4   :  { %v706_v61 = vmul.f32 %v704_v60, %v5983_v15  ;;  %v707_v62 = vmul.f32 %v705_v59, %v228_v14  ;;  %v710_v63 = vsel %vm709_vm5, %v704_v60, %v705_v59  ;;  %v796_v14 = vld [vmem:[%s7742_s4 + $0x18] sm:$0xff]  ;;  %v797_v15 = vld [vmem:[%s7742_s4 + $0x20] sm:$0xff] }
 0x6b5   :  { %712 = vst.msk [vmem:[%s7748_s10] sm:$0xff] %vm711_vm6, %v710_v63  ;;  %v6034_v19 = vpack.c.bf16 %v797_v15, %v796_v14 }
 0x6b6   :  { %v708_v2 = vadd.f32 %v707_v62, %v706_v61 }
 0x6b8   :  { %v6006_v3 = vpack.c.bf16 %v793_v1, %v708_v2 }
 0x6ba   :  { %4333 = vmatmul.mubr.msk.bf16.vlgmr.msra.gmra.mxu0 %vm433_vm4, %v6006_v3  ;;  %4341 = vmatmul.mubr.msk.bf16.vlgmr.msra.gmra.mxu1 %vm433_vm4, %v6006_v3 }
 0x6bb   :  { %994 = vmatprep.mubr.bf16.mxu0 %v7752_v18  ;;  %1107 = vmatprep.mubr.bf16.mxu1 %v7752_v18 }
 0x6bc   :  { %1191 = vmatpush1.bf16.msra.mxu0 %v5395_v4  ;;  %1304 = vmatpush1.bf16.msra.mxu1 %v5398_v5 }
 0x6bd   :  { %1192 = vmatprep.subr.bf16.mxu0 %v5403_v6  ;;  %1305 = vmatprep.subr.bf16.mxu1 %v5406_v7 }
 0x6c0   :  { %1193 = vmatpush1.bf16.msra.mxu0 %v5401_v10  ;;  %1306 = vmatpush1.bf16.msra.mxu1 %v5404_v11 }
 0x6c1   :  { %5233 = vmatprep.subr.bf16.mxu0 %v5407_v13 }
 0x6c2   :  { %4334 = vmatmul.mubr.msk.bf16.gmra.mxu0 %vm433_vm4, %v6020_v0  ;;  %4342 = vmatmul.mubr.msk.bf16.gmra.mxu1 %vm433_vm4, %v6020_v0 }
 0x6c3   :  { %1004 = vmatprep.mubr.bf16.mxu0 %v7752_v18  ;;  %1117 = vmatprep.mubr.bf16.mxu1 %v7752_v18 }
 0x6ca   :  { %4335 = vmatmul.mubr.msk.bf16.gmra.mxu0 %vm433_vm4, %v6034_v19  ;;  %4343 = vmatmul.mubr.msk.bf16.gmra.mxu1 %vm433_vm4, %v6034_v19 }
 0x6cb   :  { %1014 = vmatprep.mubr.bf16.mxu0 %v7752_v18  ;;  %1127 = vmatprep.mubr.bf16.mxu1 %v7752_v18 }
 0x6d2   :  { %4336 = vmatmul.mubr.msk.bf16.gmra.mxu0 %vm433_vm4, %v6048_v22  ;;  %4344 = vmatmul.mubr.msk.bf16.gmra.mxu1 %vm433_vm4, %v6048_v22 }
 0x6d3   :  { %1024 = vmatprep.mubr.bf16.mxu0 %v7752_v18  ;;  %1137 = vmatprep.mubr.bf16.mxu1 %v7752_v18 }
 0x6da   :  { %4337 = vmatmul.mubr.msk.bf16.gmra.mxu0 %vm433_vm4, %v6062_v25  ;;  %4345 = vmatmul.mubr.msk.bf16.gmra.mxu1 %vm433_vm4, %v6062_v25 }
 0x6db   :  { %1034 = vmatprep.mubr.bf16.mxu0 %v7752_v18  ;;  %1147 = vmatprep.mubr.bf16.mxu1 %v7752_v18 }
 0x6e2   :  { %4338 = vmatmul.mubr.msk.bf16.gmra.mxu0 %vm433_vm4, %v833_v27  ;;  %4346 = vmatmul.mubr.msk.bf16.gmra.mxu1 %vm433_vm4, %v833_v27 }
 0x6e3   :  { %1044 = vmatprep.mubr.bf16.mxu0 %v7752_v18  ;;  %1157 = vmatprep.mubr.bf16.mxu1 %v7752_v18 }
 0x6ea   :  { %4339 = vmatmul.mubr.msk.bf16.gmra.mxu0 %vm433_vm4, %v834_v30  ;;  %4347 = vmatmul.mubr.msk.bf16.gmra.mxu1 %vm433_vm4, %v834_v30 }
 0x6eb   :  { %1054 = vmatprep.mubr.bf16.mxu0 %v7752_v18  ;;  %1167 = vmatprep.mubr.bf16.mxu1 %v7752_v18 }
 0x6f2   :  { %4340 = vmatmul.mubr.msk.bf16.gmra.mxu0 %vm433_vm4, %v835_v33  ;;  %4348 = vmatmul.mubr.msk.bf16.gmra.mxu1 %vm433_vm4, %v835_v33 }
 0x6f3   :  { %1210 = vmatprep.mubr.bf16.mxu0 %v7752_v18  ;;  %1323 = vmatprep.mubr.bf16.mxu1 %v7752_v18 }
 0x6fa   :  { %4349 = vmatmul.mubr.msk.bf16.vlgmr.msra.gmra.mxu0 %vm433_vm4, %v6006_v3  ;;  %4357 = vmatmul.mubr.msk.bf16.vlgmr.msra.gmra.mxu1 %vm433_vm4, %v6006_v3 }
 0x6fb   :  { %1220 = vmatprep.mubr.bf16.mxu0 %v7752_v18  ;;  %1333 = vmatprep.mubr.bf16.mxu1 %v7752_v18 }
 0x6fc   :  { %5234 = vmatpush3.bf16.msra.mxu0 %v5407_v13 }
 0x6fd   :  { %5235 = vmatprep.subr.bf16.mxu0 %v5408_v34 }
 0x700   :  { %5236 = vmatpush3.bf16.msra.mxu0 %v5408_v34 }
 0x702   :  { %4350 = vmatmul.mubr.msk.bf16.gmra.mxu0 %vm433_vm4, %v6020_v0  ;;  %4358 = vmatmul.mubr.msk.bf16.gmra.mxu1 %vm433_vm4, %v6020_v0 }
 0x703   :  { %1230 = vmatprep.mubr.bf16.mxu0 %v7752_v18  ;;  %1343 = vmatprep.mubr.bf16.mxu1 %v7752_v18 }
 0x70a   :  { %4351 = vmatmul.mubr.msk.bf16.gmra.mxu0 %vm433_vm4, %v6034_v19  ;;  %4359 = vmatmul.mubr.msk.bf16.gmra.mxu1 %vm433_vm4, %v6034_v19 }
 0x70b   :  { %1240 = vmatprep.mubr.bf16.mxu0 %v7752_v18  ;;  %1353 = vmatprep.mubr.bf16.mxu1 %v7752_v18 }
 0x712   :  { %4352 = vmatmul.mubr.msk.bf16.gmra.mxu0 %vm433_vm4, %v6048_v22  ;;  %4360 = vmatmul.mubr.msk.bf16.gmra.mxu1 %vm433_vm4, %v6048_v22 }
 0x713   :  { %1250 = vmatprep.mubr.bf16.mxu0 %v7752_v18  ;;  %1363 = vmatprep.mubr.bf16.mxu1 %v7752_v18 }
 0x71a   :  { %4353 = vmatmul.mubr.msk.bf16.gmra.mxu0 %vm433_vm4, %v6062_v25  ;;  %4361 = vmatmul.mubr.msk.bf16.gmra.mxu1 %vm433_vm4, %v6062_v25 }
 0x71b   :  { %1260 = vmatprep.mubr.bf16.mxu0 %v7752_v18  ;;  %1373 = vmatprep.mubr.bf16.mxu1 %v7752_v18 }
 0x722   :  { %4354 = vmatmul.mubr.msk.bf16.gmra.mxu0 %vm433_vm4, %v833_v27  ;;  %4362 = vmatmul.mubr.msk.bf16.gmra.mxu1 %vm433_vm4, %v833_v27 }
 0x723   :  { %1270 = vmatprep.mubr.bf16.mxu0 %v7752_v18  ;;  %1383 = vmatprep.mubr.bf16.mxu1 %v7752_v18 }
 0x72a   :  { %4355 = vmatmul.mubr.msk.bf16.gmra.mxu0 %vm433_vm4, %v834_v30  ;;  %4363 = vmatmul.mubr.msk.bf16.gmra.mxu1 %vm433_vm4, %v834_v30 }
 0x72b   :  { %1280 = vmatprep.mubr.bf16.mxu0 %v7752_v18  ;;  %1393 = vmatprep.mubr.bf16.mxu1 %v7752_v18 }
 0x732   :  { %4356 = vmatmul.mubr.msk.bf16.gmra.mxu0 %vm433_vm4, %v835_v33  ;;  %4364 = vmatmul.mubr.msk.bf16.gmra.mxu1 %vm433_vm4, %v835_v33 }
 0x733   :  { %5237 = vmatprep.mubr.msk.bf16.mxu0 %vm433_vm4, %v6006_v3  ;;  %1973 = vmatprep.mubr.bf16.mxu1 %v5411_v35 }
 0x73a   :  { %5238 = vmatmul.mubr.msk.bf16.vlgmr.msra.gmra.mxu0 %vm433_vm4, %v6020_v0 }
 0x73b   :  { %5241 = vmatprep.mubr.msk.bf16.mxu0 %vm433_vm4, %v6034_v19 }
 0x742   :  { %5242 = vmatmul.mubr.msk.bf16.gmra.mxu0 %vm433_vm4, %v6048_v22 }
 0x743   :  { %5245 = vmatprep.mubr.msk.bf16.mxu0 %vm433_vm4, %v6062_v25 }
 0x74a   :  { %5246 = vmatmul.mubr.msk.bf16.gmra.mxu0 %vm433_vm4, %v833_v27 }
 0x74b   :  { %5249 = vmatprep.mubr.msk.bf16.mxu0 %vm433_vm4, %v834_v30 }
 0x752   :  { %5250 = vmatmul.mubr.msk.bf16.gmra.mxu0 %vm433_vm4, %v835_v33 }
 0x753   :  { %2070 = vmatprep.mubr.bf16.mxu0 %v5414_v36 }
 0x77a   :  { %v6153_v37 = vpop.f32.mrf.mxu0  ;;  %v6155_v39 = vpop.f32.mrf.mxu1 }
 0x77b   :  { %7792 = vst [vmem:[#allocation9_spill] sm:$0xff] %v6153_v37  ;;  %7793 = vst [vmem:[#allocation10_spill] sm:$0xff] %v6155_v39 }
 0x77c   :  { %v6157_v40 = vpop.f32.mrf.mxu0  ;;  %v6159_v41 = vpop.f32.mrf.mxu1 }
 0x77d   :  { %7794 = vst [vmem:[#allocation11_spill] sm:$0xff] %v6159_v41 }
 0x77e   :  { %v6161_v42 = vpop.f32.mrf.mxu0  ;;  %v6163_v43 = vpop.f32.mrf.mxu1 }
 0x77f   :  { %7795 = vst [vmem:[#allocation12_spill] sm:$0xff] %v6161_v42  ;;  %7796 = vst [vmem:[#allocation13_spill] sm:$0xff] %v6163_v43 }
 0x780   :  { %v6169_v46 = vpop.f32.mrf.mxu0  ;;  %v6171_v47 = vpop.f32.mrf.mxu1 }
 0x781   :  { %7797 = vst [vmem:[#allocation14_spill] sm:$0xff] %v6169_v46  ;;  %7798 = vst [vmem:[#allocation15_spill] sm:$0xff] %v6171_v47 }
 0x782   :  { %v6173_v48 = vpop.f32.mrf.mxu0  ;;  %v6175_v49 = vpop.f32.mrf.mxu1 }
 0x783   :  { %7799 = vst [vmem:[#allocation16_spill] sm:$0xff] %v6173_v48  ;;  %7800 = vst [vmem:[#allocation17_spill] sm:$0xff] %v6175_v49 }
 0x784   :  { %v6177_v50 = vpop.f32.mrf.mxu0  ;;  %v6179_v51 = vpop.f32.mrf.mxu1 }
 0x786   :  { %v6181_v52 = vpop.f32.mrf.mxu0  ;;  %v6183_v53 = vpop.f32.mrf.mxu1 }
 0x787   :  { %7801 = vst [vmem:[#allocation18_spill] sm:$0xff] %v6181_v52  ;;  %7802 = vst [vmem:[#allocation19_spill] sm:$0xff] %v6183_v53 }
 0x788   :  { %v6189_v56 = vpop.f32.mrf.mxu0  ;;  %v6191_v58 = vpop.f32.mrf.mxu1 }
 0x78a   :  { %v6193_v59 = vpop.f32.mrf.mxu0  ;;  %v6195_v60 = vpop.f32.mrf.mxu1 }
 0x78c   :  { %v6197_v61 = vpop.f32.mrf.mxu0  ;;  %v6199_v62 = vpop.f32.mrf.mxu1 }
 0x78e   :  { %v6201_v63 = vpop.f32.mrf.mxu0  ;;  %v6203_v1 = vpop.f32.mrf.mxu1 }
 0x790   :  { %v6205_v2 = vpop.f32.mrf.mxu0  ;;  %v6207_v3 = vpop.f32.mrf.mxu1 }
 0x792   :  { %v6209_v4 = vpop.f32.mrf.mxu0  ;;  %v6211_v5 = vpop.f32.mrf.mxu1 }
 0x794   :  { %v6213_v6 = vpop.f32.mrf.mxu0  ;;  %v6215_v7 = vpop.f32.mrf.mxu1 }
 0x796   :  { %v6217_v8 = vpop.f32.mrf.mxu0  ;;  %v6219_v9 = vpop.f32.mrf.mxu1 }
 0x798   :  { %v6221_v10 = vpop.f32.mrf.mxu0  ;;  %v6223_v11 = vpop.f32.mrf.mxu1 }
 0x79a   :  { %v6225_v13 = vpop.f32.mrf.mxu0  ;;  %v6227_v0 = vpop.f32.mrf.mxu1 }
 0x79c   :  { %v6229_v14 = vpop.f32.mrf.mxu0  ;;  %v6231_v15 = vpop.f32.mrf.mxu1 }
 0x79e   :  { %v6233_v19 = vpop.f32.mrf.mxu0  ;;  %v6235_v20 = vpop.f32.mrf.mxu1 }
 0x7a0   :  { %v6237_v21 = vpop.f32.mrf.mxu0  ;;  %v6239_v22 = vpop.f32.mrf.mxu1 }
 0x7a2   :  { %v6241_v23 = vpop.f32.mrf.mxu0  ;;  %v6243_v24 = vpop.f32.mrf.mxu1 }
 0x7a4   :  { %v1038_v25 = vpop.f32.mrf.mxu0  ;;  %v1151_v38 = vpop.f32.mrf.mxu1 }
 0x7a6   :  { %v1040_v26 = vpop.f32.mrf.mxu0  ;;  %v1153_v27 = vpop.f32.mrf.mxu1 }
 0x7a8   :  { %v1042_v28 = vpop.f32.mrf.mxu0  ;;  %v1155_v29 = vpop.f32.mrf.mxu1 }
 0x7aa   :  { %v1046_v30 = vpop.f32.mrf.mxu0  ;;  %v1159_v31 = vpop.f32.mrf.mxu1 }
 0x7ac   :  { %v1048_v32 = vpop.f32.mrf.mxu0  ;;  %v1161_v33 = vpop.f32.mrf.mxu1 }
 0x7ae   :  { %v1050_v34 = vpop.f32.mrf.mxu0  ;;  %v1163_v35 = vpop.f32.mrf.mxu1 }
 0x7af   :  { %v1557_v47 = vpack.c.bf16 %v1163_v35, %v1159_v31  ;;  %v7820_v31 = vld [vmem:[#allocation16_spill] sm:$0xff] }
 0x7b0   :  { %v1052_v36 = vpop.f32.mrf.mxu0  ;;  %v1165_v57 = vpop.f32.mrf.mxu1 }
 0x7b1   :  { %v1558_v43 = vpack.c.bf16 %v1165_v57, %v1161_v33  ;;  %v1556_v52 = vpack.c.bf16 %v1052_v36, %v1048_v32  ;;  %v7822_v33 = vld [vmem:[#allocation19_spill] sm:$0xff] }
 0x7b2   :  { %v1056_v12 = vpop.f32.mrf.mxu0  ;;  %v1169_v17 = vpop.f32.mrf.mxu1 }
 0x7b4   :  { %v1058_v18 = vpop.f32.mrf.mxu0  ;;  %v1171_v45 = vpop.f32.mrf.mxu1 }
 0x7b6   :  { %v1060_v44 = vpop.f32.mrf.mxu0  ;;  %v1173_v55 = vpop.f32.mrf.mxu1 }
 0x7b7   :  { %v1566_v54 = vpack.c.bf16 %v1173_v55, %v1169_v17  ;;  %v1564_v49 = vpack.c.bf16 %v1060_v44, %v1056_v12  ;;  %v1549_v17 = vpack.c.bf16 %v1155_v29, %v1151_v38  ;;  %v1538_v55 = vpack.c.bf16 %v6237_v21, %v6229_v14  ;;  %v7817_v29 = vld [vmem:[#allocation11_spill] sm:$0xff]  ;;  %v5435_v21 = vld [vmem:[#allocation2 + $0x124] ss:$36 sps:$4 sm:$0xff]  }
 0x7b8   :  { %v1062_v16 = vpop.f32.mrf.mxu0  ;;  %v1175_v39 = vpop.f32.mrf.mxu1 }
 0x7b9   :  { %v1565_v37 = vpack.c.bf16 %v1062_v16, %v1058_v18  ;;  %v1567_v42 = vpack.c.bf16 %v1175_v39, %v1171_v45  ;;  %v1555_v16 = vpack.c.bf16 %v1050_v34, %v1046_v30  ;;  %v1547_v18 = vpack.c.bf16 %v1042_v28, %v1038_v25  ;;  %v7823_v34 = vld [vmem:[#allocation17_spill] sm:$0xff] }
 0x7ba   :  { %v6245_v53 = vpop.f32.mrf.mxu0  ;;  %v6247_v48 = vpop.f32.mrf.mxu1  ;;  %v7824_v35 = vpack.c.bf16 %v7822_v33, %v7823_v34 }
 0x7bb   :  { %7803 = vst [vmem:[#allocation20_spill] sm:$0xff] %v6245_v53  ;;  %7804 = vst [vmem:[#allocation21_spill] sm:$0xff] %v6247_v48  ;;  %4561 = vmatprep.subr.bf16.mxu1 %v1565_v37  ;;  %4625 = vmatprep.subr.bf16.mxu0 %v1567_v42  ;;  %v1548_v42 = vpack.c.bf16 %v1153_v27, %v6243_v24  ;;  %v1539_v24 = vpack.c.bf16 %v6235_v20, %v6227_v0  ;;  %v5438_v20 = vld [vmem:[#allocation2 + $0x12c] ss:$36 sps:$4 sm:$0xff]  }
 0x7bc   :  { %v6249_v41 = vpop.f32.mrf.mxu0  ;;  %v6251_v46 = vpop.f32.mrf.mxu1  ;;  %4562 = vmatpush3.bf16.msra.mxu1 %v1564_v49  ;;  %4626 = vmatpush3.bf16.msra.mxu0 %v1566_v54  ;;  %v1546_v49 = vpack.c.bf16 %v1040_v26, %v6241_v23  ;;  %v1529_v0 = vpack.c.bf16 %v6221_v10, %v6213_v6  ;;  %v1528_v6 = vpack.c.bf16 %v6217_v8, %v6209_v4 }
 0x7bd   :  { %7805 = vst [vmem:[#allocation22_spill] sm:$0xff] %v6249_v41  ;;  %7806 = vst [vmem:[#allocation23_spill] sm:$0xff] %v6251_v46  ;;  %4563 = vmatprep.subr.bf16.mxu1 %v1556_v52  ;;  %4627 = vmatprep.subr.bf16.mxu0 %v1558_v43  ;;  %v1540_v43 = vpack.c.bf16 %v6239_v22, %v6231_v15  ;;  %v1531_v15 = vpack.c.bf16 %v6223_v11, %v6215_v7 }
 0x7be   :  { %v6253_v57 = vpop.f32.mrf.mxu0  ;;  %v6255_v12 = vpop.f32.mrf.mxu1  ;;  %v1537_v22 = vpack.c.bf16 %v6233_v19, %v6225_v13  ;;  %v1530_v7 = vpack.c.bf16 %v6219_v9, %v6211_v5  ;;  %v1520_v19 = vpack.c.bf16 %v6205_v2, %v6197_v61  ;;  %v1522_v5 = vpack.c.bf16 %v6207_v3, %v6199_v62 }
 0x7bf   :  { %7807 = vst [vmem:[#allocation24_spill] sm:$0xff] %v6253_v57  ;;  %7808 = vst [vmem:[#allocation25_spill] sm:$0xff] %v6255_v12  ;;  %v1519_v4 = vpack.c.bf16 %v6201_v63, %v6193_v59  ;;  %v1521_v8 = vpack.c.bf16 %v6203_v1, %v6195_v60  ;;  %v1511_v62 = vpack.c.bf16 %v6189_v56, %v6177_v50  ;;  %v7816_v63 = vld [vmem:[#allocation14_spill] sm:$0xff]  ;;  %v7818_v50 = vld [vmem:[#allocation15_spill] sm:$0xff] }
 0x7c0   :  { %v6262_v44 = vpop.f32.mrf.mxu0  ;;  %v6264_v45 = vpop.f32.mrf.mxu1  ;;  %4564 = vmatpush3.bf16.msra.mxu1 %v1555_v16  ;;  %4628 = vmatpush3.bf16.msra.mxu0 %v1557_v47  ;;  %v1513_v2 = vpack.c.bf16 %v6191_v58, %v6179_v51  ;;  %v1502_v1 = vpack.c.bf16 %v7816_v63, %v6157_v40  ;;  %v1504_v56 = vpack.c.bf16 %v7818_v50, %v7817_v29  ;;  %v7819_v58 = vld [vmem:[#allocation18_spill] sm:$0xff]  ;;  %v5412_v16 = vld [vmem:[#allocation2 + $0x8] ss:$36 sps:$4 sm:$0xff]  }
 0x7c1   :  { %7809 = vst [vmem:[#allocation26_spill] sm:$0xff] %v6262_v44  ;;  %7810 = vst [vmem:[#allocation27_spill] sm:$0xff] %v6264_v45  ;;  %4565 = vmatprep.subr.bf16.mxu1 %v1547_v18  ;;  %4629 = vmatprep.subr.bf16.mxu0 %v1549_v17  ;;  %v7821_v32 = vpack.c.bf16 %v7819_v58, %v7820_v31  ;;  %v5409_v17 = vld [vmem:[#allocation2] ss:$36 sps:$4 sm:$0xff]   ;;  %v5420_v63 = vld [vmem:[#allocation2 + $0x50] ss:$36 sps:$4 sm:$0xff]  }
 0x7c2   :  { %v6269_v52 = vpop.f32.mrf.mxu0  ;;  %v6271_v54 = vpop.f32.mrf.mxu1  ;;  %v5423_v50 = vld [vmem:[#allocation2 + $0x94] ss:$36 sps:$4 sm:$0xff]  }
 0x7c3   :  { %7811 = vst [vmem:[#allocation28_spill] sm:$0xff] %v6269_v52  ;;  %7812 = vst [vmem:[#allocation29_spill] sm:$0xff] %v6271_v54 }
 0x7c4   :  { %v6277_v25 = vpop.f32.mrf.mxu0  ;;  %v6279_v47 = vpop.f32.mrf.mxu1  ;;  %4566 = vmatpush3.bf16.msra.mxu1 %v1546_v49  ;;  %4630 = vmatpush3.bf16.msra.mxu0 %v1548_v42  ;;  %v7826_v49 = vld [vmem:[#allocation9_spill] sm:$0xff] }
 0x7c5   :  { %4567 = vmatprep.subr.bf16.mxu1 %v1538_v55  ;;  %4631 = vmatprep.subr.bf16.mxu0 %v1540_v43  ;;  %v7825_v43 = vld [vmem:[#allocation12_spill] sm:$0xff] }
 0x7c6   :  { %v6285_v23 = vpop.f32.mrf.mxu0  ;;  %v6287_v14 = vpop.f32.mrf.mxu1  ;;  %v7827_v55 = vpack.c.bf16 %v7825_v43, %v7826_v49 }
 0x7c7   :  { %7813 = vst [vmem:[#allocation30_spill] sm:$0xff] %v6285_v23  ;;  %7814 = vst [vmem:[#allocation31_spill] sm:$0xff] %v6287_v14 }
 0x7c8   :  { %v6297_v11 = vpop.f32.mrf.mxu0  ;;  %v6299_v38 = vpop.f32.mrf.mxu1  ;;  %4568 = vmatpush3.bf16.msra.mxu1 %v1537_v22  ;;  %4632 = vmatpush3.bf16.msra.mxu0 %v1539_v24  ;;  %v7828_v24 = vld [vmem:[#allocation13_spill] sm:$0xff] }
 0x7c9   :  { %7815 = vst [vmem:[#allocation32_spill] sm:$0xff] %v6299_v38  ;;  %4569 = vmatprep.subr.bf16.mxu1 %v1529_v0  ;;  %4633 = vmatprep.subr.bf16.mxu0 %v1531_v15  ;;  %v7829_v15 = vld [vmem:[#allocation10_spill] sm:$0xff] }
 0x7ca   :  { %v6303_v10 = vpop.f32.mrf.mxu0  ;;  %v6305_v13 = vpop.f32.mrf.mxu1  ;;  %v7830_v22 = vpack.c.bf16 %v7828_v24, %v7829_v15  ;;  %v5415_v0 = vld [vmem:[#allocation2 + $0x4c] ss:$36 sps:$4 sm:$0xff]   ;;  %v5432_v24 = vld [vmem:[#allocation2 + $0xe4] ss:$36 sps:$4 sm:$0xff]  }
 0x7cc   :  { %v6311_v9 = vpop.f32.mrf.mxu0  ;;  %v6313_v26 = vpop.f32.mrf.mxu1  ;;  %4570 = vmatpush3.bf16.msra.mxu1 %v1528_v6  ;;  %4634 = vmatpush3.bf16.msra.mxu0 %v1530_v7  ;;  %v5417_v7 = vld [vmem:[#allocation2 + $0x54] ss:$36 sps:$4 sm:$0xff]  }
 0x7cd   :  { %4571 = vmatprep.subr.bf16.mxu1 %v1520_v19  ;;  %4635 = vmatprep.subr.bf16.mxu0 %v1522_v5 }
 0x7ce   :  { %v6319_v27 = vpop.f32.mrf.mxu0  ;;  %v6321_v61 = vpop.f32.mrf.mxu1 }
 0x7d0   :  { %v6327_v3 = vpop.f32.mrf.mxu0  ;;  %v6329_v28 = vpop.f32.mrf.mxu1  ;;  %4572 = vmatpush3.bf16.msra.mxu1 %v1519_v4  ;;  %4636 = vmatpush3.bf16.msra.mxu0 %v1521_v8 }
 0x7d1   :  { %4573 = vmatprep.subr.bf16.mxu1 %v1511_v62  ;;  %4637 = vmatprep.subr.bf16.mxu0 %v1513_v2  ;;  %v5419_v2 = vld [vmem:[#allocation2 + $0x48] ss:$36 sps:$4 sm:$0xff]  }
 0x7d2   :  { %v6331_v59 = vpop.f32.mrf.mxu0  ;;  %v6333_v60 = vpop.f32.mrf.mxu1 }
 0x7d4   :  { %v6339_v30 = vpop.f32.mrf.mxu0  ;;  %v6341_v51 = vpop.f32.mrf.mxu1  ;;  %4574 = vmatpush3.bf16.msra.mxu1 %v7821_v32  ;;  %4638 = vmatpush3.bf16.msra.mxu0 %v7824_v35 }
 0x7d5   :  { %4575 = vmatprep.subr.bf16.mxu1 %v1502_v1  ;;  %4639 = vmatprep.subr.bf16.mxu0 %v1504_v56  ;;  %v5426_v56 = vld [vmem:[#allocation2 + $0x9c] ss:$36 sps:$4 sm:$0xff]  }
 0x7d6   :  { %v6349_v36 = vpop.f32.mrf.mxu0  ;;  %v6351_v40 = vpop.f32.mrf.mxu1 }
 0x7d8   :  { %v6353_v18 = vpop.f32.mrf.mxu0  ;;  %v6355_v42 = vpop.f32.mrf.mxu1  ;;  %4576 = vmatpush3.bf16.msra.mxu1 %v7827_v55  ;;  %4640 = vmatpush3.bf16.msra.mxu0 %v7830_v22  ;;  %v5429_v55 = vld [vmem:[#allocation2 + $0xdc] ss:$36 sps:$4 sm:$0xff]  }
 0x7da   :  { %v6363_v6 = vpop.f32.mrf.mxu0  ;;  %v6365_v19 = vpop.f32.mrf.mxu1 }
 0x7db   :  { %1974 = vmatmul.mubr.bf16.vlgmr.msra.gmra.mxu1 %v5409_v17  ;;  %2071 = vmatmul.mubr.bf16.vlgmr.msra.gmra.mxu0 %v5412_v16  ;;  %v5421_v17 = vld [vmem:[#allocation2 + $0x90] ss:$36 sps:$4 sm:$0xff]   ;;  %v5424_v16 = vld [vmem:[#allocation2 + $0x98] ss:$36 sps:$4 sm:$0xff]  }
 0x7dc   :  { %v6367_v5 = vpop.f32.mrf.mxu0  ;;  %v6369_v4 = vpop.f32.mrf.mxu1  ;;  %1981 = vmatprep.mubr.bf16.mxu1 %v5415_v0  ;;  %2078 = vmatprep.mubr.bf16.mxu0 %v5417_v7 }
 0x7de   :  { %v6371_v8 = vpop.f32.mrf.mxu0  ;;  %v6373_v62 = vpop.f32.mrf.mxu1 }
 0x7e0   :  { %v6375_v1 = vpop.f32.mrf.mxu0  ;;  %v6377_v29 = vpop.f32.mrf.mxu1 }
 0x7e2   :  { %v6379_v58 = vpop.f32.mrf.mxu0  ;;  %v6381_v31 = vpop.f32.mrf.mxu1 }
 0x7e3   :  { %1982 = vmatmul.mubr.bf16.gmra.mxu1 %v5419_v2  ;;  %2079 = vmatmul.mubr.bf16.gmra.mxu0 %v5420_v63 }
 0x7e4   :  { %v6383_v32 = vpop.f32.mrf.mxu0  ;;  %v6385_v33 = vpop.f32.mrf.mxu1  ;;  %1989 = vmatprep.mubr.bf16.mxu1 %v5423_v50  ;;  %2086 = vmatprep.mubr.bf16.mxu0 %v5426_v56  ;;  %v5427_v50 = vld [vmem:[#allocation2 + $0xd8] ss:$36 sps:$4 sm:$0xff]   ;;  %v5430_v56 = vld [vmem:[#allocation2 + $0xe0] ss:$36 sps:$4 sm:$0xff]  }
 0x7e6   :  { %v6387_v34 = vpop.f32.mrf.mxu0  ;;  %v6389_v35 = vpop.f32.mrf.mxu1 }
 0x7e8   :  { %v6391_v43 = vpop.f32.mrf.mxu0  ;;  %v6393_v49 = vpop.f32.mrf.mxu1 }
 0x7ea   :  { %v1272_v15 = vpop.f32.mrf.mxu0  ;;  %v1385_v22 = vpop.f32.mrf.mxu1 }
 0x7eb   :  { %1990 = vmatmul.mubr.bf16.gmra.mxu1 %v5421_v17  ;;  %2087 = vmatmul.mubr.bf16.gmra.mxu0 %v5424_v16 }
 0x7ec   :  { %v1274_v0 = vpop.f32.mrf.mxu0  ;;  %v1387_v7 = vpop.f32.mrf.mxu1  ;;  %1997 = vmatprep.mubr.bf16.mxu1 %v5429_v55  ;;  %2094 = vmatprep.mubr.bf16.mxu0 %v5432_v24  ;;  %v5433_v55 = vld [vmem:[#allocation2 + $0x120] ss:$36 sps:$4 sm:$0xff]   ;;  %v5436_v24 = vld [vmem:[#allocation2 + $0x128] ss:$36 sps:$4 sm:$0xff]  }
 0x7ee   :  { %v1276_v2 = vpop.f32.mrf.mxu0  ;;  %v1389_v63 = vpop.f32.mrf.mxu1 }
 0x7f0   :  { %v1278_v39 = vpop.f32.mrf.mxu0  ;;  %v1391_v37 = vpop.f32.mrf.mxu1 }
 0x7f1   :  { %v1562_v46 = vpack.c.bf16 %v1391_v37, %v1387_v7  ;;  %v1560_v38 = vpack.c.bf16 %v1278_v39, %v1274_v0  ;;  %v5442_v37 = vld [vmem:[#allocation2 + $0x170] ss:$36 sps:$4 sm:$0xff]   ;;  %v1551_v39 = vpack.c.bf16 %v6391_v43, %v6383_v32 }
 0x7f2   :  { %v1282_v48 = vpop.f32.mrf.mxu0  ;;  %v1395_v12 = vpop.f32.mrf.mxu1  ;;  %v5459_v43 = vld [vmem:[#allocation2 + $0x14] ss:$36 sps:$4 sm:$0xff]  }
 0x7f3   :  { %1998 = vmatmul.mubr.bf16.gmra.mxu1 %v5427_v50  ;;  %2095 = vmatmul.mubr.bf16.gmra.mxu0 %v5430_v56  ;;  %v5441_v50 = vld [vmem:[#allocation2 + $0x16c] ss:$36 sps:$4 sm:$0xff]   ;;  %v5444_v56 = vld [vmem:[#allocation2 + $0x174] ss:$36 sps:$4 sm:$0xff]  }
 0x7f4   :  { %v1284_v53 = vpop.f32.mrf.mxu0  ;;  %v1397_v57 = vpop.f32.mrf.mxu1  ;;  %2005 = vmatprep.mubr.bf16.mxu1 %v5435_v21  ;;  %2102 = vmatprep.mubr.bf16.mxu0 %v5438_v20  ;;  %v1561_v21 = vpack.c.bf16 %v1389_v63, %v1385_v22  ;;  %v7835_v22 = vld [vmem:[#allocation27_spill] sm:$0xff]  ;;  %v7840_v63 = vld [vmem:[#allocation29_spill] sm:$0xff] }
 0x7f6   :  { %v1286_v17 = vpop.f32.mrf.mxu0  ;;  %v1399_v16 = vpop.f32.mrf.mxu1 }
 0x7f7   :  { %v1570_v52 = vpack.c.bf16 %v1399_v16, %v1395_v12  ;;  %v1568_v41 = vpack.c.bf16 %v1286_v17, %v1282_v48  ;;  %v1559_v48 = vpack.c.bf16 %v1276_v2, %v1272_v15  ;;  %v5439_v12 = vld [vmem:[#allocation2 + $0x168] ss:$36 sps:$4 sm:$0xff]   ;;  %v7839_v2 = vld [vmem:[#allocation31_spill] sm:$0xff] }
 0x7f8   :  { %v1288_v54 = vpop.f32.mrf.mxu0  ;;  %v1401_v14 = vpop.f32.mrf.mxu1  ;;  %v7841_v17 = vpack.c.bf16 %v7839_v2, %v7840_v63 }
 0x7f9   :  { %v1569_v23 = vpack.c.bf16 %v1288_v54, %v1284_v53  ;;  %v1571_v45 = vpack.c.bf16 %v1401_v14, %v1397_v57  ;;  %v1553_v53 = vpack.c.bf16 %v6393_v49, %v6385_v33  ;;  %v5447_v54 = vld [vmem:[#allocation2 + $0x1b4] ss:$36 sps:$4 sm:$0xff]   ;;  %v1550_v14 = vpack.c.bf16 %v6387_v34, %v6379_v58  ;;  %v5462_v49 = vld [vmem:[#allocation2 + $0x1c] ss:$36 sps:$4 sm:$0xff]  }
 0x7fa   :  { %v6395_v44 = vpop.f32.mrf.mxu0  ;;  %v1541_v58 = vpack.c.bf16 %v6371_v8, %v6363_v6  ;;  %v1533_v33 = vpack.c.bf16 %v6353_v18, %v6339_v30  ;;  %v1524_v30 = vpack.c.bf16 %v6327_v3, %v6311_v9  ;;  %v1526_v18 = vpack.c.bf16 %v6329_v28, %v6313_v26  ;;  %v5454_v8 = vld [vmem:[#allocation2 + $0x200] ss:$36 sps:$4 sm:$0xff]  }
 0x7fb   :  { %2006 = vmatmul.mubr.bf16.gmra.mxu1 %v5433_v55  ;;  %2103 = vmatmul.mubr.bf16.gmra.mxu0 %v5436_v24  ;;  %v1515_v9 = vpack.c.bf16 %v6297_v11, %v6277_v25  ;;  %v7831_v26 = vld [vmem:[#allocation32_spill] sm:$0xff]  ;;  %v5457_v24 = vld [vmem:[#allocation2 + $0x10] ss:$36 sps:$4 sm:$0xff]  }
 0x7fc   :  { %4689 = vmatprep.subr.bf16.mxu1 %v1569_v23  ;;  %4753 = vmatprep.subr.bf16.mxu0 %v1571_v45  ;;  %v6397_v20 = vpop.f32.mrf.mxu0  ;;  %v1517_v3 = vpack.c.bf16 %v7831_v26, %v6279_v47  ;;  %v7836_v47 = vld [vmem:[#allocation30_spill] sm:$0xff]  ;;  %v7837_v11 = vld [vmem:[#allocation28_spill] sm:$0xff] }
 0x7fd   :  { %4690 = vmatpush3.bf16.msra.mxu1 %v1568_v41  ;;  %4754 = vmatpush3.bf16.msra.mxu0 %v1570_v52  ;;  %v5450_v41 = vld [vmem:[#allocation2 + $0x1bc] ss:$36 sps:$4 sm:$0xff]   ;;  %v1552_v52 = vpack.c.bf16 %v6389_v35, %v6381_v31  ;;  %v1543_v31 = vpack.c.bf16 %v6373_v62, %v6365_v19  ;;  %v5456_v62 = vld [vmem:[#allocation2 + $0x204] ss:$36 sps:$4 sm:$0xff]   ;;  %v1534_v35 = vpack.c.bf16 %v6351_v40, %v6333_v60  ;;  %v5502_v26 = vld [vmem:[#allocation2 + $0x210] ss:$36 sps:$4 sm:$0xff]  }
 0x7fe   :  { %4691 = vmatprep.subr.bf16.mxu1 %v1560_v38  ;;  %4755 = vmatprep.subr.bf16.mxu0 %v1562_v46  ;;  %v6401_v57 = vpop.f32.mrf.mxu0  ;;  %v1544_v46 = vpack.c.bf16 %v6377_v29, %v6369_v4  ;;  %v1542_v38 = vpack.c.bf16 %v6375_v1, %v6367_v5  ;;  %v1535_v4 = vpack.c.bf16 %v6355_v42, %v6341_v51  ;;  %v5445_v5 = vld [vmem:[#allocation2 + $0x1b0] ss:$36 sps:$4 sm:$0xff]   ;;  %v5448_v1 = vld [vmem:[#allocation2 + $0x1b8] ss:$36 sps:$4 sm:$0xff]  }
 0x7ff   :  { %2013 = vmatprep.mubr.bf16.mxu1 %v5441_v50  ;;  %2110 = vmatprep.mubr.bf16.mxu0 %v5444_v56  ;;  %v5453_v19 = vld [vmem:[#allocation2 + $0x1fc] ss:$36 sps:$4 sm:$0xff]   ;;  %v1532_v42 = vpack.c.bf16 %v6349_v36, %v6331_v59  ;;  %v1523_v40 = vpack.c.bf16 %v6319_v27, %v6303_v10  ;;  %v1525_v59 = vpack.c.bf16 %v6321_v61, %v6305_v13  ;;  %v7832_v10 = vld [vmem:[#allocation22_spill] sm:$0xff] }
 0x800   :  { %v6405_v45 = vpop.f32.mrf.mxu0  ;;  %v5451_v36 = vld [vmem:[#allocation2 + $0x1f8] ss:$36 sps:$4 sm:$0xff]   ;;  %v7833_v13 = vld [vmem:[#allocation26_spill] sm:$0xff]  ;;  %v7838_v7 = vpack.c.bf16 %v7836_v47, %v7837_v11 }
 0x801   :  { %4692 = vmatpush3.bf16.msra.mxu1 %v1559_v48  ;;  %4756 = vmatpush3.bf16.msra.mxu0 %v1561_v21  ;;  %v1506_v27 = vpack.c.bf16 %v7833_v13, %v7832_v10  ;;  %v7834_v61 = vld [vmem:[#allocation23_spill] sm:$0xff]  ;;  %v7842_v21 = vld [vmem:[#allocation24_spill] sm:$0xff]  ;;  %v5510_v13 = vld [vmem:[#allocation2 + $0x188] ss:$36 sps:$4 sm:$0xff]  }
 0x802   :  { %4693 = vmatprep.subr.bf16.mxu1 %v1551_v39  ;;  %4757 = vmatprep.subr.bf16.mxu0 %v1553_v53  ;;  %v6411_v23 = vpop.f32.mrf.mxu0  ;;  %v1508_v0 = vpack.c.bf16 %v7835_v22, %v7834_v61  ;;  %v5460_v56 = vld [vmem:[#allocation2 + $0x18] ss:$36 sps:$4 sm:$0xff]   ;;  %v7843_v53 = vld [vmem:[#allocation20_spill] sm:$0xff] }
 0x803   :  { %2014 = vmatmul.mubr.bf16.gmra.mxu1 %v5439_v12  ;;  %2111 = vmatmul.mubr.bf16.gmra.mxu0 %v5442_v37  ;;  %v7844_v48 = vpack.c.bf16 %v7842_v21, %v7843_v53  ;;  %v7845_v12 = vld [vmem:[#allocation25_spill] sm:$0xff]  ;;  %v5509_v10 = vld [vmem:[#allocation2 + $0x140] ss:$36 sps:$4 sm:$0xff]   ;;  %v5512_v61 = vld [vmem:[#allocation2 + $0x218] ss:$36 sps:$4 sm:$0xff]  }
 0x804   :  { %v6417_v32 = vpop.f32.mrf.mxu0  ;;  %2021 = vmatprep.mubr.bf16.mxu1 %v5447_v54  ;;  %2118 = vmatprep.mubr.bf16.mxu0 %v5450_v41  ;;  %v7846_v37 = vld [vmem:[#allocation21_spill] sm:$0xff]  ;;  %v5465_v54 = vld [vmem:[#allocation2 + $0x5c] ss:$36 sps:$4 sm:$0xff]  }
 0x805   :  { %4694 = vmatpush3.bf16.msra.mxu1 %v1550_v14  ;;  %4758 = vmatpush3.bf16.msra.mxu0 %v1552_v52  ;;  %v7847_v39 = vpack.c.bf16 %v7845_v12, %v7846_v37  ;;  %v5468_v52 = vld [vmem:[#allocation2 + $0x64] ss:$36 sps:$4 sm:$0xff]   ;;  %v5463_v14 = vld [vmem:[#allocation2 + $0x58] ss:$36 sps:$4 sm:$0xff]  }
 0x806   :  { %4695 = vmatprep.subr.bf16.mxu1 %v1542_v38  ;;  %4759 = vmatprep.subr.bf16.mxu0 %v1544_v46  ;;  %v6423_v29 = vpop.f32.mrf.mxu0  ;;  %v5466_v38 = vld [vmem:[#allocation2 + $0x60] ss:$36 sps:$4 sm:$0xff]   ;;  %v5513_v22 = vld [vmem:[#allocation4 + $0xd8] ss:$36 sps:$4 sm:$0xff]  }
 0x807   :  { %v5516_v21 = vld [vmem:[#allocation4 + $0xe0] ss:$36 sps:$4 sm:$0xff]  }
 0x808   :  { %v6429_v34 = vpop.f32.mrf.mxu0 }
 0x809   :  { %4696 = vmatpush3.bf16.msra.mxu1 %v1541_v58  ;;  %4760 = vmatpush3.bf16.msra.mxu0 %v1543_v31  ;;  %v5471_v31 = vld [vmem:[#allocation2 + $0xa4] ss:$36 sps:$4 sm:$0xff]   ;;  %v5474_v58 = vld [vmem:[#allocation2 + $0xac] ss:$36 sps:$4 sm:$0xff]  }
 0x80a   :  { %4697 = vmatprep.subr.bf16.mxu1 %v1533_v33  ;;  %4761 = vmatprep.subr.bf16.mxu0 %v1535_v4  ;;  %v5247_v51 = vpop.f32.mrf.mxu0  ;;  %v5472_v33 = vld [vmem:[#allocation2 + $0xa8] ss:$36 sps:$4 sm:$0xff]  }
 0x80b   :  { %2022 = vmatmul.mubr.bf16.gmra.mxu1 %v5445_v5  ;;  %2119 = vmatmul.mubr.bf16.gmra.mxu0 %v5448_v1  ;;  %v1536_v5 = vpack.c.bf16 %v6423_v29, %v6411_v23  ;;  %v5469_v1 = vld [vmem:[#allocation2 + $0xa0] ss:$36 sps:$4 sm:$0xff]   ;;  %v5478_v23 = vld [vmem:[#allocation2 + $0xf0] ss:$36 sps:$4 sm:$0xff]  }
 0x80c   :  { %v1470_v6 = vpop.f32.mrf.mxu0  ;;  %2029 = vmatprep.mubr.bf16.mxu1 %v5453_v19  ;;  %2126 = vmatprep.mubr.bf16.mxu0 %v5456_v62  ;;  %v5477_v19 = vld [vmem:[#allocation2 + $0xec] ss:$36 sps:$4 sm:$0xff]   ;;  %v5480_v62 = vld [vmem:[#allocation2 + $0xf4] ss:$36 sps:$4 sm:$0xff]  }
 0x80d   :  { %4698 = vmatpush3.bf16.msra.mxu1 %v1532_v42  ;;  %4762 = vmatpush3.bf16.msra.mxu0 %v1534_v35  ;;  %v1527_v35 = vpack.c.bf16 %v6429_v34, %v6417_v32  ;;  %v5475_v42 = vld [vmem:[#allocation2 + $0xe8] ss:$36 sps:$4 sm:$0xff]   ;;  %v5483_v29 = vld [vmem:[#allocation2 + $0x134] ss:$36 sps:$4 sm:$0xff]  }
 0x80e   :  { %4699 = vmatprep.subr.bf16.mxu1 %v1524_v30  ;;  %4763 = vmatprep.subr.bf16.mxu0 %v1526_v18  ;;  %v5248_v60 = vpop.f32.mrf.mxu0  ;;  %v5486_v30 = vld [vmem:[#allocation2 + $0x13c] ss:$36 sps:$4 sm:$0xff]   ;;  %v1509_v18 = vpack.c.bf16 %v6405_v45, %v6397_v20  ;;  %v5481_v32 = vld [vmem:[#allocation2 + $0x130] ss:$36 sps:$4 sm:$0xff]   ;;  %v5496_v45 = vld [vmem:[#allocation2 + $0x1c8] ss:$36 sps:$4 sm:$0xff]  }
 0x80f   :  { %v1554_v46 = vpack.c.bf16 %v5248_v60, %v5247_v51  ;;  %v1518_v51 = vpack.c.bf16 %v6401_v57, %v6395_v44  ;;  %v5484_v34 = vld [vmem:[#allocation2 + $0x138] ss:$36 sps:$4 sm:$0xff]   ;;  %v5492_v44 = vld [vmem:[#allocation2 + $0x184] ss:$36 sps:$4 sm:$0xff]  }
 0x810   :  { %v1473_v28 = vpop.f32.mrf.mxu0  ;;  %v5487_v57 = vld [vmem:[#allocation2 + $0x178] ss:$36 sps:$4 sm:$0xff]   ;;  %v5490_v60 = vld [vmem:[#allocation2 + $0x180] ss:$36 sps:$4 sm:$0xff]  }
 0x811   :  { %4700 = vmatpush3.bf16.msra.mxu1 %v1523_v40  ;;  %4764 = vmatpush3.bf16.msra.mxu0 %v1525_v59  ;;  %v1545_v4 = vpack.c.bf16 %v1473_v28, %v1470_v6  ;;  %v5489_v6 = vld [vmem:[#allocation2 + $0x17c] ss:$36 sps:$4 sm:$0xff]   ;;  %v5495_v40 = vld [vmem:[#allocation2 + $0x1c4] ss:$36 sps:$4 sm:$0xff]   ;;  %v5498_v59 = vld [vmem:[#allocation2 + $0x1cc] ss:$36 sps:$4 sm:$0xff]  }
 0x812   :  { %4701 = vmatprep.subr.bf16.mxu1 %v1515_v9  ;;  %4765 = vmatprep.subr.bf16.mxu0 %v1517_v3  ;;  %v5251_v15 = vpop.f32.mrf.mxu0  ;;  %v5493_v20 = vld [vmem:[#allocation2 + $0x1c0] ss:$36 sps:$4 sm:$0xff]   ;;  %v5499_v9 = vld [vmem:[#allocation2 + $0x208] ss:$36 sps:$4 sm:$0xff]   ;;  %v7848_v28 = vmov 0  }
 0x813   :  { %2030 = vmatmul.mubr.bf16.gmra.mxu1 %v5451_v36  ;;  %2127 = vmatmul.mubr.bf16.gmra.mxu0 %v5454_v8  ;;  %v5501_v36 = vld [vmem:[#allocation2 + $0x20c] ss:$36 sps:$4 sm:$0xff]   ;;  %v5504_v8 = vld [vmem:[#allocation2 + $0x214] ss:$36 sps:$4 sm:$0xff]   ;;  %v5505_v3 = vld [vmem:[#allocation2 + $0x20] ss:$36 sps:$4 sm:$0xff]  }
 0x814   :  { %v1486_v25 = vpop.f32.mrf.mxu0  ;;  %2167 = vmatprep.mubr.bf16.mxu1 %v5459_v43  ;;  %2264 = vmatprep.mubr.bf16.mxu0 %v5462_v49  ;;  %v5506_v43 = vld [vmem:[#allocation2 + $0x68] ss:$36 sps:$4 sm:$0xff]   ;;  %v5507_v49 = vld [vmem:[#allocation2 + $0xb0] ss:$36 sps:$4 sm:$0xff]  }
 0x815   :  { %4702 = vmatpush3.bf16.msra.mxu1 %v7838_v7  ;;  %4766 = vmatpush3.bf16.msra.mxu0 %v7841_v17 }
 0x816   :  { %4703 = vmatprep.subr.bf16.mxu1 %v1506_v27  ;;  %4767 = vmatprep.subr.bf16.mxu0 %v1508_v0  ;;  %v5252_v16 = vpop.f32.mrf.mxu0  ;;  %v5511_v27 = vld [vmem:[#allocation2 + $0x1d0] ss:$36 sps:$4 sm:$0xff]   ;;  %v5515_v0 = vld [vmem:[#allocation4 + $0xdc] ss:$36 sps:$4 sm:$0xff]  }
 0x817   :  { %v1572_v55 = vpack.c.bf16 %v5252_v16, %v5251_v15  ;;  %v5508_v15 = vld [vmem:[#allocation2 + $0xf8] ss:$36 sps:$4 sm:$0xff]  }
 0x818   :  { %v1489_v50 = vpop.f32.mrf.mxu0 }
 0x819   :  { %4704 = vmatpush3.bf16.msra.mxu1 %v7844_v48  ;;  %4768 = vmatpush3.bf16.msra.mxu0 %v7847_v39  ;;  %v1563_v41 = vpack.c.bf16 %v1489_v50, %v1486_v25  ;;  %v5521_v39 = vld [vmem:[#allocation4 + $0x94] ss:$36 sps:$4 sm:$0xff]  }
 0x81a   :  { %5253 = vmatprep.subr.bf16.mxu1 %v1572_v55  ;;  %2618 = vmatprep.subr.bf16.mxu0 %v5515_v0 }
 0x81c   :  { %2168 = vmatmul.mubr.bf16.vlgmr.msra.gmra.mxu1 %v5457_v24  ;;  %2265 = vmatmul.mubr.bf16.vlgmr.msra.gmra.mxu0 %v5460_v56  ;;  %v5518_v56 = vld [vmem:[#allocation4 + $0xe4] ss:$36 sps:$4 sm:$0xff]  }
 0x81d   :  { %5254 = vmatpush3.bf16.msra.mxu1 %v1572_v55  ;;  %2175 = vmatprep.mubr.bf16.mxu1 %v5465_v54  ;;  %v5524_v54 = vld [vmem:[#allocation4 + $0x9c] ss:$36 sps:$4 sm:$0xff]  }
 0x81e   :  { %5255 = vmatprep.subr.bf16.mxu1 %v1563_v41  ;;  %2272 = vmatprep.mubr.bf16.mxu0 %v5468_v52 }
 0x81f   :  { %2619 = vmatpush1.bf16.msra.mxu0 %v5513_v22 }
 0x820   :  { %2620 = vmatprep.subr.bf16.mxu0 %v5521_v39 }
 0x821   :  { %5256 = vmatpush3.bf16.msra.mxu1 %v1563_v41 }
 0x822   :  { %5257 = vmatprep.subr.bf16.mxu1 %v1554_v46 }
 0x824   :  { %2176 = vmatmul.mubr.bf16.gmra.mxu1 %v5463_v14  ;;  %2273 = vmatmul.mubr.bf16.gmra.mxu0 %v5466_v38  ;;  %v5522_v14 = vld [vmem:[#allocation4 + $0x98] ss:$36 sps:$4 sm:$0xff]  }
 0x825   :  { %5258 = vmatpush3.bf16.msra.mxu1 %v1554_v46  ;;  %2183 = vmatprep.mubr.bf16.mxu1 %v5471_v31  ;;  %v5519_v46 = vld [vmem:[#allocation4 + $0x90] ss:$36 sps:$4 sm:$0xff]  }
 0x826   :  { %5259 = vmatprep.subr.bf16.mxu1 %v1545_v4  ;;  %2280 = vmatprep.mubr.bf16.mxu0 %v5474_v58 }
 0x827   :  { %2621 = vmatpush1.bf16.msra.mxu0 %v5519_v46 }
 0x829   :  { %5260 = vmatpush3.bf16.msra.mxu1 %v1545_v4 }
 0x82a   :  { %5261 = vmatprep.subr.bf16.mxu1 %v1536_v5 }
 0x82c   :  { %2184 = vmatmul.mubr.bf16.gmra.mxu1 %v5469_v1  ;;  %2281 = vmatmul.mubr.bf16.gmra.mxu0 %v5472_v33 }
 0x82d   :  { %5262 = vmatpush3.bf16.msra.mxu1 %v1536_v5  ;;  %2191 = vmatprep.mubr.bf16.mxu1 %v5477_v19 }
 0x82e   :  { %5263 = vmatprep.subr.bf16.mxu1 %v1527_v35  ;;  %2288 = vmatprep.mubr.bf16.mxu0 %v5480_v62 }
 0x831   :  { %5264 = vmatpush3.bf16.msra.mxu1 %v1527_v35 }
 0x832   :  { %5265 = vmatprep.subr.bf16.mxu1 %v1518_v51 }
 0x834   :  { %2192 = vmatmul.mubr.bf16.gmra.mxu1 %v5475_v42  ;;  %2289 = vmatmul.mubr.bf16.gmra.mxu0 %v5478_v23 }
 0x835   :  { %5266 = vmatpush3.bf16.msra.mxu1 %v1518_v51  ;;  %2199 = vmatprep.mubr.bf16.mxu1 %v5483_v29 }
 0x836   :  { %5267 = vmatprep.subr.bf16.mxu1 %v1509_v18  ;;  %2296 = vmatprep.mubr.bf16.mxu0 %v5486_v30 }
 0x839   :  { %5268 = vmatpush3.bf16.msra.mxu1 %v1509_v18 }
 0x83a   :  { %2731 = vmatprep.subr.bf16.mxu1 %v5518_v56 }
 0x83c   :  { %2200 = vmatmul.mubr.bf16.gmra.mxu1 %v5481_v32  ;;  %2297 = vmatmul.mubr.bf16.gmra.mxu0 %v5484_v34 }
 0x83d   :  { %2207 = vmatprep.mubr.bf16.mxu1 %v5489_v6  ;;  %2304 = vmatprep.mubr.bf16.mxu0 %v5492_v44 }
 0x844   :  { %2208 = vmatmul.mubr.bf16.gmra.mxu1 %v5487_v57  ;;  %2305 = vmatmul.mubr.bf16.gmra.mxu0 %v5490_v60 }
 0x845   :  { %2215 = vmatprep.mubr.bf16.mxu1 %v5495_v40  ;;  %2312 = vmatprep.mubr.bf16.mxu0 %v5498_v59 }
 0x84c   :  { %2216 = vmatmul.mubr.bf16.gmra.mxu1 %v5493_v20  ;;  %2313 = vmatmul.mubr.bf16.gmra.mxu0 %v5496_v45 }
 0x84d   :  { %2223 = vmatprep.mubr.bf16.mxu1 %v5501_v36  ;;  %2320 = vmatprep.mubr.bf16.mxu0 %v5504_v8 }
 0x854   :  { %2224 = vmatmul.mubr.bf16.gmra.mxu1 %v5499_v9  ;;  %2321 = vmatmul.mubr.bf16.gmra.mxu0 %v5502_v26 }
 0x855   :  { %5269 = vmatprep.mubr.bf16.mxu1 %v5505_v3  ;;  %2638 = vmatprep.mubr.bf16.mxu0 %v7848_v28 }
 0x85c   :  { %5270 = vmatmul.mubr.bf16.vlgmr.msra.gmra.mxu1 %v5506_v43 }
 0x85d   :  { %5273 = vmatprep.mubr.bf16.mxu1 %v5507_v49  ;;  %2732 = vmatpush1.bf16.msra.mxu1 %v5516_v21 }
 0x85e   :  { %2733 = vmatprep.subr.bf16.mxu1 %v5524_v54 }
 0x861   :  { %2734 = vmatpush1.bf16.msra.mxu1 %v5522_v14 }
 0x864   :  { %5274 = vmatmul.mubr.bf16.gmra.mxu1 %v5508_v15 }
 0x865   :  { %5277 = vmatprep.mubr.bf16.mxu1 %v5509_v10 }
 0x86c   :  { %5278 = vmatmul.mubr.bf16.gmra.mxu1 %v5510_v13 }
 0x86d   :  { %5281 = vmatprep.mubr.bf16.mxu1 %v5511_v27 }
 0x874   :  { %5282 = vmatmul.mubr.bf16.gmra.mxu1 %v5512_v61 }
 0x875   :  { %2751 = vmatprep.mubr.bf16.mxu1 %v7848_v28 }
 0x89b   :  { %v4577_v25 = vpop.f32.mrf.mxu1  ;;  %v4641_v47 = vpop.f32.mrf.mxu0 }
 0x89d   :  { %v4578_v11 = vpop.f32.mrf.mxu1  ;;  %v4642_v7 = vpop.f32.mrf.mxu0 }
 0x89e   :  { %v4579_v2 = vadd.f32 %v4578_v11, %v4577_v25  ;;  %v4643_v63 = vadd.f32 %v4642_v7, %v4641_v47 }
 0x89f   :  { %v6473_v17 = vpop.f32.mrf.mxu1  ;;  %v6475_v16 = vpop.f32.mrf.mxu0 }
 0x8a0   :  { %v6477_v55 = vadd.f32 %v4643_v63, %v4579_v2 }
 0x8a1   :  { %v6479_v24 = vpop.f32.mrf.mxu1  ;;  %v6481_v50 = vpop.f32.mrf.mxu0 }
 0x8a3   :  { %v4583_v53 = vpop.f32.mrf.mxu1  ;;  %v4647_v48 = vpop.f32.mrf.mxu0 }
 0x8a5   :  { %v4584_v12 = vpop.f32.mrf.mxu1  ;;  %v4648_v37 = vpop.f32.mrf.mxu0 }
 0x8a6   :  { %v4585_v41 = vadd.f32 %v4584_v12, %v4583_v53  ;;  %v4649_v52 = vadd.f32 %v4648_v37, %v4647_v48  ;;  %v5527_v37 = vld [vmem:[#allocation4 + $0xec] ss:$36 sps:$4 sm:$0xff]  }
 0x8a7   :  { %v6483_v38 = vpop.f32.mrf.mxu1  ;;  %v6485_v31 = vpop.f32.mrf.mxu0  ;;  %2844 = vmatprep.subr.bf16.mxu0 %v5527_v37 }
 0x8a8   :  { %v6487_v4 = vadd.f32 %v4649_v52, %v4585_v41 }
 0x8a9   :  { %v6489_v58 = vpop.f32.mrf.mxu1  ;;  %v6491_v5 = vpop.f32.mrf.mxu0 }
 0x8ab   :  { %v4589_v1 = vpop.f32.mrf.mxu1  ;;  %v4653_v33 = vpop.f32.mrf.mxu0 }
 0x8ad   :  { %v4590_v19 = vpop.f32.mrf.mxu1  ;;  %v4654_v62 = vpop.f32.mrf.mxu0 }
 0x8ae   :  { %v4591_v35 = vadd.f32 %v4590_v19, %v4589_v1  ;;  %v4655_v51 = vadd.f32 %v4654_v62, %v4653_v33 }
 0x8af   :  { %v6493_v42 = vpop.f32.mrf.mxu1  ;;  %v6495_v23 = vpop.f32.mrf.mxu0 }
 0x8b0   :  { %v6497_v29 = vadd.f32 %v4655_v51, %v4591_v35 }
 0x8b1   :  { %v6499_v30 = vpop.f32.mrf.mxu1  ;;  %v6501_v18 = vpop.f32.mrf.mxu0 }
 0x8b3   :  { %v4595_v32 = vpop.f32.mrf.mxu1  ;;  %v4659_v34 = vpop.f32.mrf.mxu0 }
 0x8b5   :  { %v4596_v6 = vpop.f32.mrf.mxu1  ;;  %v4660_v44 = vpop.f32.mrf.mxu0 }
 0x8b6   :  { %v4597_v57 = vadd.f32 %v4596_v6, %v4595_v32  ;;  %v4661_v60 = vadd.f32 %v4660_v44, %v4659_v34 }
 0x8b7   :  { %v6503_v40 = vpop.f32.mrf.mxu1  ;;  %v6505_v59 = vpop.f32.mrf.mxu0 }
 0x8b8   :  { %v6507_v20 = vadd.f32 %v4661_v60, %v4597_v57 }
 0x8b9   :  { %v6509_v45 = vpop.f32.mrf.mxu1  ;;  %v6511_v36 = vpop.f32.mrf.mxu0 }
 0x8bb   :  { %v4601_v8 = vpop.f32.mrf.mxu1  ;;  %v4665_v9 = vpop.f32.mrf.mxu0 }
 0x8bd   :  { %v4602_v26 = vpop.f32.mrf.mxu1  ;;  %v4666_v3 = vpop.f32.mrf.mxu0 }
 0x8be   :  { %v4603_v43 = vadd.f32 %v4602_v26, %v4601_v8  ;;  %v4667_v49 = vadd.f32 %v4666_v3, %v4665_v9 }
 0x8bf   :  { %v6513_v15 = vpop.f32.mrf.mxu1  ;;  %v6515_v10 = vpop.f32.mrf.mxu0 }
 0x8c0   :  { %v6517_v13 = vadd.f32 %v4667_v49, %v4603_v43 }
 0x8c1   :  { %v6519_v27 = vpop.f32.mrf.mxu1  ;;  %v6521_v61 = vpop.f32.mrf.mxu0 }
 0x8c3   :  { %v4607_v22 = vpop.f32.mrf.mxu1  ;;  %v4671_v0 = vpop.f32.mrf.mxu0 }
 0x8c5   :  { %v4608_v25 = vpop.f32.mrf.mxu1  ;;  %v4672_v47 = vpop.f32.mrf.mxu0 }
 0x8c6   :  { %v4609_v11 = vadd.f32 %v4608_v25, %v4607_v22  ;;  %v4673_v7 = vadd.f32 %v4672_v47, %v4671_v0 }
 0x8c7   :  { %v6523_v2 = vpop.f32.mrf.mxu1  ;;  %v6525_v63 = vpop.f32.mrf.mxu0 }
 0x8c8   :  { %v6527_v56 = vadd.f32 %v4673_v7, %v4609_v11  ;;  %v5530_v11 = vld [vmem:[#allocation4 + $0xf4] ss:$36 sps:$4 sm:$0xff]  }
 0x8c9   :  { %v6529_v21 = vpop.f32.mrf.mxu1  ;;  %v6531_v53 = vpop.f32.mrf.mxu0  ;;  %2957 = vmatprep.subr.bf16.mxu1 %v5530_v11 }
 0x8cb   :  { %v4613_v48 = vpop.f32.mrf.mxu1  ;;  %v4677_v12 = vpop.f32.mrf.mxu0 }
 0x8cd   :  { %v4614_v39 = vpop.f32.mrf.mxu1  ;;  %v4678_v54 = vpop.f32.mrf.mxu0 }
 0x8ce   :  { %v4615_v41 = vadd.f32 %v4614_v39, %v4613_v48  ;;  %v4679_v52 = vadd.f32 %v4678_v54, %v4677_v12 }
 0x8cf   :  { %v6533_v46 = vpop.f32.mrf.mxu1  ;;  %v6535_v14 = vpop.f32.mrf.mxu0 }
 0x8d0   :  { %7849 = vst [vmem:[#allocation14_spill] sm:$0xff] %v6533_v46  ;;  %7850 = vst [vmem:[#allocation11_spill] sm:$0xff] %v6535_v14  ;;  %v6537_v1 = vadd.f32 %v4679_v52, %v4615_v41 }
 0x8d1   :  { %v6539_v33 = vpop.f32.mrf.mxu1  ;;  %v6541_v19 = vpop.f32.mrf.mxu0 }
 0x8d2   :  { %7851 = vst [vmem:[#allocation15_spill] sm:$0xff] %v6539_v33  ;;  %7852 = vst [vmem:[#allocation18_spill] sm:$0xff] %v6541_v19 }
 0x8d3   :  { %v4619_v62 = vpop.f32.mrf.mxu1  ;;  %v4683_v35 = vpop.f32.mrf.mxu0 }
 0x8d5   :  { %v4620_v51 = vpop.f32.mrf.mxu1  ;;  %v4684_v32 = vpop.f32.mrf.mxu0 }
 0x8d6   :  { %v4621_v34 = vadd.f32 %v4620_v51, %v4619_v62  ;;  %v4685_v6 = vadd.f32 %v4684_v32, %v4683_v35 }
 0x8d7   :  { %v6543_v44 = vpop.f32.mrf.mxu1  ;;  %v6545_v57 = vpop.f32.mrf.mxu0 }
 0x8d8   :  { %7853 = vst [vmem:[#allocation16_spill] sm:$0xff] %v6543_v44  ;;  %7854 = vst [vmem:[#allocation19_spill] sm:$0xff] %v6545_v57  ;;  %v6547_v60 = vadd.f32 %v4685_v6, %v4621_v34 }
 0x8d9   :  { %v6549_v8 = vpop.f32.mrf.mxu1  ;;  %v6551_v9 = vpop.f32.mrf.mxu0 }
 0x8da   :  { %7855 = vst [vmem:[#allocation17_spill] sm:$0xff] %v6549_v8  ;;  %7856 = vst [vmem:[#allocation12_spill] sm:$0xff] %v6551_v9 }
 0x8dc   :  { %v4705_v26 = vpop.f32.mrf.mxu1  ;;  %v6553_v3 = vpop.f32.mrf.mxu0 }
 0x8de   :  { %v4706_v43 = vpop.f32.mrf.mxu1  ;;  %v6555_v49 = vpop.f32.mrf.mxu0 }
 0x8df   :  { %v4707_v22 = vadd.f32 %v4706_v43, %v4705_v26 }
 0x8e0   :  { %v6557_v0 = vpop.f32.mrf.mxu1  ;;  %v6559_v25 = vpop.f32.mrf.mxu0 }
 0x8e1   :  { %v6562_v47 = vadd.f32 %v4707_v22, %v6477_v55 }
 0x8e2   :  { %v6564_v7 = vpop.f32.mrf.mxu1  ;;  %v6566_v48 = vpop.f32.mrf.mxu0 }
 0x8e4   :  { %v4711_v12 = vpop.f32.mrf.mxu1  ;;  %v4775_v37 = vpop.f32.mrf.mxu0 }
 0x8e6   :  { %v4712_v39 = vpop.f32.mrf.mxu1  ;;  %v4776_v54 = vpop.f32.mrf.mxu0 }
 0x8e7   :  { %v4713_v41 = vadd.f32 %v4712_v39, %v4711_v12 }
 0x8e8   :  { %v4714_v52 = vpop.f32.mrf.mxu1  ;;  %v6568_v62 = vpop.f32.mrf.mxu0 }
 0x8e9   :  { %v6571_v35 = vadd.f32 %v4713_v41, %v6487_v4 }
 0x8ea   :  { %v4715_v51 = vpop.f32.mrf.mxu1  ;;  %v6573_v55 = vpop.f32.mrf.mxu0 }
 0x8ec   :  { %v4717_v32 = vpop.f32.mrf.mxu1  ;;  %v6575_v34 = vpop.f32.mrf.mxu0 }
 0x8ee   :  { %v4718_v6 = vpop.f32.mrf.mxu1  ;;  %v6577_v26 = vpop.f32.mrf.mxu0 }
 0x8ef   :  { %v4719_v43 = vadd.f32 %v4718_v6, %v4717_v32 }
 0x8f0   :  { %v6579_v22 = vpop.f32.mrf.mxu1  ;;  %v6581_v11 = vpop.f32.mrf.mxu0 }
 0x8f1   :  { %7857 = vst [vmem:[#allocation9_spill] sm:$0xff] %v6581_v11  ;;  %v6584_v12 = vadd.f32 %v4719_v43, %v6497_v29 }
 0x8f2   :  { %v6586_v39 = vpop.f32.mrf.mxu1  ;;  %v6588_v4 = vpop.f32.mrf.mxu0 }
 0x8f3   :  { %7858 = vst [vmem:[#allocation13_spill] sm:$0xff] %v6584_v12  ;;  %7859 = vst [vmem:[#allocation10_spill] sm:$0xff] %v6588_v4 }
 0x8f4   :  { %v4723_v41 = vpop.f32.mrf.mxu1  ;;  %v6590_v28 = vpop.f32.mrf.mxu0 }
 0x8f6   :  { %v4724_v9 = vpop.f32.mrf.mxu1  ;;  %v6592_v57 = vpop.f32.mrf.mxu0 }
 0x8f7   :  { %v4725_v8 = vadd.f32 %v4724_v9, %v4723_v41 }
 0x8f8   :  { %v6594_v44 = vpop.f32.mrf.mxu1  ;;  %v6596_v32 = vpop.f32.mrf.mxu0 }
 0x8f9   :  { %7860 = vst [vmem:[#allocation32_spill] sm:$0xff] %v6596_v32  ;;  %v6599_v6 = vadd.f32 %v4725_v8, %v6507_v20 }
 0x8fa   :  { %v6601_v29 = vpop.f32.mrf.mxu1  ;;  %v6603_v43 = vpop.f32.mrf.mxu0 }
 0x8fb   :  { %7861 = vst [vmem:[#allocation22_spill] sm:$0xff] %v6599_v6  ;;  %7862 = vst [vmem:[#allocation26_spill] sm:$0xff] %v6603_v43 }
 0x8fc   :  { %v4729_v19 = vpop.f32.mrf.mxu1  ;;  %v6605_v14 = vpop.f32.mrf.mxu0 }
 0x8fd   :  { %7863 = vst [vmem:[#allocation23_spill] sm:$0xff] %v6605_v14 }
 0x8fe   :  { %v4730_v33 = vpop.f32.mrf.mxu1  ;;  %v6607_v46 = vpop.f32.mrf.mxu0 }
 0x8ff   :  { %7864 = vst [vmem:[#allocation27_spill] sm:$0xff] %v6607_v46  ;;  %v4731_v12 = vadd.f32 %v4730_v33, %v4729_v19 }
 0x900   :  { %v6609_v4 = vpop.f32.mrf.mxu1  ;;  %v6611_v9 = vpop.f32.mrf.mxu0 }
 0x901   :  { %7865 = vst [vmem:[#allocation30_spill] sm:$0xff] %v6609_v4  ;;  %7866 = vst [vmem:[#allocation28_spill] sm:$0xff] %v6611_v9  ;;  %v6614_v41 = vadd.f32 %v4731_v12, %v6517_v13 }
 0x902   :  { %v6616_v20 = vpop.f32.mrf.mxu1  ;;  %v6618_v8 = vpop.f32.mrf.mxu0 }
 0x903   :  { %7867 = vst [vmem:[#allocation31_spill] sm:$0xff] %v6614_v41  ;;  %7868 = vst [vmem:[#allocation29_spill] sm:$0xff] %v6616_v20 }
 0x904   :  { %7869 = vst [vmem:[#allocation24_spill] sm:$0xff] %v6618_v8  ;;  %v4735_v11 = vpop.f32.mrf.mxu1  ;;  %v6620_v6 = vpop.f32.mrf.mxu0 }
 0x906   :  { %v4736_v43 = vpop.f32.mrf.mxu1  ;;  %v6622_v32 = vpop.f32.mrf.mxu0 }
 0x907   :  { %v4737_v14 = vadd.f32 %v4736_v43, %v4735_v11 }
 0x908   :  { %v6624_v46 = vpop.f32.mrf.mxu1  ;;  %v6631_v13 = vpop.f32.mrf.mxu0 }
 0x909   :  { %v6627_v33 = vadd.f32 %v4737_v14, %v6527_v56  ;;  %7871 = vst [vmem:[#allocation25_spill] sm:$0xff] %v6631_v13  ;;  %v4588_v14 = vadd.f32 %v6489_v58, %v6483_v38 }
 0x90a   :  { %v6629_v19 = vpop.f32.mrf.mxu1  ;;  %v6633_v9 = vpop.f32.mrf.mxu0 }
 0x90b   :  { %7870 = vst [vmem:[#allocation20_spill] sm:$0xff] %v6627_v33  ;;  %7872 = vst [vmem:[#allocation21_spill] sm:$0xff] %v6633_v9  ;;  %v4652_v33 = vadd.f32 %v6491_v5, %v6485_v31  ;;  %v4582_v9 = vadd.f32 %v6479_v24, %v6473_v17  ;;  %v4771_v31 = vadd.f32 %v6555_v49, %v6553_v3 }
 0x90c   :  { %v4741_v12 = vpop.f32.mrf.mxu1  ;;  %v6642_v4 = vpop.f32.mrf.mxu0  ;;  %v4710_v17 = vadd.f32 %v6564_v7, %v6557_v0  ;;  %v4664_v5 = vadd.f32 %v6511_v36, %v6505_v59  ;;  %v4774_v59 = vadd.f32 %v6566_v48, %v6559_v25  ;;  %v4789_v25 = vadd.f32 %v6592_v57, %v6590_v28 }
 0x90d   :  { %7876 = vst [vmem:[#allocation36_spill] sm:$0xff] %v6642_v4  ;;  %v2084_v38 = vadd.f32 %v4652_v33, %v4588_v14  ;;  %v7878_v33 = vld [vmem:[#allocation32_spill] sm:$0xff] }
 0x90e   :  { %v4742_v41 = vpop.f32.mrf.mxu1 }
 0x90f   :  { %v4743_v8 = vadd.f32 %v4742_v41, %v4741_v12  ;;  %v4646_v41 = vadd.f32 %v6481_v50, %v6475_v16  ;;  %v4600_v50 = vadd.f32 %v6509_v45, %v6503_v40  ;;  %v4594_v40 = vadd.f32 %v6499_v30, %v6493_v42 }
 0x910   :  { %v6635_v20 = vpop.f32.mrf.mxu1  ;;  %v4728_v42 = vadd.f32 %v6601_v29, %v6594_v44 }
 0x911   :  { %7873 = vst [vmem:[#allocation33_spill] sm:$0xff] %v6635_v20  ;;  %v6638_v11 = vadd.f32 %v4743_v8, %v6537_v1  ;;  %v4777_v1 = vadd.f32 %v4776_v54, %v4775_v37  ;;  %v4716_v8 = vadd.f32 %v4715_v51, %v4714_v52  ;;  %v7877_v20 = vld [vmem:[#allocation8_spill] sm:$0xff]  ;;  %v2076_v16 = vadd.f32 %v4646_v41, %v4582_v9  ;;  %v7881_v41 = vld [vmem:[#allocation9_spill] sm:$0xff] }
 0x912   :  { %v6640_v43 = vpop.f32.mrf.mxu1  ;;  %v2428_v4 = vsub.s32 6, %v7877_v20  ;;  %v4780_v54 = vadd.f32 %v6573_v55, %v6568_v62  ;;  %v2267_v52 = vadd.f32 %v4771_v31, %v6562_v47  ;;  %v4658_v62 = vadd.f32 %v6501_v18, %v6495_v23 }
 0x913   :  { %7874 = vst [vmem:[#allocation34_spill] sm:$0xff] %v6638_v11  ;;  %7875 = vst [vmem:[#allocation35_spill] sm:$0xff] %v6640_v43  ;;  %v6652_v11 = vpop.f32.mrf.mxu0  ;;  %v2181_v37 = vadd.f32 %v4716_v8, %v2084_v38  ;;  %v2275_v49 = vadd.f32 %v4777_v1, %v6571_v35  ;;  %v2173_v7 = vadd.f32 %v4710_v17, %v2076_v16  ;;  %v7883_v38 = vld [vmem:[#allocation13_spill] sm:$0xff] }
 0x914   :  { %v4747_v56 = vpop.f32.mrf.mxu1  ;;  %v4606_v35 = vadd.f32 %v6519_v27, %v6513_v15  ;;  %v4670_v51 = vadd.f32 %v6521_v61, %v6515_v10  ;;  %v2100_v55 = vadd.f32 %v4664_v5, %v4600_v50  ;;  %v4612_v23 = vadd.f32 %v6529_v21, %v6523_v2 }
 0x915   :  { %v6672_v3 = vpop.f32.mrf.mxu0  ;;  %v4676_v18 = vadd.f32 %v6531_v53, %v6525_v63  ;;  %v4783_v15 = vadd.f32 %v6577_v26, %v6575_v34  ;;  %v4722_v10 = vadd.f32 %v6586_v39, %v6579_v22  ;;  %v2270_v44 = vadd.f32 %v4774_v59, %v2173_v7  ;;  %v7880_v26 = vld [vmem:[#allocation22_spill] sm:$0xff] }
 0x916   :  { %v4748_v12 = vpop.f32.mrf.mxu1  ;;  %v2092_v57 = vadd.f32 %v4658_v62, %v4594_v40  ;;  %v2108_v29 = vadd.f32 %v4670_v51, %v4606_v35  ;;  %v2197_v9 = vadd.f32 %v4728_v42, %v2100_v55  ;;  %v2291_v22 = vadd.f32 %v4789_v25, %v7880_v26  ;;  %v7886_v51 = vld [vmem:[#allocation11_spill] sm:$0xff]  ;;  %v7887_v42 = vld [vmem:[#allocation18_spill] sm:$0xff]  ;;  %v7888_v55 = vld [vmem:[#allocation16_spill] sm:$0xff] }
 0x917   :  { %v4749_v43 = vadd.f32 %v4748_v12, %v4747_v56  ;;  %v6695_v48 = vpop.f32.mrf.mxu0  ;;  %v2116_v39 = vadd.f32 %v4676_v18, %v4612_v23  ;;  %v7882_v12 = vld [vmem:[#allocation10_spill] sm:$0xff]  ;;  %v2283_v31 = vadd.f32 %v4783_v15, %v7883_v38  ;;  %v4740_v40 = vadd.f32 %v6629_v19, %v6624_v46  ;;  %v7889_v25 = vld [vmem:[#allocation17_spill] sm:$0xff]  ;;  %v7891_v23 = vld [vmem:[#allocation27_spill] sm:$0xff] }
 0x918   :  { %v6655_v13 = vpop.f32.mrf.mxu1  ;;  %v2189_v14 = vadd.f32 %v4722_v10, %v2092_v57  ;;  %v4786_v1 = vadd.f32 %v7882_v12, %v7881_v41  ;;  %v7893_v18 = vld [vmem:[#allocation29_spill] sm:$0xff]  ;;  %v7894_v57 = vld [vmem:[#allocation19_spill] sm:$0xff] }
 0x919   :  { %v6662_v24 = vadd.f32 %v4749_v43, %v6547_v60  ;;  %v5615_v60 = vld [vmem:[%s7746_s8] sm:$0xff]  ;;  %v7879_v43 = vld [vmem:[#allocation26_spill] sm:$0xff]  ;;  %v4811_v56 = vpop.f32.mrf.mxu0 }
 0x91a   :  { %v6666_v58 = vpop.f32.mrf.mxu1  ;;  %v6678_v0 = vrot.slane %v5615_v60, %v2428_v4  ;;  %v2278_v4 = vadd.f32 %v4780_v54, %v2181_v37  ;;  %v4792_v2 = vadd.f32 %v7879_v43, %v7878_v33  ;;  %v7884_v37 = vld [vmem:[#allocation14_spill] sm:$0xff]  ;;  %v7885_v54 = vld [vmem:[#allocation15_spill] sm:$0xff]  ;;  %v4801_v60 = vadd.f32 %v6622_v32, %v6620_v6 }
 0x91b   :  { %v4812_v59 = vpop.f32.mrf.mxu0  ;;  %v7892_v6 = vld [vmem:[#allocation30_spill] sm:$0xff]  ;;  %v2213_v43 = vadd.f32 %v4740_v40, %v2116_v39 }
 0x91c   :  { %v5271_v45 = vpop.f32.mrf.mxu1  ;;  %v2294_v7 = vadd.f32 %v4792_v2, %v2197_v9  ;;  %v4734_v46 = vadd.f32 %v7893_v18, %v7892_v6  ;;  %v7895_v9 = vld [vmem:[#allocation12_spill] sm:$0xff]  ;;  %v7896_v2 = vld [vmem:[#allocation25_spill] sm:$0xff] }
 0x91d   :  { %v2372_v36 = vadd.f32 %v5271_v45, %v2275_v49  ;;  %v6717_v49 = vadd.f32 %v7885_v54, %v7884_v37  ;;  %v4688_v33 = vadd.f32 %v7895_v9, %v7894_v57  ;;  %v5536_v41 = vld [vmem:[#allocation4 + $0xac] ss:$36 sps:$4 sm:$0xff]   ;;  %v4814_v12 = vpop.f32.mrf.mxu0  ;;  %v7902_v37 = vmov 0   ;;  %v7903_v18 = vld [vmem:[#allocation36_spill] sm:$0xff] }
 0x91e   :  { %v2363_v30 = vpop.f32.mrf.mxu1  ;;  %v2205_v39 = vadd.f32 %v4734_v46, %v2108_v29  ;;  %v4813_v29 = vadd.f32 %v4812_v59, %v4811_v56  ;;  %v4807_v46 = vadd.f32 %v6652_v11, %v7903_v18  ;;  %v7904_v56 = vld [vmem:[#allocation33_spill] sm:$0xff]  ;;  %v7905_v59 = vld [vmem:[#allocation35_spill] sm:$0xff] }
 0x91f   :  { %v2364_v47 = vadd.f32 %v2363_v30, %v2267_v52  ;;  %v2432_v61 = vadd.f32 %v6678_v0, %v2372_v36  ;;  %v4682_v30 = vadd.f32 %v7887_v42, %v7886_v51  ;;  %v6755_v42 = vld [vmem:[#allocation4 + $0xf8] ss:$36 sps:$4 sm:$0xff]  }
 0x920   :  { %v5272_v27 = vpop.f32.mrf.mxu1  ;;  %v2323_v9 = vadd.f32 %v4813_v29, %v6662_v24 }
 0x921   :  { %v2375_v28 = vadd.f32 %v5272_v27, %v2278_v4  ;;  %v2430_v63 = vadd.f32 %v6678_v0, %v2364_v47  ;;  %v2448_v17 = vmax.f32 %v2432_v61, 0.0  ;;  %v4624_v47 = vadd.f32 %v7889_v25, %v7888_v55  ;;  %v7890_v4 = vld [vmem:[#allocation23_spill] sm:$0xff]  ;;  %v4815_v55 = vpop.f32.mrf.mxu0 }
 0x922   :  { %v2366_v21 = vpop.f32.mrf.mxu1  ;;  %v4795_v32 = vadd.f32 %v7891_v23, %v7890_v4  ;;  %v2286_v61 = vadd.f32 %v4786_v1, %v2189_v14  ;;  %v7899_v1 = vld [vmem:[#allocation28_spill] sm:$0xff]  ;;  %v4816_v57 = vadd.f32 %v4815_v55, %v4814_v12 }
 0x923   :  { %v2433_v53 = vadd.f32 %v6678_v0, %v2375_v28  ;;  %v2367_v34 = vadd.f32 %v2366_v21, %v2270_v44  ;;  %v2446_v36 = vmax.f32 %v2430_v63, 0.0  ;;  %v5525_v28 = vld [vmem:[#allocation4 + $0xe8] ss:$36 sps:$4 sm:$0xff]   ;;  %v5528_v44 = vld [vmem:[#allocation4 + $0xf0] ss:$36 sps:$4 sm:$0xff]   ;;  %v2132_v6 = vadd.f32 %v4688_v33, %v4624_v47 }
 0x924   :  { %v5275_v8 = vpop.f32.mrf.mxu1  ;;  %v7897_v21 = vld [vmem:[#allocation21_spill] sm:$0xff] }
 0x925   :  { %v2449_v16 = vmax.f32 %v2433_v53, 0.0  ;;  %v2431_v50 = vadd.f32 %v6678_v0, %v2367_v34  ;;  %v2388_v5 = vadd.f32 %v5275_v8, %v2291_v22  ;;  %v4804_v63 = vadd.f32 %v7897_v21, %v7896_v2  ;;  %v7898_v34 = vld [vmem:[#allocation20_spill] sm:$0xff]  ;;  %v7906_v21 = vld [vmem:[#allocation34_spill] sm:$0xff] }
 0x926   :  { %v2379_v45 = vpop.f32.mrf.mxu1  ;;  %v2307_v26 = vadd.f32 %v4801_v60, %v7898_v34  ;;  %v5533_v22 = vld [vmem:[#allocation4 + $0xa4] ss:$36 sps:$4 sm:$0xff]   ;;  %v2315_v24 = vadd.f32 %v4807_v46, %v7906_v21 }
 0x927   :  { %v6723_v52 = vpack.c.bf16 %v2449_v16, %v2448_v17  ;;  %v2447_v62 = vmax.f32 %v2431_v50, 0.0  ;;  %v2380_v35 = vadd.f32 %v2379_v45, %v2283_v31  ;;  %v2436_v10 = vadd.f32 %v6678_v0, %v2388_v5  ;;  %v7900_v31 = vld [vmem:[#allocation24_spill] sm:$0xff]  ;;  %v7901_v50 = vld [vmem:[#allocation31_spill] sm:$0xff] }
 0x928   :  { %v5276_v19 = vpop.f32.mrf.mxu1  ;;  %v4798_v17 = vadd.f32 %v7900_v31, %v7899_v1  ;;  %v2299_v5 = vadd.f32 %v4795_v32, %v7901_v50  ;;  %v2310_v51 = vadd.f32 %v4804_v63, %v2213_v43 }
 0x929   :  { %v6733_v15 = vpack.c.bf16 %v2447_v62, %v2446_v36  ;;  %v2391_v27 = vadd.f32 %v5276_v19, %v2294_v7  ;;  %v2434_v8 = vadd.f32 %v6678_v0, %v2380_v35  ;;  %v2452_v54 = vmax.f32 %v2436_v10, 0.0  ;;  %v5531_v7 = vld [vmem:[#allocation4 + $0xa0] ss:$36 sps:$4 sm:$0xff]   ;;  %v5534_v36 = vld [vmem:[#allocation4 + $0xa8] ss:$36 sps:$4 sm:$0xff]  }
 0x92a   :  { %v2382_v53 = vpop.f32.mrf.mxu1  ;;  %v4752_v62 = vadd.f32 %v6666_v58, %v6655_v13  ;;  %v4746_v19 = vadd.f32 %v7905_v59, %v7904_v56  ;;  %v2302_v58 = vadd.f32 %v4798_v17, %v2205_v39 }
 0x92b   :  { %v2437_v38 = vadd.f32 %v6678_v0, %v2391_v27  ;;  %v2383_v14 = vadd.f32 %v2382_v53, %v2286_v61  ;;  %4463 = vmatmul.mubr.msk.bf16.vlgmr.msra.gmra.mxu0 %vm433_vm4, %v6733_v15  ;;  %4471 = vmatmul.mubr.msk.bf16.vlgmr.msra.gmra.mxu1 %vm433_vm4, %v6733_v15  ;;  %v2450_v25 = vmax.f32 %v2434_v8, 0.0 }
 0x92c   :  { %v5279_v16 = vpop.f32.mrf.mxu1  ;;  %2648 = vmatprep.mubr.bf16.mxu0 %v7902_v37  ;;  %2761 = vmatprep.mubr.bf16.mxu1 %v7902_v37 }
 0x92d   :  { %v2453_v60 = vmax.f32 %v2437_v38, 0.0  ;;  %v2435_v40 = vadd.f32 %v6678_v0, %v2383_v14  ;;  %v2404_v45 = vadd.f32 %v5279_v16, %v2307_v26  ;;  %2845 = vmatpush1.bf16.msra.mxu0 %v5525_v28  ;;  %2958 = vmatpush1.bf16.msra.mxu1 %v5528_v44  ;;  %v2124_v28 = vadd.f32 %v4682_v30, %v6717_v49 }
 0x92e   :  { %v2395_v35 = vpop.f32.mrf.mxu1  ;;  %2846 = vmatprep.subr.bf16.mxu0 %v5533_v22  ;;  %2959 = vmatprep.subr.bf16.mxu1 %v5536_v41  ;;  %v2229_v44 = vadd.f32 %v4752_v62, %v2132_v6  ;;  %v4810_v49 = vadd.f32 %v6695_v48, %v6672_v3  ;;  %v5616_v62 = vld [vmem:[#allocation2 + $0x4] ss:$36 sps:$4 sm:$0xff]  }
 0x92f   :  { %v6757_v4 = vpack.c.bf16 %v2453_v60, %v2452_v54  ;;  %v2451_v23 = vmax.f32 %v2435_v40, 0.0  ;;  %v2396_v32 = vadd.f32 %v2395_v35, %v2299_v5  ;;  %v2440_v27 = vadd.f32 %v6678_v0, %v2404_v45 }
 0x930   :  { %v5280_v13 = vpop.f32.mrf.mxu1  ;;  %v2221_v2 = vadd.f32 %v4746_v19, %v2124_v28  ;;  %v2326_v41 = vadd.f32 %v4816_v57, %v2229_v44 }
 0x931   :  { %v6763_v10 = vpack.c.bf16 %v2451_v23, %v2450_v25  ;;  %v2407_v61 = vadd.f32 %v5280_v13, %v2310_v51  ;;  %2847 = vmatpush1.bf16.msra.mxu0 %v5531_v7  ;;  %2960 = vmatpush1.bf16.msra.mxu1 %v5534_v36  ;;  %v2438_v11 = vadd.f32 %v6678_v0, %v2396_v32  ;;  %v2456_v63 = vmax.f32 %v2440_v27, 0.0 }
 0x932   :  { %v2398_v47 = vpop.f32.mrf.mxu1  ;;  %5285 = vmatprep.subr.bf16.mxu0 %v6755_v42  ;;  %v2318_v31 = vadd.f32 %v4810_v49, %v2221_v2 }
 0x933   :  { %v2441_v33 = vadd.f32 %v6678_v0, %v2407_v61  ;;  %v2399_v43 = vadd.f32 %v2398_v47, %v2302_v58  ;;  %4464 = vmatmul.mubr.msk.bf16.gmra.mxu0 %vm433_vm4, %v6723_v52  ;;  %4472 = vmatmul.mubr.msk.bf16.gmra.mxu1 %vm433_vm4, %v6723_v52  ;;  %v2454_v12 = vmax.f32 %v2438_v11, 0.0 }
 0x934   :  { %v5283_v30 = vpop.f32.mrf.mxu1  ;;  %2658 = vmatprep.mubr.bf16.mxu0 %v7902_v37  ;;  %2771 = vmatprep.mubr.bf16.mxu1 %v7902_v37 }
 0x935   :  { %v2457_v53 = vmax.f32 %v2441_v33, 0.0  ;;  %v2439_v34 = vadd.f32 %v6678_v0, %v2399_v43  ;;  %v2420_v26 = vadd.f32 %v5283_v30, %v2323_v9 }
 0x936   :  { %v2411_v22 = vpop.f32.mrf.mxu1 }
 0x937   :  { %v6781_v8 = vpack.c.bf16 %v2457_v53, %v2456_v63  ;;  %v2455_v38 = vmax.f32 %v2439_v34, 0.0  ;;  %v2412_v14 = vadd.f32 %v2411_v22, %v2315_v24  ;;  %v2444_v39 = vadd.f32 %v6678_v0, %v2420_v26 }
 0x938   :  { %v5284_v3 = vpop.f32.mrf.mxu1 }
 0x939   :  { %v6783_v48 = vpack.c.bf16 %v2455_v38, %v2454_v12  ;;  %v2423_v1 = vadd.f32 %v5284_v3, %v2326_v41  ;;  %v2442_v16 = vadd.f32 %v6678_v0, %v2412_v14  ;;  %v2460_v54 = vmax.f32 %v2444_v39, 0.0 }
 0x93a   :  { %v2414_v17 = vpop.f32.mrf.mxu1 }
 0x93b   :  { %v2445_v50 = vadd.f32 %v6678_v0, %v2423_v1  ;;  %v2415_v5 = vadd.f32 %v2414_v17, %v2318_v31  ;;  %4465 = vmatmul.mubr.msk.bf16.gmra.mxu0 %vm433_vm4, %v6763_v10  ;;  %4473 = vmatmul.mubr.msk.bf16.gmra.mxu1 %vm433_vm4, %v6763_v10  ;;  %v2458_v45 = vmax.f32 %v2442_v16, 0.0 }
 0x93c   :  { %2668 = vmatprep.mubr.bf16.mxu0 %v7902_v37  ;;  %2781 = vmatprep.mubr.bf16.mxu1 %v7902_v37 }
 0x93d   :  { %v2461_v60 = vmax.f32 %v2445_v50, 0.0  ;;  %v2443_v40 = vadd.f32 %v6678_v0, %v2415_v5  ;;  %v5538_v0 = vld [vmem:[#allocation4 + $0xb0] ss:$36 sps:$4 sm:$0xff]  }
 0x93f   :  { %v6795_v7 = vpack.c.bf16 %v2461_v60, %v2460_v54  ;;  %v2459_v36 = vmax.f32 %v2443_v40, 0.0 }
 0x941   :  { %v6797_v29 = vpack.c.bf16 %v2459_v36, %v2458_v45 }
 0x943   :  { %4466 = vmatmul.mubr.msk.bf16.gmra.mxu0 %vm433_vm4, %v6757_v4  ;;  %4474 = vmatmul.mubr.msk.bf16.gmra.mxu1 %vm433_vm4, %v6757_v4 }
 0x944   :  { %2678 = vmatprep.mubr.bf16.mxu0 %v7902_v37  ;;  %2791 = vmatprep.mubr.bf16.mxu1 %v7902_v37 }
 0x94b   :  { %4467 = vmatmul.mubr.msk.bf16.gmra.mxu0 %vm433_vm4, %v6783_v48  ;;  %4475 = vmatmul.mubr.msk.bf16.gmra.mxu1 %vm433_vm4, %v6783_v48 }
 0x94c   :  { %2688 = vmatprep.mubr.bf16.mxu0 %v7902_v37  ;;  %2801 = vmatprep.mubr.bf16.mxu1 %v7902_v37 }
 0x953   :  { %4468 = vmatmul.mubr.msk.bf16.gmra.mxu0 %vm433_vm4, %v6781_v8  ;;  %4476 = vmatmul.mubr.msk.bf16.gmra.mxu1 %vm433_vm4, %v6781_v8 }
 0x954   :  { %2698 = vmatprep.mubr.bf16.mxu0 %v7902_v37  ;;  %2811 = vmatprep.mubr.bf16.mxu1 %v7902_v37 }
 0x95b   :  { %4469 = vmatmul.mubr.msk.bf16.gmra.mxu0 %vm433_vm4, %v6797_v29  ;;  %4477 = vmatmul.mubr.msk.bf16.gmra.mxu1 %vm433_vm4, %v6797_v29 }
 0x95c   :  { %2708 = vmatprep.mubr.bf16.mxu0 %v7902_v37  ;;  %2821 = vmatprep.mubr.bf16.mxu1 %v7902_v37 }
 0x963   :  { %4470 = vmatmul.mubr.msk.bf16.gmra.mxu0 %vm433_vm4, %v6795_v7  ;;  %4478 = vmatmul.mubr.msk.bf16.gmra.mxu1 %vm433_vm4, %v6795_v7 }
 0x964   :  { %2864 = vmatprep.mubr.bf16.mxu0 %v7902_v37  ;;  %2977 = vmatprep.mubr.bf16.mxu1 %v7902_v37 }
 0x96b   :  { %4479 = vmatmul.mubr.msk.bf16.vlgmr.msra.gmra.mxu0 %vm433_vm4, %v6733_v15  ;;  %4487 = vmatmul.mubr.msk.bf16.vlgmr.msra.gmra.mxu1 %vm433_vm4, %v6733_v15 }
 0x96c   :  { %2874 = vmatprep.mubr.bf16.mxu0 %v7902_v37  ;;  %2987 = vmatprep.mubr.bf16.mxu1 %v7902_v37 }
 0x96d   :  { %5286 = vmatpush3.bf16.msra.mxu0 %v6755_v42 }
 0x96e   :  { %5287 = vmatprep.subr.bf16.mxu0 %v5538_v0 }
 0x971   :  { %5288 = vmatpush3.bf16.msra.mxu0 %v5538_v0 }
 0x973   :  { %4480 = vmatmul.mubr.msk.bf16.gmra.mxu0 %vm433_vm4, %v6723_v52  ;;  %4488 = vmatmul.mubr.msk.bf16.gmra.mxu1 %vm433_vm4, %v6723_v52 }
 0x974   :  { %2884 = vmatprep.mubr.bf16.mxu0 %v7902_v37  ;;  %2997 = vmatprep.mubr.bf16.mxu1 %v7902_v37 }
 0x97b   :  { %4481 = vmatmul.mubr.msk.bf16.gmra.mxu0 %vm433_vm4, %v6763_v10  ;;  %4489 = vmatmul.mubr.msk.bf16.gmra.mxu1 %vm433_vm4, %v6763_v10 }
 0x97c   :  { %2894 = vmatprep.mubr.bf16.mxu0 %v7902_v37  ;;  %3007 = vmatprep.mubr.bf16.mxu1 %v7902_v37 }
 0x983   :  { %4482 = vmatmul.mubr.msk.bf16.gmra.mxu0 %vm433_vm4, %v6757_v4  ;;  %4490 = vmatmul.mubr.msk.bf16.gmra.mxu1 %vm433_vm4, %v6757_v4 }
 0x984   :  { %2904 = vmatprep.mubr.bf16.mxu0 %v7902_v37  ;;  %3017 = vmatprep.mubr.bf16.mxu1 %v7902_v37 }
 0x98b   :  { %4483 = vmatmul.mubr.msk.bf16.gmra.mxu0 %vm433_vm4, %v6783_v48  ;;  %4491 = vmatmul.mubr.msk.bf16.gmra.mxu1 %vm433_vm4, %v6783_v48 }
 0x98c   :  { %2914 = vmatprep.mubr.bf16.mxu0 %v7902_v37  ;;  %3027 = vmatprep.mubr.bf16.mxu1 %v7902_v37 }
 0x993   :  { %4484 = vmatmul.mubr.msk.bf16.gmra.mxu0 %vm433_vm4, %v6781_v8  ;;  %4492 = vmatmul.mubr.msk.bf16.gmra.mxu1 %vm433_vm4, %v6781_v8 }
 0x994   :  { %2924 = vmatprep.mubr.bf16.mxu0 %v7902_v37  ;;  %3037 = vmatprep.mubr.bf16.mxu1 %v7902_v37 }
 0x99b   :  { %4485 = vmatmul.mubr.msk.bf16.gmra.mxu0 %vm433_vm4, %v6797_v29  ;;  %4493 = vmatmul.mubr.msk.bf16.gmra.mxu1 %vm433_vm4, %v6797_v29 }
 0x99c   :  { %2934 = vmatprep.mubr.bf16.mxu0 %v7902_v37  ;;  %3047 = vmatprep.mubr.bf16.mxu1 %v7902_v37 }
 0x9a3   :  { %4486 = vmatmul.mubr.msk.bf16.gmra.mxu0 %vm433_vm4, %v6795_v7  ;;  %4494 = vmatmul.mubr.msk.bf16.gmra.mxu1 %vm433_vm4, %v6795_v7 }
 0x9a4   :  { %5289 = vmatprep.mubr.msk.bf16.mxu0 %vm433_vm4, %v6733_v15  ;;  %3259 = vmatprep.mubr.bf16.mxu1 %v5616_v62  ;;  %v5617_v15 = vld [vmem:[#allocation2 + $0xc] ss:$36 sps:$4 sm:$0xff]  }
 0x9ab   :  { %5290 = vmatmul.mubr.msk.bf16.vlgmr.msra.gmra.mxu0 %vm433_vm4, %v6723_v52 }
 0x9ac   :  { %5293 = vmatprep.mubr.msk.bf16.mxu0 %vm433_vm4, %v6763_v10 }
 0x9b3   :  { %5294 = vmatmul.mubr.msk.bf16.gmra.mxu0 %vm433_vm4, %v6757_v4 }
 0x9b4   :  { %5297 = vmatprep.mubr.msk.bf16.mxu0 %vm433_vm4, %v6783_v48 }
 0x9bb   :  { %5298 = vmatmul.mubr.msk.bf16.gmra.mxu0 %vm433_vm4, %v6781_v8 }
 0x9bc   :  { %5301 = vmatprep.mubr.msk.bf16.mxu0 %vm433_vm4, %v6797_v29 }
 0x9c3   :  { %5302 = vmatmul.mubr.msk.bf16.gmra.mxu0 %vm433_vm4, %v6795_v7 }
 0x9c4   :  { %3356 = vmatprep.mubr.bf16.mxu0 %v5617_v15 }
 0x9eb   :  { %v6892_v52 = vpop.f32.mrf.mxu0  ;;  %v6894_v37 = vpop.f32.mrf.mxu1 }
 0x9ec   :  { %7907 = vst [vmem:[#allocation32_spill] sm:$0xff] %v6892_v52  ;;  %7908 = vst [vmem:[#allocation26_spill] sm:$0xff] %v6894_v37 }
 0x9ed   :  { %v6896_v35 = vpop.f32.mrf.mxu0  ;;  %v6898_v51 = vpop.f32.mrf.mxu1 }
 0x9ee   :  { %7909 = vst [vmem:[#allocation22_spill] sm:$0xff] %v6898_v51 }
 0x9ef   :  { %v6900_v42 = vpop.f32.mrf.mxu0  ;;  %v6902_v55 = vpop.f32.mrf.mxu1 }
 0x9f0   :  { %7910 = vst [vmem:[#allocation9_spill] sm:$0xff] %v6900_v42  ;;  %7911 = vst [vmem:[#allocation10_spill] sm:$0xff] %v6902_v55 }
 0x9f1   :  { %v6908_v23 = vpop.f32.mrf.mxu0  ;;  %v6910_v32 = vpop.f32.mrf.mxu1 }
 0x9f2   :  { %7912 = vst [vmem:[#allocation13_spill] sm:$0xff] %v6910_v32 }
 0x9f3   :  { %v6912_v6 = vpop.f32.mrf.mxu0  ;;  %v6914_v18 = vpop.f32.mrf.mxu1 }
 0x9f4   :  { %7913 = vst [vmem:[#allocation14_spill] sm:$0xff] %v6912_v6  ;;  %7914 = vst [vmem:[#allocation15_spill] sm:$0xff] %v6914_v18 }
 0x9f5   :  { %v6916_v46 = vpop.f32.mrf.mxu0  ;;  %v6918_v56 = vpop.f32.mrf.mxu1 }
 0x9f7   :  { %v6920_v59 = vpop.f32.mrf.mxu0  ;;  %v6922_v19 = vpop.f32.mrf.mxu1 }
 0x9f8   :  { %7915 = vst [vmem:[#allocation11_spill] sm:$0xff] %v6920_v59  ;;  %7916 = vst [vmem:[#allocation18_spill] sm:$0xff] %v6922_v19 }
 0x9f9   :  { %v6928_v10 = vpop.f32.mrf.mxu0  ;;  %v6930_v27 = vpop.f32.mrf.mxu1 }
 0x9fb   :  { %v6932_v61 = vpop.f32.mrf.mxu0  ;;  %v6934_v28 = vpop.f32.mrf.mxu1 }
 0x9fd   :  { %v6936_v44 = vpop.f32.mrf.mxu0  ;;  %v6938_v57 = vpop.f32.mrf.mxu1 }
 0x9ff   :  { %v6940_v47 = vpop.f32.mrf.mxu0  ;;  %v6942_v9 = vpop.f32.mrf.mxu1 }
 0xa01   :  { %v6944_v11 = vpop.f32.mrf.mxu0  ;;  %v6946_v33 = vpop.f32.mrf.mxu1 }
 0xa03   :  { %v6948_v43 = vpop.f32.mrf.mxu0  ;;  %v6950_v2 = vpop.f32.mrf.mxu1 }
 0xa05   :  { %v6952_v49 = vpop.f32.mrf.mxu0  ;;  %v6954_v30 = vpop.f32.mrf.mxu1 }
 0xa07   :  { %v6956_v21 = vpop.f32.mrf.mxu0  ;;  %v6958_v24 = vpop.f32.mrf.mxu1 }
 0xa09   :  { %v6960_v63 = vpop.f32.mrf.mxu0  ;;  %v6962_v53 = vpop.f32.mrf.mxu1 }
 0xa0b   :  { %v6964_v34 = vpop.f32.mrf.mxu0  ;;  %v6966_v26 = vpop.f32.mrf.mxu1 }
 0xa0d   :  { %v6968_v22 = vpop.f32.mrf.mxu0  ;;  %v6970_v41 = vpop.f32.mrf.mxu1 }
 0xa0f   :  { %v6972_v12 = vpop.f32.mrf.mxu0  ;;  %v6974_v8 = vpop.f32.mrf.mxu1 }
 0xa11   :  { %v6976_v38 = vpop.f32.mrf.mxu0  ;;  %v6978_v14 = vpop.f32.mrf.mxu1 }
 0xa13   :  { %v6980_v3 = vpop.f32.mrf.mxu0  ;;  %v6982_v48 = vpop.f32.mrf.mxu1 }
 0xa15   :  { %v2692_v39 = vpop.f32.mrf.mxu0  ;;  %v2805_v1 = vpop.f32.mrf.mxu1 }
 0xa17   :  { %v2694_v31 = vpop.f32.mrf.mxu0  ;;  %v2807_v17 = vpop.f32.mrf.mxu1 }
 0xa19   :  { %v2696_v16 = vpop.f32.mrf.mxu0  ;;  %v2809_v50 = vpop.f32.mrf.mxu1 }
 0xa1b   :  { %v2700_v5 = vpop.f32.mrf.mxu0  ;;  %v2813_v54 = vpop.f32.mrf.mxu1 }
 0xa1d   :  { %v2702_v60 = vpop.f32.mrf.mxu0  ;;  %v2815_v40 = vpop.f32.mrf.mxu1 }
 0xa1f   :  { %v2704_v45 = vpop.f32.mrf.mxu0  ;;  %v2817_v7 = vpop.f32.mrf.mxu1 }
 0xa21   :  { %v2706_v36 = vpop.f32.mrf.mxu0  ;;  %v2819_v29 = vpop.f32.mrf.mxu1 }
 0xa22   :  { %v3210_v6 = vpack.c.bf16 %v2706_v36, %v2702_v60  ;;  %v3212_v59 = vpack.c.bf16 %v2819_v29, %v2815_v40  ;;  %v3176_v40 = vpack.c.bf16 %v6946_v33, %v6938_v57  ;;  %v3165_v57 = vpack.c.bf16 %v6928_v10, %v6916_v46  ;;  %v7929_v46 = vld [vmem:[#allocation13_spill] sm:$0xff]  ;;  %v7931_v29 = vld [vmem:[#allocation14_spill] sm:$0xff] }
 0xa23   :  { %v2710_v0 = vpop.f32.mrf.mxu0  ;;  %v2823_v62 = vpop.f32.mrf.mxu1 }
 0xa25   :  { %v2712_v15 = vpop.f32.mrf.mxu0  ;;  %v2825_v4 = vpop.f32.mrf.mxu1 }
 0xa27   :  { %v2714_v25 = vpop.f32.mrf.mxu0  ;;  %v2827_v58 = vpop.f32.mrf.mxu1 }
 0xa28   :  { %v3218_v52 = vpack.c.bf16 %v2714_v25, %v2710_v0  ;;  %v3220_v42 = vpack.c.bf16 %v2827_v58, %v2823_v62  ;;  %v3201_v58 = vpack.c.bf16 %v2696_v16, %v2692_v39  ;;  %v3203_v0 = vpack.c.bf16 %v2809_v50, %v2805_v1 }
 0xa29   :  { %v2716_v13 = vpop.f32.mrf.mxu0  ;;  %v2829_v20 = vpop.f32.mrf.mxu1  ;;  %v3192_v16 = vpack.c.bf16 %v6976_v38, %v6968_v22  ;;  %v3194_v50 = vpack.c.bf16 %v6978_v14, %v6970_v41  ;;  %v3183_v41 = vpack.c.bf16 %v6960_v63, %v6952_v49  ;;  %v3185_v38 = vpack.c.bf16 %v6962_v53, %v6954_v30  ;;  %v5630_v14 = vld [vmem:[#allocation2 + $0xd8] ss:$36 sps:$4 sm:$0xff]  }
 0xa2a   :  { %v3219_v37 = vpack.c.bf16 %v2716_v13, %v2712_v15  ;;  %v3221_v55 = vpack.c.bf16 %v2829_v20, %v2825_v4  ;;  %v3209_v13 = vpack.c.bf16 %v2704_v45, %v2700_v5  ;;  %v3211_v20 = vpack.c.bf16 %v2817_v7, %v2813_v54  ;;  %v7933_v15 = vld [vmem:[#allocation18_spill] sm:$0xff] }
 0xa2b   :  { %v6984_v18 = vpop.f32.mrf.mxu0  ;;  %v6986_v19 = vpop.f32.mrf.mxu1  ;;  %v3182_v49 = vpack.c.bf16 %v6956_v21, %v6948_v43  ;;  %v3184_v30 = vpack.c.bf16 %v6958_v24, %v6950_v2  ;;  %v3173_v43 = vpack.c.bf16 %v6940_v47, %v6932_v61  ;;  %v3175_v2 = vpack.c.bf16 %v6942_v9, %v6934_v28  ;;  %v7928_v9 = vld [vmem:[#allocation22_spill] sm:$0xff] }
 0xa2c   :  { %7917 = vst [vmem:[#allocation16_spill] sm:$0xff] %v6984_v18  ;;  %7918 = vst [vmem:[#allocation17_spill] sm:$0xff] %v6986_v19  ;;  %4843 = vmatprep.subr.bf16.mxu1 %v3219_v37  ;;  %4907 = vmatprep.subr.bf16.mxu0 %v3221_v55  ;;  %v3156_v47 = vpack.c.bf16 %v6908_v23, %v6896_v35  ;;  %v3158_v10 = vpack.c.bf16 %v7929_v46, %v7928_v9 }
 0xa2d   :  { %v6988_v32 = vpop.f32.mrf.mxu0  ;;  %v6990_v51 = vpop.f32.mrf.mxu1  ;;  %4844 = vmatpush3.bf16.msra.mxu1 %v3218_v52  ;;  %4908 = vmatpush3.bf16.msra.mxu0 %v3220_v42 }
 0xa2e   :  { %7919 = vst [vmem:[#allocation23_spill] sm:$0xff] %v6990_v51  ;;  %4845 = vmatprep.subr.bf16.mxu1 %v3210_v6  ;;  %4909 = vmatprep.subr.bf16.mxu0 %v3212_v59  ;;  %v3200_v6 = vpack.c.bf16 %v2694_v31, %v6980_v3  ;;  %v3202_v59 = vpack.c.bf16 %v2807_v17, %v6982_v48 }
 0xa2f   :  { %v6992_v25 = vpop.f32.mrf.mxu0  ;;  %v6994_v4 = vpop.f32.mrf.mxu1  ;;  %v3191_v3 = vpack.c.bf16 %v6972_v12, %v6964_v34  ;;  %v3193_v48 = vpack.c.bf16 %v6974_v8, %v6966_v26  ;;  %v3174_v8 = vpack.c.bf16 %v6944_v11, %v6936_v44  ;;  %v3167_v11 = vpack.c.bf16 %v6930_v27, %v6918_v56  ;;  %v7930_v27 = vld [vmem:[#allocation11_spill] sm:$0xff]  ;;  %v5631_v26 = vld [vmem:[#allocation2 + $0xe0] ss:$36 sps:$4 sm:$0xff]  }
 0xa30   :  { %7920 = vst [vmem:[#allocation27_spill] sm:$0xff] %v6992_v25  ;;  %7921 = vst [vmem:[#allocation30_spill] sm:$0xff] %v6994_v4  ;;  %v7932_v62 = vpack.c.bf16 %v7930_v27, %v7931_v29  ;;  %v5622_v27 = vld [vmem:[#allocation2 + $0x48] ss:$36 sps:$4 sm:$0xff]   ;;  %v5623_v29 = vld [vmem:[#allocation2 + $0x50] ss:$36 sps:$4 sm:$0xff]  }
 0xa31   :  { %v7000_v60 = vpop.f32.mrf.mxu0  ;;  %v7002_v52 = vpop.f32.mrf.mxu1  ;;  %4846 = vmatpush3.bf16.msra.mxu1 %v3209_v13  ;;  %4910 = vmatpush3.bf16.msra.mxu0 %v3211_v20  ;;  %v7934_v13 = vld [vmem:[#allocation15_spill] sm:$0xff]  ;;  %v5632_v4 = vld [vmem:[#allocation2 + $0x124] ss:$36 sps:$4 sm:$0xff]  }
 0xa32   :  { %7922 = vst [vmem:[#allocation29_spill] sm:$0xff] %v7000_v60  ;;  %7923 = vst [vmem:[#allocation19_spill] sm:$0xff] %v7002_v52  ;;  %4847 = vmatprep.subr.bf16.mxu1 %v3201_v58  ;;  %4911 = vmatprep.subr.bf16.mxu0 %v3203_v0  ;;  %v7935_v20 = vpack.c.bf16 %v7933_v15, %v7934_v13  ;;  %v5624_v13 = vld [vmem:[#allocation2 + $0x94] ss:$36 sps:$4 sm:$0xff]  }
 0xa33   :  { %v7008_v39 = vpop.f32.mrf.mxu0  ;;  %v7010_v1 = vpop.f32.mrf.mxu1 }
 0xa34   :  { %7924 = vst [vmem:[#allocation12_spill] sm:$0xff] %v7008_v39  ;;  %7925 = vst [vmem:[#allocation25_spill] sm:$0xff] %v7010_v1 }
 0xa35   :  { %v7016_v5 = vpop.f32.mrf.mxu0  ;;  %v7018_v54 = vpop.f32.mrf.mxu1  ;;  %4848 = vmatpush3.bf16.msra.mxu1 %v3200_v6  ;;  %4912 = vmatpush3.bf16.msra.mxu0 %v3202_v59  ;;  %v7936_v6 = vld [vmem:[#allocation9_spill] sm:$0xff]  ;;  %v7937_v59 = vld [vmem:[#allocation32_spill] sm:$0xff] }
 0xa36   :  { %4849 = vmatprep.subr.bf16.mxu1 %v3192_v16  ;;  %4913 = vmatprep.subr.bf16.mxu0 %v3194_v50  ;;  %v7938_v16 = vpack.c.bf16 %v7936_v6, %v7937_v59  ;;  %v7939_v50 = vld [vmem:[#allocation10_spill] sm:$0xff] }
 0xa37   :  { %v7024_v31 = vpop.f32.mrf.mxu0  ;;  %v7026_v22 = vpop.f32.mrf.mxu1 }
 0xa38   :  { %7926 = vst [vmem:[#allocation21_spill] sm:$0xff] %v7024_v31  ;;  %7927 = vst [vmem:[#allocation20_spill] sm:$0xff] %v7026_v22 }
 0xa39   :  { %v7036_v34 = vpop.f32.mrf.mxu0  ;;  %v7038_v12 = vpop.f32.mrf.mxu1  ;;  %4850 = vmatpush3.bf16.msra.mxu1 %v3191_v3  ;;  %4914 = vmatpush3.bf16.msra.mxu0 %v3193_v48  ;;  %v7940_v3 = vld [vmem:[#allocation26_spill] sm:$0xff] }
 0xa3a   :  { %4851 = vmatprep.subr.bf16.mxu1 %v3183_v41  ;;  %4915 = vmatprep.subr.bf16.mxu0 %v3185_v38  ;;  %v7941_v48 = vpack.c.bf16 %v7939_v50, %v7940_v3 }
 0xa3b   :  { %v7046_v63 = vpop.f32.mrf.mxu0  ;;  %v7048_v53 = vpop.f32.mrf.mxu1 }
 0xa3d   :  { %v7054_v45 = vpop.f32.mrf.mxu0  ;;  %v7056_v7 = vpop.f32.mrf.mxu1  ;;  %4852 = vmatpush3.bf16.msra.mxu1 %v3182_v49  ;;  %4916 = vmatpush3.bf16.msra.mxu0 %v3184_v30  ;;  %v5618_v49 = vld [vmem:[#allocation2] ss:$36 sps:$4 sm:$0xff]   ;;  %v5619_v30 = vld [vmem:[#allocation2 + $0x8] ss:$36 sps:$4 sm:$0xff]  }
 0xa3e   :  { %4853 = vmatprep.subr.bf16.mxu1 %v3174_v8  ;;  %4917 = vmatprep.subr.bf16.mxu0 %v3176_v40 }
 0xa3f   :  { %v7062_v21 = vpop.f32.mrf.mxu0  ;;  %v7064_v44 = vpop.f32.mrf.mxu1 }
 0xa41   :  { %v7070_v33 = vpop.f32.mrf.mxu0  ;;  %v7072_v24 = vpop.f32.mrf.mxu1  ;;  %4854 = vmatpush3.bf16.msra.mxu1 %v3173_v43  ;;  %4918 = vmatpush3.bf16.msra.mxu0 %v3175_v2  ;;  %v5620_v43 = vld [vmem:[#allocation2 + $0x4c] ss:$36 sps:$4 sm:$0xff]   ;;  %v5621_v2 = vld [vmem:[#allocation2 + $0x54] ss:$36 sps:$4 sm:$0xff]  }
 0xa42   :  { %4855 = vmatprep.subr.bf16.mxu1 %v3165_v57  ;;  %4919 = vmatprep.subr.bf16.mxu0 %v3167_v11 }
 0xa43   :  { %v7074_v61 = vpop.f32.mrf.mxu0  ;;  %v7076_v28 = vpop.f32.mrf.mxu1 }
 0xa45   :  { %v7082_v36 = vpop.f32.mrf.mxu0  ;;  %v7084_v56 = vpop.f32.mrf.mxu1  ;;  %4856 = vmatpush3.bf16.msra.mxu1 %v7932_v62  ;;  %4920 = vmatpush3.bf16.msra.mxu0 %v7935_v20  ;;  %v5625_v20 = vld [vmem:[#allocation2 + $0x9c] ss:$36 sps:$4 sm:$0xff]  }
 0xa46   :  { %4857 = vmatprep.subr.bf16.mxu1 %v3156_v47  ;;  %4921 = vmatprep.subr.bf16.mxu0 %v3158_v10 }
 0xa47   :  { %v7092_v58 = vpop.f32.mrf.mxu0  ;;  %v7094_v35 = vpop.f32.mrf.mxu1 }
 0xa49   :  { %v7096_v23 = vpop.f32.mrf.mxu0  ;;  %v7098_v0 = vpop.f32.mrf.mxu1  ;;  %4858 = vmatpush3.bf16.msra.mxu1 %v7938_v16  ;;  %4922 = vmatpush3.bf16.msra.mxu0 %v7941_v48 }
 0xa4b   :  { %v7106_v41 = vpop.f32.mrf.mxu0  ;;  %v7108_v38 = vpop.f32.mrf.mxu1 }
 0xa4c   :  { %3260 = vmatmul.mubr.bf16.vlgmr.msra.gmra.mxu1 %v5618_v49  ;;  %3357 = vmatmul.mubr.bf16.vlgmr.msra.gmra.mxu0 %v5619_v30  ;;  %v5626_v49 = vld [vmem:[#allocation2 + $0x90] ss:$36 sps:$4 sm:$0xff]   ;;  %v5627_v30 = vld [vmem:[#allocation2 + $0x98] ss:$36 sps:$4 sm:$0xff]  }
 0xa4d   :  { %v7110_v8 = vpop.f32.mrf.mxu0  ;;  %v7112_v40 = vpop.f32.mrf.mxu1  ;;  %3267 = vmatprep.mubr.bf16.mxu1 %v5620_v43  ;;  %3364 = vmatprep.mubr.bf16.mxu0 %v5621_v2 }
 0xa4f   :  { %v7114_v57 = vpop.f32.mrf.mxu0  ;;  %v7116_v11 = vpop.f32.mrf.mxu1 }
 0xa51   :  { %v7118_v47 = vpop.f32.mrf.mxu0  ;;  %v7120_v9 = vpop.f32.mrf.mxu1 }
 0xa53   :  { %v7122_v46 = vpop.f32.mrf.mxu0  ;;  %v7124_v10 = vpop.f32.mrf.mxu1 }
 0xa54   :  { %3268 = vmatmul.mubr.bf16.gmra.mxu1 %v5622_v27  ;;  %3365 = vmatmul.mubr.bf16.gmra.mxu0 %v5623_v29  ;;  %v5628_v27 = vld [vmem:[#allocation2 + $0xdc] ss:$36 sps:$4 sm:$0xff]   ;;  %v5629_v29 = vld [vmem:[#allocation2 + $0xe4] ss:$36 sps:$4 sm:$0xff]  }
 0xa55   :  { %v7126_v62 = vpop.f32.mrf.mxu0  ;;  %v7128_v15 = vpop.f32.mrf.mxu1  ;;  %3275 = vmatprep.mubr.bf16.mxu1 %v5624_v13  ;;  %3372 = vmatprep.mubr.bf16.mxu0 %v5625_v20 }
 0xa57   :  { %v7130_v6 = vpop.f32.mrf.mxu0  ;;  %v7132_v59 = vpop.f32.mrf.mxu1 }
 0xa59   :  { %v7134_v16 = vpop.f32.mrf.mxu0  ;;  %v7136_v50 = vpop.f32.mrf.mxu1 }
 0xa5b   :  { %v2926_v3 = vpop.f32.mrf.mxu0  ;;  %v3039_v48 = vpop.f32.mrf.mxu1 }
 0xa5c   :  { %3276 = vmatmul.mubr.bf16.gmra.mxu1 %v5626_v49  ;;  %3373 = vmatmul.mubr.bf16.gmra.mxu0 %v5627_v30  ;;  %v5633_v30 = vld [vmem:[#allocation2 + $0x12c] ss:$36 sps:$4 sm:$0xff]  }
 0xa5d   :  { %v2928_v43 = vpop.f32.mrf.mxu0  ;;  %v3041_v2 = vpop.f32.mrf.mxu1  ;;  %3283 = vmatprep.mubr.bf16.mxu1 %v5628_v27  ;;  %3380 = vmatprep.mubr.bf16.mxu0 %v5629_v29 }
 0xa5f   :  { %v2930_v13 = vpop.f32.mrf.mxu0  ;;  %v3043_v20 = vpop.f32.mrf.mxu1 }
 0xa61   :  { %v2932_v55 = vpop.f32.mrf.mxu0  ;;  %v3045_v37 = vpop.f32.mrf.mxu1 }
 0xa62   :  { %v3214_v39 = vpack.c.bf16 %v2932_v55, %v2928_v43  ;;  %v5636_v55 = vld [vmem:[#allocation2 + $0x16c] ss:$36 sps:$4 sm:$0xff]   ;;  %v7947_v43 = vld [vmem:[#allocation20_spill] sm:$0xff] }
 0xa63   :  { %v2936_v42 = vpop.f32.mrf.mxu0  ;;  %v3049_v17 = vpop.f32.mrf.mxu1 }
 0xa64   :  { %3284 = vmatmul.mubr.bf16.gmra.mxu1 %v5630_v14  ;;  %3381 = vmatmul.mubr.bf16.gmra.mxu0 %v5631_v26  ;;  %v5634_v14 = vld [vmem:[#allocation2 + $0x120] ss:$36 sps:$4 sm:$0xff]   ;;  %v3216_v26 = vpack.c.bf16 %v3045_v37, %v3041_v2  ;;  %v3207_v37 = vpack.c.bf16 %v7136_v50, %v7128_v15  ;;  %v7948_v2 = vld [vmem:[#allocation25_spill] sm:$0xff] }
 0xa65   :  { %v2938_v19 = vpop.f32.mrf.mxu0  ;;  %v3051_v49 = vpop.f32.mrf.mxu1  ;;  %3291 = vmatprep.mubr.bf16.mxu1 %v5632_v4  ;;  %3388 = vmatprep.mubr.bf16.mxu0 %v5633_v30  ;;  %v3213_v4 = vpack.c.bf16 %v2930_v13, %v2926_v3  ;;  %v5635_v30 = vld [vmem:[#allocation2 + $0x128] ss:$36 sps:$4 sm:$0xff]   ;;  %v5646_v3 = vld [vmem:[#allocation2 + $0x1f8] ss:$36 sps:$4 sm:$0xff]   ;;  %v7949_v13 = vpack.c.bf16 %v7947_v43, %v7948_v2 }
 0xa67   :  { %v2940_v18 = vpop.f32.mrf.mxu0  ;;  %v3053_v27 = vpop.f32.mrf.mxu1 }
 0xa68   :  { %v3222_v1 = vpack.c.bf16 %v2940_v18, %v2936_v42  ;;  %v3224_v31 = vpack.c.bf16 %v3053_v27, %v3049_v17  ;;  %v3205_v18 = vpack.c.bf16 %v7134_v16, %v7126_v62  ;;  %v3204_v42 = vpack.c.bf16 %v7130_v6, %v7122_v46  ;;  %v5638_v17 = vld [vmem:[#allocation2 + $0x168] ss:$36 sps:$4 sm:$0xff]   ;;  %v5639_v16 = vld [vmem:[#allocation2 + $0x1b4] ss:$36 sps:$4 sm:$0xff]  }
 0xa69   :  { %v2942_v25 = vpop.f32.mrf.mxu0  ;;  %v3055_v29 = vpop.f32.mrf.mxu1  ;;  %v3198_v62 = vpack.c.bf16 %v7120_v9, %v7112_v40  ;;  %v3195_v46 = vpack.c.bf16 %v7114_v57, %v7106_v41  ;;  %v5640_v6 = vld [vmem:[#allocation2 + $0x170] ss:$36 sps:$4 sm:$0xff]   ;;  %v3197_v40 = vpack.c.bf16 %v7116_v11, %v7108_v38  ;;  %v5641_v9 = vld [vmem:[#allocation2 + $0x1bc] ss:$36 sps:$4 sm:$0xff]   ;;  %v3186_v41 = vpack.c.bf16 %v7092_v58, %v7074_v61 }
 0xa6a   :  { %v3223_v51 = vpack.c.bf16 %v2942_v25, %v2938_v19  ;;  %v3225_v52 = vpack.c.bf16 %v3055_v29, %v3051_v49  ;;  %v3215_v25 = vpack.c.bf16 %v3043_v20, %v3039_v48  ;;  %v5642_v38 = vld [vmem:[#allocation2 + $0x1b0] ss:$36 sps:$4 sm:$0xff]   ;;  %v5643_v11 = vld [vmem:[#allocation2 + $0x1fc] ss:$36 sps:$4 sm:$0xff]   ;;  %v3177_v61 = vpack.c.bf16 %v7062_v21, %v7046_v63  ;;  %v7943_v21 = vld [vmem:[#allocation29_spill] sm:$0xff] }
 0xa6b   :  { %v7138_v22 = vpop.f32.mrf.mxu0  ;;  %v5644_v58 = vld [vmem:[#allocation2 + $0x1b8] ss:$36 sps:$4 sm:$0xff]   ;;  %v3160_v50 = vpack.c.bf16 %v7943_v21, %v6988_v32  ;;  %v7945_v48 = vld [vmem:[#allocation12_spill] sm:$0xff]  ;;  %v5682_v21 = vld [vmem:[#allocation2 + $0xb0] ss:$36 sps:$4 sm:$0xff]  }
 0xa6c   :  { %3292 = vmatmul.mubr.bf16.gmra.mxu1 %v5634_v14  ;;  %4971 = vmatprep.subr.bf16.mxu1 %v3223_v51  ;;  %v5637_v51 = vld [vmem:[#allocation2 + $0x174] ss:$36 sps:$4 sm:$0xff]   ;;  %v5649_v29 = vld [vmem:[#allocation2 + $0x1c] ss:$36 sps:$4 sm:$0xff]  }
 0xa6d   :  { %5035 = vmatprep.subr.bf16.mxu0 %v3225_v52  ;;  %v7140_v60 = vpop.f32.mrf.mxu0  ;;  %4972 = vmatpush3.bf16.msra.mxu1 %v3222_v1  ;;  %v3196_v1 = vpack.c.bf16 %v7118_v47, %v7110_v8  ;;  %v3187_v47 = vpack.c.bf16 %v7096_v23, %v7082_v36  ;;  %v3178_v36 = vpack.c.bf16 %v7070_v33, %v7054_v45  ;;  %v7951_v20 = vld [vmem:[#allocation23_spill] sm:$0xff] }
 0xa6e   :  { %5036 = vmatpush3.bf16.msra.mxu0 %v3224_v31  ;;  %4973 = vmatprep.subr.bf16.mxu1 %v3214_v39  ;;  %v3206_v31 = vpack.c.bf16 %v7132_v59, %v7124_v10  ;;  %v3189_v10 = vpack.c.bf16 %v7098_v0, %v7084_v56  ;;  %v3188_v23 = vpack.c.bf16 %v7094_v35, %v7076_v28 }
 0xa6f   :  { %3389 = vmatmul.mubr.bf16.gmra.mxu0 %v5635_v30  ;;  %5037 = vmatprep.subr.bf16.mxu0 %v3216_v26  ;;  %v7142_v19 = vpop.f32.mrf.mxu0  ;;  %v3180_v56 = vpack.c.bf16 %v7072_v24, %v7056_v7  ;;  %v3169_v33 = vpack.c.bf16 %v7036_v34, %v7016_v5  ;;  %v3179_v28 = vpack.c.bf16 %v7064_v44, %v7048_v53  ;;  %v5645_v7 = vld [vmem:[#allocation2 + $0x204] ss:$36 sps:$4 sm:$0xff]   ;;  %v5647_v44 = vld [vmem:[#allocation2 + $0x14] ss:$36 sps:$4 sm:$0xff]  }
 0xa70   :  { %3299 = vmatprep.mubr.bf16.mxu1 %v5636_v55  ;;  %3396 = vmatprep.mubr.bf16.mxu0 %v5637_v51  ;;  %v7942_v35 = vpack.c.bf16 %v7038_v12, %v7018_v54  ;;  %v7944_v34 = vld [vmem:[#allocation21_spill] sm:$0xff]  ;;  %v5648_v54 = vld [vmem:[#allocation2 + $0x200] ss:$36 sps:$4 sm:$0xff]   ;;  %v7950_v12 = vld [vmem:[#allocation19_spill] sm:$0xff] }
 0xa71   :  { %v7148_v52 = vpop.f32.mrf.mxu0  ;;  %4974 = vmatpush3.bf16.msra.mxu1 %v3213_v4  ;;  %v7946_v53 = vpack.c.bf16 %v7944_v34, %v7945_v48  ;;  %v7952_v49 = vpack.c.bf16 %v7950_v12, %v7951_v20  ;;  %v7953_v26 = vld [vmem:[#allocation27_spill] sm:$0xff]  ;;  %v7954_v4 = vld [vmem:[#allocation16_spill] sm:$0xff]  ;;  %v5686_v34 = vld [vmem:[#allocation2 + $0x1d0] ss:$36 sps:$4 sm:$0xff]  }
 0xa72   :  { %5038 = vmatpush3.bf16.msra.mxu0 %v3215_v25  ;;  %4975 = vmatprep.subr.bf16.mxu1 %v3205_v18  ;;  %v7955_v30 = vpack.c.bf16 %v7953_v26, %v7954_v4  ;;  %v7956_v18 = vld [vmem:[#allocation30_spill] sm:$0xff]  ;;  %v7957_v25 = vld [vmem:[#allocation17_spill] sm:$0xff]  ;;  %v5687_v48 = vld [vmem:[#allocation2 + $0x218] ss:$36 sps:$4 sm:$0xff]  }
 0xa73   :  { %5039 = vmatprep.subr.bf16.mxu0 %v3207_v37  ;;  %v7152_v39 = vpop.f32.mrf.mxu0  ;;  %v7958_v55 = vpack.c.bf16 %v7956_v18, %v7957_v25  ;;  %v5650_v37 = vld [vmem:[#allocation2 + $0x10] ss:$36 sps:$4 sm:$0xff]  }
 0xa74   :  { %3300 = vmatmul.mubr.bf16.gmra.mxu1 %v5638_v17  ;;  %v5653_v17 = vld [vmem:[#allocation2 + $0x64] ss:$36 sps:$4 sm:$0xff]  }
 0xa75   :  { %v7160_v15 = vpop.f32.mrf.mxu0  ;;  %4976 = vmatpush3.bf16.msra.mxu1 %v3204_v42  ;;  %3307 = vmatprep.mubr.bf16.mxu1 %v5639_v16  ;;  %v5651_v42 = vld [vmem:[#allocation2 + $0x5c] ss:$36 sps:$4 sm:$0xff]  }
 0xa76   :  { %5040 = vmatpush3.bf16.msra.mxu0 %v3206_v31  ;;  %4977 = vmatprep.subr.bf16.mxu1 %v3196_v1  ;;  %v5652_v1 = vld [vmem:[#allocation2 + $0x18] ss:$36 sps:$4 sm:$0xff]  }
 0xa77   :  { %3397 = vmatmul.mubr.bf16.gmra.mxu0 %v5640_v6  ;;  %5041 = vmatprep.subr.bf16.mxu0 %v3198_v62  ;;  %v7164_v8 = vpop.f32.mrf.mxu0  ;;  %v5654_v16 = vld [vmem:[#allocation2 + $0x58] ss:$36 sps:$4 sm:$0xff]   ;;  %v5656_v6 = vld [vmem:[#allocation2 + $0x60] ss:$36 sps:$4 sm:$0xff]  }
 0xa78   :  { %3404 = vmatprep.mubr.bf16.mxu0 %v5641_v9 }
 0xa79   :  { %v7172_v59 = vpop.f32.mrf.mxu0  ;;  %4978 = vmatpush3.bf16.msra.mxu1 %v3195_v46  ;;  %v5655_v46 = vld [vmem:[#allocation2 + $0xa4] ss:$36 sps:$4 sm:$0xff]  }
 0xa7a   :  { %5042 = vmatpush3.bf16.msra.mxu0 %v3197_v40  ;;  %4979 = vmatprep.subr.bf16.mxu1 %v3187_v47  ;;  %v3190_v47 = vpack.c.bf16 %v7164_v8, %v7152_v39  ;;  %v5657_v40 = vld [vmem:[#allocation2 + $0xac] ss:$36 sps:$4 sm:$0xff]   ;;  %v3181_v9 = vpack.c.bf16 %v7172_v59, %v7160_v15  ;;  %v3163_v39 = vpack.c.bf16 %v7148_v52, %v7140_v60  ;;  %v5663_v15 = vld [vmem:[#allocation2 + $0x134] ss:$36 sps:$4 sm:$0xff]   ;;  %v5671_v52 = vld [vmem:[#allocation2 + $0x1c4] ss:$36 sps:$4 sm:$0xff]  }
 0xa7b   :  { %5043 = vmatprep.subr.bf16.mxu0 %v3189_v10  ;;  %v5299_v57 = vpop.f32.mrf.mxu0  ;;  %v5658_v10 = vld [vmem:[#allocation2 + $0xa0] ss:$36 sps:$4 sm:$0xff]   ;;  %v5662_v8 = vld [vmem:[#allocation2 + $0xe8] ss:$36 sps:$4 sm:$0xff]   ;;  %v5664_v59 = vld [vmem:[#allocation2 + $0xf0] ss:$36 sps:$4 sm:$0xff]  }
 0xa7c   :  { %3308 = vmatmul.mubr.bf16.gmra.mxu1 %v5642_v38  ;;  %v5665_v38 = vld [vmem:[#allocation2 + $0x13c] ss:$36 sps:$4 sm:$0xff]  }
 0xa7d   :  { %v3124_v0 = vpop.f32.mrf.mxu0  ;;  %4980 = vmatpush3.bf16.msra.mxu1 %v3186_v41  ;;  %3315 = vmatprep.mubr.bf16.mxu1 %v5643_v11  ;;  %v5659_v41 = vld [vmem:[#allocation2 + $0xec] ss:$36 sps:$4 sm:$0xff]   ;;  %v5670_v60 = vld [vmem:[#allocation2 + $0x178] ss:$36 sps:$4 sm:$0xff]   ;;  %v5672_v11 = vld [vmem:[#allocation2 + $0x180] ss:$36 sps:$4 sm:$0xff]  }
 0xa7e   :  { %5044 = vmatpush3.bf16.msra.mxu0 %v3188_v23  ;;  %4981 = vmatprep.subr.bf16.mxu1 %v3178_v36  ;;  %v3172_v36 = vpack.c.bf16 %v7142_v19, %v7138_v22  ;;  %v5661_v23 = vld [vmem:[#allocation2 + $0xf4] ss:$36 sps:$4 sm:$0xff]   ;;  %v5667_v22 = vld [vmem:[#allocation2 + $0x17c] ss:$36 sps:$4 sm:$0xff]  }
 0xa7f   :  { %3405 = vmatmul.mubr.bf16.gmra.mxu0 %v5644_v58  ;;  %5045 = vmatprep.subr.bf16.mxu0 %v3180_v56  ;;  %v5300_v45 = vpop.f32.mrf.mxu0  ;;  %v5666_v56 = vld [vmem:[#allocation2 + $0x130] ss:$36 sps:$4 sm:$0xff]   ;;  %v5668_v19 = vld [vmem:[#allocation2 + $0x138] ss:$36 sps:$4 sm:$0xff]   ;;  %v5674_v58 = vld [vmem:[#allocation2 + $0x1c0] ss:$36 sps:$4 sm:$0xff]  }
 0xa80   :  { %3412 = vmatprep.mubr.bf16.mxu0 %v5645_v7  ;;  %v3208_v31 = vpack.c.bf16 %v5300_v45, %v5299_v57  ;;  %v5660_v57 = vld [vmem:[#allocation2 + $0xa8] ss:$36 sps:$4 sm:$0xff]  }
 0xa81   :  { %v3127_v24 = vpop.f32.mrf.mxu0  ;;  %4982 = vmatpush3.bf16.msra.mxu1 %v3177_v61  ;;  %v5673_v61 = vld [vmem:[#allocation2 + $0x1cc] ss:$36 sps:$4 sm:$0xff]  }
 0xa82   :  { %5046 = vmatpush3.bf16.msra.mxu0 %v3179_v28  ;;  %4983 = vmatprep.subr.bf16.mxu1 %v3169_v33  ;;  %v3199_v62 = vpack.c.bf16 %v3127_v24, %v3124_v0  ;;  %v5669_v0 = vld [vmem:[#allocation2 + $0x184] ss:$36 sps:$4 sm:$0xff]   ;;  %v5675_v45 = vld [vmem:[#allocation2 + $0x20c] ss:$36 sps:$4 sm:$0xff]   ;;  %v5677_v28 = vld [vmem:[#allocation2 + $0x214] ss:$36 sps:$4 sm:$0xff]  }
 0xa83   :  { %5047 = vmatprep.subr.bf16.mxu0 %v7942_v35  ;;  %v5303_v63 = vpop.f32.mrf.mxu0  ;;  %v5676_v33 = vld [vmem:[#allocation2 + $0x1c8] ss:$36 sps:$4 sm:$0xff]   ;;  %v5679_v24 = vld [vmem:[#allocation2 + $0x20] ss:$36 sps:$4 sm:$0xff]   ;;  %v5680_v35 = vld [vmem:[#allocation2 + $0x210] ss:$36 sps:$4 sm:$0xff]  }
 0xa84   :  { %3316 = vmatmul.mubr.bf16.gmra.mxu1 %v5646_v3  ;;  %v5678_v7 = vld [vmem:[#allocation2 + $0x208] ss:$36 sps:$4 sm:$0xff]   ;;  %v5684_v3 = vld [vmem:[#allocation2 + $0x140] ss:$36 sps:$4 sm:$0xff]  }
 0xa85   :  { %v3140_v5 = vpop.f32.mrf.mxu0  ;;  %4984 = vmatpush3.bf16.msra.mxu1 %v7946_v53  ;;  %3453 = vmatprep.mubr.bf16.mxu1 %v5647_v44  ;;  %v5539_v53 = vld [vmem:[%s7744_s6 + $0x70] sm:$0xff]  }
 0xa86   :  { %5048 = vmatpush3.bf16.msra.mxu0 %v7949_v13  ;;  %4985 = vmatprep.subr.bf16.mxu1 %v3160_v50  ;;  %v5683_v50 = vld [vmem:[#allocation2 + $0xf8] ss:$36 sps:$4 sm:$0xff]  }
 0xa87   :  { %3413 = vmatmul.mubr.bf16.gmra.mxu0 %v5648_v54  ;;  %5049 = vmatprep.subr.bf16.mxu0 %v7952_v49  ;;  %v5304_v32 = vpop.f32.mrf.mxu0 }
 0xa88   :  { %v3226_v27 = vpack.c.bf16 %v5304_v32, %v5303_v63  ;;  %3550 = vmatprep.mubr.bf16.mxu0 %v5649_v29  ;;  %v5681_v63 = vld [vmem:[#allocation2 + $0x68] ss:$36 sps:$4 sm:$0xff]  }
 0xa89   :  { %v3143_v14 = vpop.f32.mrf.mxu0  ;;  %4986 = vmatpush3.bf16.msra.mxu1 %v7955_v30 }
 0xa8a   :  { %5050 = vmatpush3.bf16.msra.mxu0 %v7958_v55  ;;  %5305 = vmatprep.subr.bf16.mxu1 %v3226_v27  ;;  %v3217_v51 = vpack.c.bf16 %v3143_v14, %v3140_v5  ;;  %v5685_v5 = vld [vmem:[#allocation2 + $0x188] ss:$36 sps:$4 sm:$0xff]  }
 0xa8b   :  { %5337 = vmatprep.subr.bf16.mxu0 %v5539_v53 }
 0xa8c   :  { %3454 = vmatmul.mubr.bf16.vlgmr.msra.gmra.mxu1 %v5650_v37 }
 0xa8d   :  { %5306 = vmatpush3.bf16.msra.mxu1 %v3226_v27  ;;  %3461 = vmatprep.mubr.bf16.mxu1 %v5651_v42 }
 0xa8e   :  { %5307 = vmatprep.subr.bf16.mxu1 %v3217_v51 }
 0xa8f   :  { %3551 = vmatmul.mubr.bf16.vlgmr.msra.gmra.mxu0 %v5652_v1 }
 0xa90   :  { %3558 = vmatprep.mubr.bf16.mxu0 %v5653_v17  ;;  %5338 = vmatpush3.bf16.msra.mxu0 %v5539_v53  ;;  %v5540_v17 = vld [vmem:[%s7744_s6 + $0x68] sm:$0xff]  }
 0xa91   :  { %5308 = vmatpush3.bf16.msra.mxu1 %v3217_v51  ;;  %5339 = vmatprep.subr.bf16.mxu0 %v5540_v17 }
 0xa92   :  { %5309 = vmatprep.subr.bf16.mxu1 %v3208_v31 }
 0xa94   :  { %3462 = vmatmul.mubr.bf16.gmra.mxu1 %v5654_v16  ;;  %5340 = vmatpush3.bf16.msra.mxu0 %v5540_v17 }
 0xa95   :  { %5310 = vmatpush3.bf16.msra.mxu1 %v3208_v31  ;;  %3469 = vmatprep.mubr.bf16.mxu1 %v5655_v46 }
 0xa96   :  { %5311 = vmatprep.subr.bf16.mxu1 %v3199_v62 }
 0xa97   :  { %3559 = vmatmul.mubr.bf16.gmra.mxu0 %v5656_v6 }
 0xa98   :  { %3566 = vmatprep.mubr.bf16.mxu0 %v5657_v40 }
 0xa99   :  { %5312 = vmatpush3.bf16.msra.mxu1 %v3199_v62 }
 0xa9a   :  { %5313 = vmatprep.subr.bf16.mxu1 %v3190_v47 }
 0xa9c   :  { %3470 = vmatmul.mubr.bf16.gmra.mxu1 %v5658_v10 }
 0xa9d   :  { %5314 = vmatpush3.bf16.msra.mxu1 %v3190_v47  ;;  %3477 = vmatprep.mubr.bf16.mxu1 %v5659_v41 }
 0xa9e   :  { %5315 = vmatprep.subr.bf16.mxu1 %v3181_v9 }
 0xa9f   :  { %3567 = vmatmul.mubr.bf16.gmra.mxu0 %v5660_v57 }
 0xaa0   :  { %3574 = vmatprep.mubr.bf16.mxu0 %v5661_v23 }
 0xaa1   :  { %5316 = vmatpush3.bf16.msra.mxu1 %v3181_v9 }
 0xaa2   :  { %5317 = vmatprep.subr.bf16.mxu1 %v3172_v36 }
 0xaa4   :  { %3478 = vmatmul.mubr.bf16.gmra.mxu1 %v5662_v8 }
 0xaa5   :  { %5318 = vmatpush3.bf16.msra.mxu1 %v3172_v36  ;;  %3485 = vmatprep.mubr.bf16.mxu1 %v5663_v15 }
 0xaa6   :  { %5319 = vmatprep.subr.bf16.mxu1 %v3163_v39 }
 0xaa7   :  { %3575 = vmatmul.mubr.bf16.gmra.mxu0 %v5664_v59 }
 0xaa8   :  { %3582 = vmatprep.mubr.bf16.mxu0 %v5665_v38 }
 0xaa9   :  { %5320 = vmatpush3.bf16.msra.mxu1 %v3163_v39 }
 0xaac   :  { %3486 = vmatmul.mubr.bf16.gmra.mxu1 %v5666_v56 }
 0xaad   :  { %3493 = vmatprep.mubr.bf16.mxu1 %v5667_v22 }
 0xaaf   :  { %3583 = vmatmul.mubr.bf16.gmra.mxu0 %v5668_v19 }
 0xab0   :  { %3590 = vmatprep.mubr.bf16.mxu0 %v5669_v0 }
 0xab4   :  { %3494 = vmatmul.mubr.bf16.gmra.mxu1 %v5670_v60 }
 0xab5   :  { %3501 = vmatprep.mubr.bf16.mxu1 %v5671_v52 }
 0xab7   :  { %3591 = vmatmul.mubr.bf16.gmra.mxu0 %v5672_v11 }
 0xab8   :  { %3598 = vmatprep.mubr.bf16.mxu0 %v5673_v61 }
 0xabc   :  { %3502 = vmatmul.mubr.bf16.gmra.mxu1 %v5674_v58 }
 0xabd   :  { %3509 = vmatprep.mubr.bf16.mxu1 %v5675_v45 }
 0xabf   :  { %3599 = vmatmul.mubr.bf16.gmra.mxu0 %v5676_v33 }
 0xac0   :  { %3606 = vmatprep.mubr.bf16.mxu0 %v5677_v28 }
 0xac4   :  { %3510 = vmatmul.mubr.bf16.gmra.mxu1 %v5678_v7 }
 0xac5   :  { %5321 = vmatprep.mubr.bf16.mxu1 %v5679_v24 }
 0xac7   :  { %3607 = vmatmul.mubr.bf16.gmra.mxu0 %v5680_v35 }
 0xacc   :  { %5322 = vmatmul.mubr.bf16.vlgmr.msra.gmra.mxu1 %v5681_v63 }
 0xacd   :  { %5325 = vmatprep.mubr.bf16.mxu1 %v5682_v21 }
 0xad4   :  { %5326 = vmatmul.mubr.bf16.gmra.mxu1 %v5683_v50 }
 0xad5   :  { %5329 = vmatprep.mubr.bf16.mxu1 %v5684_v3 }
 0xadc   :  { %5330 = vmatmul.mubr.bf16.gmra.mxu1 %v5685_v5 }
 0xadd   :  { %5333 = vmatprep.mubr.bf16.mxu1 %v5686_v34 }
 0xae4   :  { %5334 = vmatmul.mubr.bf16.gmra.mxu1 %v5687_v48 }
 0xb0c   :  { %v4859_v44 = vpop.f32.mrf.mxu1  ;;  %v4923_v43 = vpop.f32.mrf.mxu0 }
 0xb0e   :  { %v4860_v2 = vpop.f32.mrf.mxu1  ;;  %v4924_v13 = vpop.f32.mrf.mxu0 }
 0xb0f   :  { %v4861_v54 = vadd.f32 %v4860_v2, %v4859_v44  ;;  %v4925_v12 = vadd.f32 %v4924_v13, %v4923_v43 }
 0xb10   :  { %v4862_v20 = vpop.f32.mrf.mxu1  ;;  %v4926_v49 = vpop.f32.mrf.mxu0 }
 0xb11   :  { %v7219_v32 = vadd.f32 %v4925_v12, %v4861_v54 }
 0xb12   :  { %v4863_v27 = vpop.f32.mrf.mxu1  ;;  %v4927_v29 = vpop.f32.mrf.mxu0 }
 0xb13   :  { %v4864_v14 = vadd.f32 %v4863_v27, %v4862_v20  ;;  %v4928_v26 = vadd.f32 %v4927_v29, %v4926_v49 }
 0xb14   :  { %v4865_v4 = vpop.f32.mrf.mxu1  ;;  %v4929_v30 = vpop.f32.mrf.mxu0 }
 0xb15   :  { %v7221_v18 = vadd.f32 %v4928_v26, %v4864_v14 }
 0xb16   :  { %v4866_v25 = vpop.f32.mrf.mxu1  ;;  %v4930_v55 = vpop.f32.mrf.mxu0 }
 0xb17   :  { %v4867_v51 = vadd.f32 %v4866_v25, %v4865_v4  ;;  %v4931_v37 = vadd.f32 %v4930_v55, %v4929_v30 }
 0xb18   :  { %v4868_v42 = vpop.f32.mrf.mxu1  ;;  %v4932_v1 = vpop.f32.mrf.mxu0 }
 0xb19   :  { %v7223_v31 = vadd.f32 %v4931_v37, %v4867_v51 }
 0xb1a   :  { %v4869_v62 = vpop.f32.mrf.mxu1  ;;  %v4933_v16 = vpop.f32.mrf.mxu0 }
 0xb1b   :  { %v4870_v46 = vadd.f32 %v4869_v62, %v4868_v42  ;;  %v4934_v6 = vadd.f32 %v4933_v16, %v4932_v1 }
 0xb1c   :  { %v4871_v47 = vpop.f32.mrf.mxu1  ;;  %v4935_v40 = vpop.f32.mrf.mxu0 }
 0xb1d   :  { %v7228_v9 = vadd.f32 %v4934_v6, %v4870_v46 }
 0xb1e   :  { %v4872_v10 = vpop.f32.mrf.mxu1  ;;  %v4936_v41 = vpop.f32.mrf.mxu0 }
 0xb1f   :  { %v4873_v57 = vadd.f32 %v4872_v10, %v4871_v47  ;;  %v4937_v36 = vadd.f32 %v4936_v41, %v4935_v40 }
 0xb20   :  { %v4874_v23 = vpop.f32.mrf.mxu1  ;;  %v4938_v39 = vpop.f32.mrf.mxu0 }
 0xb21   :  { %v7230_v8 = vadd.f32 %v4937_v36, %v4873_v57 }
 0xb22   :  { %v4875_v15 = vpop.f32.mrf.mxu1  ;;  %v4939_v59 = vpop.f32.mrf.mxu0 }
 0xb23   :  { %v4876_v38 = vadd.f32 %v4875_v15, %v4874_v23  ;;  %v4940_v56 = vadd.f32 %v4939_v59, %v4938_v39 }
 0xb24   :  { %v4877_v22 = vpop.f32.mrf.mxu1  ;;  %v4941_v19 = vpop.f32.mrf.mxu0 }
 0xb25   :  { %v7232_v0 = vadd.f32 %v4940_v56, %v4876_v38 }
 0xb26   :  { %v4878_v60 = vpop.f32.mrf.mxu1  ;;  %v4942_v52 = vpop.f32.mrf.mxu0 }
 0xb27   :  { %v4879_v11 = vadd.f32 %v4878_v60, %v4877_v22  ;;  %v4943_v61 = vadd.f32 %v4942_v52, %v4941_v19 }
 0xb28   :  { %v4880_v58 = vpop.f32.mrf.mxu1  ;;  %v4944_v45 = vpop.f32.mrf.mxu0 }
 0xb29   :  { %v7234_v33 = vadd.f32 %v4943_v61, %v4879_v11 }
 0xb2a   :  { %v4881_v28 = vpop.f32.mrf.mxu1  ;;  %v4945_v7 = vpop.f32.mrf.mxu0 }
 0xb2b   :  { %v4882_v24 = vadd.f32 %v4881_v28, %v4880_v58  ;;  %v4946_v35 = vadd.f32 %v4945_v7, %v4944_v45 }
 0xb2c   :  { %v4883_v63 = vpop.f32.mrf.mxu1 }
 0xb2d   :  { %v7236_v21 = vadd.f32 %v4946_v35, %v4882_v24 }
 0xb2e   :  { %v4884_v50 = vpop.f32.mrf.mxu1 }
 0xb2f   :  { %v4885_v3 = vadd.f32 %v4884_v50, %v4883_v63  ;;  %v4947_v5 = vpop.f32.mrf.mxu0 }
 0xb30   :  { %v4886_v34 = vpop.f32.mrf.mxu1 }
 0xb31   :  { %v4948_v48 = vpop.f32.mrf.mxu0 }
 0xb32   :  { %v4949_v53 = vadd.f32 %v4948_v48, %v4947_v5  ;;  %v4887_v44 = vpop.f32.mrf.mxu1 }
 0xb33   :  { %v4888_v43 = vadd.f32 %v4887_v44, %v4886_v34  ;;  %v4950_v2 = vpop.f32.mrf.mxu0 }
 0xb34   :  { %v7238_v13 = vadd.f32 %v4949_v53, %v4885_v3  ;;  %v4889_v54 = vpop.f32.mrf.mxu1 }
 0xb35   :  { %v4951_v12 = vpop.f32.mrf.mxu0 }
 0xb36   :  { %v4952_v20 = vadd.f32 %v4951_v12, %v4950_v2  ;;  %v4890_v49 = vpop.f32.mrf.mxu1 }
 0xb37   :  { %v4891_v27 = vadd.f32 %v4890_v49, %v4889_v54  ;;  %v4953_v29 = vpop.f32.mrf.mxu0 }
 0xb38   :  { %v7240_v14 = vadd.f32 %v4952_v20, %v4888_v43  ;;  %v4892_v26 = vpop.f32.mrf.mxu1 }
 0xb39   :  { %v4954_v4 = vpop.f32.mrf.mxu0 }
 0xb3a   :  { %7959 = vst [vmem:[#allocation28_spill] sm:$0xff] %v7240_v14  ;;  %v4955_v30 = vadd.f32 %v4954_v4, %v4953_v29  ;;  %v4893_v25 = vpop.f32.mrf.mxu1 }
 0xb3b   :  { %v4894_v55 = vadd.f32 %v4893_v25, %v4892_v26  ;;  %v4956_v51 = vpop.f32.mrf.mxu0 }
 0xb3c   :  { %v7242_v37 = vadd.f32 %v4955_v30, %v4891_v27  ;;  %v4895_v42 = vpop.f32.mrf.mxu1 }
 0xb3d   :  { %v4957_v1 = vpop.f32.mrf.mxu0 }
 0xb3e   :  { %v4958_v17 = vadd.f32 %v4957_v1, %v4956_v51  ;;  %v4896_v62 = vpop.f32.mrf.mxu1 }
 0xb3f   :  { %v4897_v16 = vadd.f32 %v4896_v62, %v4895_v42  ;;  %v4959_v46 = vpop.f32.mrf.mxu0 }
 0xb40   :  { %v7244_v6 = vadd.f32 %v4958_v17, %v4894_v55  ;;  %v4898_v47 = vpop.f32.mrf.mxu1 }
 0xb41   :  { %v4960_v40 = vpop.f32.mrf.mxu0 }
 0xb42   :  { %7960 = vst [vmem:[#allocation24_spill] sm:$0xff] %v7244_v6  ;;  %v4961_v10 = vadd.f32 %v4960_v40, %v4959_v46  ;;  %v4899_v41 = vpop.f32.mrf.mxu1 }
 0xb43   :  { %v4900_v57 = vadd.f32 %v4899_v41, %v4898_v47  ;;  %v4962_v36 = vpop.f32.mrf.mxu0 }
 0xb44   :  { %v7246_v23 = vadd.f32 %v4961_v10, %v4897_v16  ;;  %v4901_v39 = vpop.f32.mrf.mxu1 }
 0xb45   :  { %v4963_v15 = vpop.f32.mrf.mxu0 }
 0xb46   :  { %7961 = vst [vmem:[#allocation31_spill] sm:$0xff] %v7246_v23  ;;  %v4964_v59 = vadd.f32 %v4963_v15, %v4962_v36  ;;  %v4902_v38 = vpop.f32.mrf.mxu1 }
 0xb47   :  { %v4903_v56 = vadd.f32 %v4902_v38, %v4901_v39  ;;  %v4965_v22 = vpop.f32.mrf.mxu0 }
 0xb48   :  { %v7248_v19 = vadd.f32 %v4964_v59, %v4900_v57  ;;  %v4904_v60 = vpop.f32.mrf.mxu1 }
 0xb49   :  { %v4966_v52 = vpop.f32.mrf.mxu0 }
 0xb4a   :  { %7962 = vst [vmem:[#allocation36_spill] sm:$0xff] %v7248_v19  ;;  %v4967_v11 = vadd.f32 %v4966_v52, %v4965_v22  ;;  %v4905_v61 = vpop.f32.mrf.mxu1 }
 0xb4b   :  { %v7250_v58 = vadd.f32 %v4905_v61, %v4904_v60  ;;  %v7252_v45 = vpop.f32.mrf.mxu0 }
 0xb4c   :  { %7964 = vst [vmem:[#allocation35_spill] sm:$0xff] %v7252_v45  ;;  %v7254_v28 = vadd.f32 %v4967_v11, %v4903_v56  ;;  %v4987_v7 = vpop.f32.mrf.mxu1 }
 0xb4d   :  { %7963 = vst [vmem:[#allocation33_spill] sm:$0xff] %v7250_v58  ;;  %v7256_v24 = vpop.f32.mrf.mxu0 }
 0xb4e   :  { %7965 = vst [vmem:[#allocation34_spill] sm:$0xff] %v7254_v28  ;;  %7966 = vst [vmem:[#allocation22_spill] sm:$0xff] %v7256_v24  ;;  %v4988_v35 = vpop.f32.mrf.mxu1 }
 0xb4f   :  { %v4989_v63 = vadd.f32 %v4988_v35, %v4987_v7  ;;  %v5051_v50 = vpop.f32.mrf.mxu0 }
 0xb50   :  { %v4990_v3 = vpop.f32.mrf.mxu1 }
 0xb51   :  { %v7259_v5 = vadd.f32 %v4989_v63, %v7219_v32  ;;  %v5052_v34 = vpop.f32.mrf.mxu0 }
 0xb52   :  { %v4991_v48 = vpop.f32.mrf.mxu1 }
 0xb53   :  { %v7261_v53 = vpop.f32.mrf.mxu0 }
 0xb54   :  { %v4993_v44 = vpop.f32.mrf.mxu1 }
 0xb55   :  { %v7263_v43 = vpop.f32.mrf.mxu0 }
 0xb56   :  { %v4994_v2 = vpop.f32.mrf.mxu1 }
 0xb57   :  { %v5057_v54 = vpop.f32.mrf.mxu0 }
 0xb58   :  { %v4996_v12 = vpop.f32.mrf.mxu1 }
 0xb59   :  { %v5058_v20 = vpop.f32.mrf.mxu0 }
 0xb5a   :  { %v4997_v49 = vpop.f32.mrf.mxu1 }
 0xb5b   :  { %v5060_v27 = vpop.f32.mrf.mxu0  ;;  %v4998_v45 = vadd.f32 %v4997_v49, %v4996_v12 }
 0xb5c   :  { %v4999_v29 = vpop.f32.mrf.mxu1 }
 0xb5d   :  { %v5061_v26 = vpop.f32.mrf.mxu0 }
 0xb5e   :  { %v5000_v4 = vpop.f32.mrf.mxu1 }
 0xb5f   :  { %v7265_v30 = vpop.f32.mrf.mxu0  ;;  %v5001_v12 = vadd.f32 %v5000_v4, %v4999_v29 }
 0xb60   :  { %v7267_v32 = vpop.f32.mrf.mxu1 }
 0xb61   :  { %v7269_v25 = vpop.f32.mrf.mxu0  ;;  %v3472_v29 = vadd.f32 %v5001_v12, %v7230_v8 }
 0xb62   :  { %v7271_v55 = vpop.f32.mrf.mxu1 }
 0xb63   :  { %v7273_v51 = vpop.f32.mrf.mxu0 }
 0xb64   :  { %v5005_v42 = vpop.f32.mrf.mxu1 }
 0xb65   :  { %v7275_v1 = vpop.f32.mrf.mxu0 }
 0xb66   :  { %v5006_v17 = vpop.f32.mrf.mxu1 }
 0xb67   :  { %v5069_v62 = vpop.f32.mrf.mxu0 }
 0xb68   :  { %v5008_v16 = vpop.f32.mrf.mxu1 }
 0xb69   :  { %v5070_v46 = vpop.f32.mrf.mxu0 }
 0xb6a   :  { %v5009_v47 = vpop.f32.mrf.mxu1  ;;  %v5071_v49 = vadd.f32 %v5070_v46, %v5069_v62 }
 0xb6b   :  { %v7277_v40 = vpop.f32.mrf.mxu0 }
 0xb6c   :  { %v7279_v10 = vpop.f32.mrf.mxu1 }
 0xb6d   :  { %v5073_v41 = vpop.f32.mrf.mxu0 }
 0xb6e   :  { %v7281_v57 = vpop.f32.mrf.mxu1  ;;  %v5074_v4 = vadd.f32 %v5073_v41, %v7277_v40 }
 0xb6f   :  { %v7283_v36 = vpop.f32.mrf.mxu0 }
 0xb70   :  { %v7285_v39 = vpop.f32.mrf.mxu1 }
 0xb71   :  { %7967 = vst [vmem:[#allocation13_spill] sm:$0xff] %v7285_v39  ;;  %v7287_v15 = vpop.f32.mrf.mxu0  ;;  %v4992_v39 = vadd.f32 %v4991_v48, %v4990_v3  ;;  %v5056_v3 = vadd.f32 %v7263_v43, %v7261_v53  ;;  %v5004_v53 = vadd.f32 %v7271_v55, %v7267_v32  ;;  %v5068_v55 = vadd.f32 %v7275_v1, %v7273_v51 }
 0xb72   :  { %v7289_v59 = vpop.f32.mrf.mxu1 }
 0xb73   :  { %7968 = vst [vmem:[#allocation11_spill] sm:$0xff] %v7289_v59  ;;  %v7291_v38 = vpop.f32.mrf.mxu0  ;;  %v3475_v32 = vadd.f32 %v5004_v53, %v7232_v0 }
 0xb74   :  { %7969 = vst [vmem:[#allocation14_spill] sm:$0xff] %v7291_v38  ;;  %v5017_v56 = vpop.f32.mrf.mxu1 }
 0xb75   :  { %v7293_v22 = vpop.f32.mrf.mxu0 }
 0xb76   :  { %7970 = vst [vmem:[#allocation18_spill] sm:$0xff] %v7293_v22  ;;  %v5018_v60 = vpop.f32.mrf.mxu1  ;;  %v4995_v22 = vadd.f32 %v4994_v2, %v4993_v44  ;;  %v3467_v44 = vadd.f32 %v4998_v45, %v7228_v9  ;;  %v5062_v2 = vadd.f32 %v5061_v26, %v5060_v27  ;;  %v5010_v45 = vadd.f32 %v5009_v47, %v5008_v16 }
 0xb77   :  { %v7295_v52 = vpop.f32.mrf.mxu0  ;;  %v5013_v47 = vadd.f32 %v7281_v57, %v7279_v10 }
 0xb78   :  { %v7297_v11 = vpop.f32.mrf.mxu1  ;;  %v3464_v24 = vadd.f32 %v4995_v22, %v7223_v31  ;;  %v5688_v31 = vld [vmem:[%s7746_s8] sm:$0xff]  ;;  %v7981_v12 = vld [vmem:[#allocation13_spill] sm:$0xff] }
 0xb79   :  { %v7299_v61 = vpop.f32.mrf.mxu0 }
 0xb7a   :  { %v7301_v7 = vpop.f32.mrf.mxu1  ;;  %v5083_v22 = vadd.f32 %v7299_v61, %v7295_v52 }
 0xb7b   :  { %v7303_v35 = vpop.f32.mrf.mxu0  ;;  %v5022_v0 = vadd.f32 %v7301_v7, %v7297_v11  ;;  %v3572_v7 = vadd.f32 %v5068_v55, %v3475_v32 }
 0xb7c   :  { %7971 = vst [vmem:[#allocation15_spill] sm:$0xff] %v7303_v35  ;;  %v7305_v63 = vpop.f32.mrf.mxu1  ;;  %v5059_v35 = vadd.f32 %v5058_v20, %v5057_v54 }
 0xb7d   :  { %7972 = vst [vmem:[#allocation9_spill] sm:$0xff] %v7305_v63  ;;  %v7309_v23 = vpop.f32.mrf.mxu0 }
 0xb7e   :  { %v7307_v19 = vpop.f32.mrf.mxu1  ;;  %7974 = vst [vmem:[#allocation10_spill] sm:$0xff] %v7309_v23 }
 0xb7f   :  { %7973 = vst [vmem:[#allocation32_spill] sm:$0xff] %v7307_v19  ;;  %v7315_v38 = vpop.f32.mrf.mxu0  ;;  %v7980_v19 = vld [vmem:[#allocation8_spill] sm:$0xff] }
 0xb80   :  { %v7311_v58 = vpop.f32.mrf.mxu1  ;;  %7977 = vst [vmem:[#allocation21_spill] sm:$0xff] %v7315_v38  ;;  %v3714_v59 = vsub.s32 7, %v7980_v19  ;;  %v5007_v38 = vadd.f32 %v5006_v17, %v5005_v42  ;;  %v3564_v42 = vadd.f32 %v5062_v2, %v3467_v44  ;;  %v5019_v17 = vadd.f32 %v5018_v60, %v5017_v56 }
 0xb81   :  { %7975 = vst [vmem:[#allocation26_spill] sm:$0xff] %v7311_v58  ;;  %v7322_v63 = vpop.f32.mrf.mxu0  ;;  %v5053_v58 = vadd.f32 %v5052_v34, %v5051_v50  ;;  %v3459_v50 = vadd.f32 %v4992_v39, %v7221_v18  ;;  %v5065_v18 = vadd.f32 %v7269_v25, %v7265_v30  ;;  %v3488_v2 = vadd.f32 %v5013_v47, %v7238_v13 }
 0xb82   :  { %v7313_v28 = vpop.f32.mrf.mxu1  ;;  %v7335_v54 = vrot.slane %v5688_v31, %v3714_v59  ;;  %v3496_v56 = vadd.f32 %v5019_v17, %v7242_v37  ;;  %v5077_v31 = vadd.f32 %v7287_v15, %v7283_v36  ;;  %v7982_v37 = vld [vmem:[#allocation11_spill] sm:$0xff] }
 0xb83   :  { %7976 = vst [vmem:[#allocation29_spill] sm:$0xff] %v7313_v28  ;;  %v3553_v9 = vadd.f32 %v5053_v58, %v7259_v5  ;;  %v3556_v43 = vadd.f32 %v5056_v3, %v3459_v50  ;;  %v3569_v39 = vadd.f32 %v5065_v18, %v3472_v29  ;;  %v7983_v3 = vld [vmem:[#allocation35_spill] sm:$0xff] }
 0xb84   :  { %v7317_v14 = vpop.f32.mrf.mxu1 }
 0xb85   :  { %7978 = vst [vmem:[#allocation12_spill] sm:$0xff] %v7317_v14  ;;  %v7330_v14 = vpop.f32.mrf.mxu0 }
 0xb86   :  { %v7319_v6 = vpop.f32.mrf.mxu1 }
 0xb87   :  { %7979 = vst [vmem:[#allocation20_spill] sm:$0xff] %v7319_v6  ;;  %v3561_v6 = vadd.f32 %v5059_v35, %v3464_v24  ;;  %v3480_v24 = vadd.f32 %v5007_v38, %v7234_v33  ;;  %v7342_v27 = vpop.f32.mrf.mxu0  ;;  %v3483_v33 = vadd.f32 %v5010_v45, %v7236_v21  ;;  %v7985_v45 = vld [vmem:[#allocation24_spill] sm:$0xff] }
 0xb88   :  { %v7325_v23 = vpop.f32.mrf.mxu1 }
 0xb89   :  { %v5093_v16 = vpop.f32.mrf.mxu0  ;;  %v3577_v25 = vadd.f32 %v5071_v49, %v3480_v24  ;;  %v3580_v51 = vadd.f32 %v5074_v4, %v3483_v33  ;;  %v7986_v24 = vld [vmem:[#allocation15_spill] sm:$0xff]  ;;  %v7987_v49 = vld [vmem:[#allocation10_spill] sm:$0xff] }
 0xb8a   :  { %v7327_v28 = vpop.f32.mrf.mxu1  ;;  %v5086_v13 = vadd.f32 %v7987_v49, %v7986_v24  ;;  %v7991_v33 = vld [vmem:[#allocation14_spill] sm:$0xff]  ;;  %v5092_v24 = vadd.f32 %v7342_v27, %v7330_v14 }
 0xb8b   :  { %v5094_v1 = vpop.f32.mrf.mxu0  ;;  %v7992_v4 = vld [vmem:[#allocation18_spill] sm:$0xff] }
 0xb8c   :  { %v5323_v20 = vpop.f32.mrf.mxu1  ;;  %v5080_v17 = vadd.f32 %v7992_v4, %v7991_v33 }
 0xb8d   :  { %v3658_v34 = vadd.f32 %v5323_v20, %v3561_v6  ;;  %v5016_v20 = vadd.f32 %v7982_v37, %v7981_v12  ;;  %v5096_v29 = vpop.f32.mrf.mxu0  ;;  %v7999_v37 = vld [vmem:[#allocation26_spill] sm:$0xff] }
 0xb8e   :  { %v3649_v48 = vpop.f32.mrf.mxu1 }
 0xb8f   :  { %v3650_v26 = vadd.f32 %v3649_v48, %v3553_v9  ;;  %v3718_v58 = vadd.f32 %v7335_v54, %v3658_v34  ;;  %v7984_v34 = vld [vmem:[#allocation22_spill] sm:$0xff]  ;;  %v3499_v48 = vadd.f32 %v5022_v0, %v7985_v45  ;;  %v8001_v45 = vld [vmem:[#allocation36_spill] sm:$0xff] }
 0xb90   :  { %v5324_v6 = vpop.f32.mrf.mxu1  ;;  %v4970_v9 = vadd.f32 %v7984_v34, %v7983_v3 }
 0xb91   :  { %v3661_v5 = vadd.f32 %v5324_v6, %v3564_v42  ;;  %v3716_v8 = vadd.f32 %v7335_v54, %v3650_v26  ;;  %v3734_v40 = vmax.f32 %v3718_v58, 0.0  ;;  %v7988_v26 = vld [vmem:[#allocation12_spill] sm:$0xff]  ;;  %v3593_v58 = vadd.f32 %v5083_v22, %v3496_v56  ;;  %v5097_v22 = vpop.f32.mrf.mxu0 }
 0xb92   :  { %v3652_v62 = vpop.f32.mrf.mxu1  ;;  %v7989_v42 = vld [vmem:[#allocation20_spill] sm:$0xff]  ;;  %v3596_v56 = vadd.f32 %v5086_v13, %v3499_v48 }
 0xb93   :  { %v3719_v46 = vadd.f32 %v7335_v54, %v3661_v5  ;;  %v3653_v30 = vadd.f32 %v3652_v62, %v3556_v43  ;;  %v3732_v35 = vmax.f32 %v3716_v8, 0.0  ;;  %v5031_v36 = vadd.f32 %v7989_v42, %v7988_v26  ;;  %v7990_v5 = vld [vmem:[#allocation28_spill] sm:$0xff]  ;;  %v7993_v62 = vld [vmem:[#allocation9_spill] sm:$0xff] }
 0xb94   :  { %v5327_v21 = vpop.f32.mrf.mxu1  ;;  %v3491_v43 = vadd.f32 %v5016_v20, %v7990_v5  ;;  %v7994_v8 = vld [vmem:[#allocation32_spill] sm:$0xff]  ;;  %v8000_v20 = vld [vmem:[#allocation29_spill] sm:$0xff] }
 0xb95   :  { %v3735_v41 = vmax.f32 %v3719_v46, 0.0  ;;  %v3717_v59 = vadd.f32 %v7335_v54, %v3653_v30  ;;  %v3674_v38 = vadd.f32 %v5327_v21, %v3577_v25  ;;  %v5025_v46 = vadd.f32 %v7994_v8, %v7993_v62 }
 0xb96   :  { %v3665_v60 = vpop.f32.mrf.mxu1  ;;  %v3585_v25 = vadd.f32 %v5077_v31, %v3488_v2  ;;  %v7998_v31 = vld [vmem:[#allocation21_spill] sm:$0xff] }
 0xb97   :  { %v3753_v10 = vpack.c.bf16 %v3735_v41, %v3734_v40  ;;  %v3733_v57 = vmax.f32 %v3717_v59, 0.0  ;;  %v3666_v44 = vadd.f32 %v3665_v60, %v3569_v39  ;;  %v3722_v61 = vadd.f32 %v7335_v54, %v3674_v38  ;;  %v7995_v39 = vld [vmem:[#allocation34_spill] sm:$0xff] }
 0xb98   :  { %v5328_v50 = vpop.f32.mrf.mxu1  ;;  %v3512_v40 = vadd.f32 %v5031_v36, %v7995_v39  ;;  %v5095_v41 = vadd.f32 %v5094_v1, %v5093_v16  ;;  %v5034_v59 = vadd.f32 %v7327_v28, %v7325_v23  ;;  %v5089_v12 = vadd.f32 %v7322_v63, %v7998_v31 }
 0xb99   :  { %v3752_v52 = vpack.c.bf16 %v3733_v57, %v3732_v35  ;;  %v3677_v11 = vadd.f32 %v5328_v50, %v3580_v51  ;;  %v3720_v18 = vadd.f32 %v7335_v54, %v3666_v44  ;;  %v3738_v32 = vmax.f32 %v3722_v61, 0.0  ;;  %v7997_v44 = vld [vmem:[#allocation31_spill] sm:$0xff] }
 0xb9a   :  { %v3668_v15 = vpop.f32.mrf.mxu1  ;;  %v3504_v2 = vadd.f32 %v5025_v46, %v7997_v44  ;;  %v5028_v16 = vadd.f32 %v8000_v20, %v7999_v37  ;;  %v3609_v63 = vadd.f32 %v5095_v41, %v3512_v40  ;;  %v7417_v40 = vld [vmem:[%s7746_s8 + $0x8] sm:$0xff]  ;;  %v8002_v41 = vsub.s32 0, %v7980_v19  ;;  %s5740_s8 = smov 1  }
 0xb9b   :  { %v3723_v53 = vadd.f32 %v7335_v54, %v3677_v11  ;;  %v3669_v6 = vadd.f32 %v3668_v15, %v3572_v7  ;;  %5341 = vmatprep.mubr.msk.bf16.mxu0 %vm433_vm4, %v3752_v52  ;;  %v3736_v0 = vmax.f32 %v3720_v18, 0.0  ;;  %v3588_v52 = vadd.f32 %v5080_v17, %v3491_v43 }
 0xb9c   :  { %v5331_v30 = vpop.f32.mrf.mxu1  ;;  %5342 = vmatmul.mubr.msk.bf16.vlgmr.msra.gmra.mxu0 %vm433_vm4, %v3753_v10  ;;  %v7996_v10 = vld [vmem:[#allocation33_spill] sm:$0xff]  ;;  %v5098_v11 = vadd.f32 %v5097_v22, %v5096_v29  ;;  %v3507_v48 = vadd.f32 %v5028_v16, %v8001_v45  ;;  %v3601_v13 = vadd.f32 %v5089_v12, %v3504_v2 }
 0xb9d   :  { %v3739_v55 = vmax.f32 %v3723_v53, 0.0  ;;  %v3721_v47 = vadd.f32 %v7335_v54, %v3669_v6  ;;  %v3690_v21 = vadd.f32 %v5331_v30, %v3593_v58  ;;  %v3418_v57 = vadd.f32 %v4970_v9, %v7996_v10 }
 0xb9e   :  { %v3681_v38 = vpop.f32.mrf.mxu1  ;;  %v3604_v27 = vadd.f32 %v5092_v24, %v3507_v48 }
 0xb9f   :  { %v3755_v60 = vpack.c.bf16 %v3739_v55, %v3738_v32  ;;  %v3737_v51 = vmax.f32 %v3721_v47, 0.0  ;;  %v3682_v35 = vadd.f32 %v3681_v38, %v3585_v25  ;;  %v3726_v23 = vadd.f32 %v7335_v54, %v3690_v21 }
 0xba0   :  { %v5332_v1 = vpop.f32.mrf.mxu1  ;;  %v3515_v61 = vadd.f32 %v5034_v59, %v3418_v57  ;;  %v7422_v59 = vrot.slane %v7417_v40, %v8002_v41 }
 0xba1   :  { %v3754_v50 = vpack.c.bf16 %v3737_v51, %v3736_v0  ;;  %v3693_v28 = vadd.f32 %v5332_v1, %v3596_v56  ;;  %v3724_v3 = vadd.f32 %v7335_v54, %v3682_v35  ;;  %v3742_v26 = vmax.f32 %v3726_v23, 0.0 }
 0xba2   :  { %v3684_v7 = vpop.f32.mrf.mxu1  ;;  %v3612_v18 = vadd.f32 %v5098_v11, %v3515_v61 }
 0xba3   :  { %v3727_v34 = vadd.f32 %v7335_v54, %v3693_v28  ;;  %v3685_v9 = vadd.f32 %v3684_v7, %v3588_v52  ;;  %5345 = vmatprep.mubr.msk.bf16.mxu0 %vm433_vm4, %v3754_v50  ;;  %v3740_v53 = vmax.f32 %v3724_v3, 0.0 }
 0xba4   :  { %v5335_v49 = vpop.f32.mrf.mxu1  ;;  %5346 = vmatmul.mubr.msk.bf16.gmra.mxu0 %vm433_vm4, %v3755_v60 }
 0xba5   :  { %v3743_v42 = vmax.f32 %v3727_v34, 0.0  ;;  %v3725_v36 = vadd.f32 %v7335_v54, %v3685_v9  ;;  %v3706_v15 = vadd.f32 %v5335_v49, %v3609_v63 }
 0xba6   :  { %v3697_v29 = vpop.f32.mrf.mxu1 }
 0xba7   :  { %v3757_v6 = vpack.c.bf16 %v3743_v42, %v3742_v26  ;;  %v3741_v58 = vmax.f32 %v3725_v36, 0.0  ;;  %v3698_v5 = vadd.f32 %v3697_v29, %v3601_v13  ;;  %v3730_v4 = vadd.f32 %v7335_v54, %v3706_v15 }
 0xba8   :  { %v5336_v43 = vpop.f32.mrf.mxu1 }
 0xba9   :  { %v3756_v33 = vpack.c.bf16 %v3741_v58, %v3740_v53  ;;  %v3709_v14 = vadd.f32 %v5336_v43, %v3612_v18  ;;  %v3728_v62 = vadd.f32 %v7335_v54, %v3698_v5  ;;  %v3746_v30 = vmax.f32 %v3730_v4, 0.0 }
 0xbaa   :  { %v3700_v17 = vpop.f32.mrf.mxu1 }
 0xbab   :  { %v3731_v8 = vadd.f32 %v7335_v54, %v3709_v14  ;;  %v3701_v46 = vadd.f32 %v3700_v17, %v3604_v27  ;;  %5349 = vmatprep.mubr.msk.bf16.mxu0 %vm433_vm4, %v3756_v33  ;;  %v3744_v55 = vmax.f32 %v3728_v62, 0.0 }
 0xbac   :  { %5350 = vmatmul.mubr.msk.bf16.gmra.mxu0 %vm433_vm4, %v3757_v6 }
 0xbad   :  { %v3747_v25 = vmax.f32 %v3731_v8, 0.0  ;;  %v3729_v32 = vadd.f32 %v7335_v54, %v3701_v46  ;;  %v8003_v54 = vsub.s32 1, %v7980_v19 }
 0xbaf   :  { %v3759_v47 = vpack.c.bf16 %v3747_v25, %v3746_v30  ;;  %v3745_v21 = vmax.f32 %v3729_v32, 0.0  ;;  %v7427_v56 = vrot.slane %v7417_v40, %v8003_v54 }
 0xbb1   :  { %v3758_v39 = vpack.c.bf16 %v3745_v21, %v3744_v55 }
 0xbb3   :  { %5353 = vmatprep.mubr.msk.bf16.mxu0 %vm433_vm4, %v3758_v39 }
 0xbb4   :  { %5354 = vmatmul.mubr.msk.bf16.gmra.mxu0 %vm433_vm4, %v3759_v47 }
 0xc5c   :  { %v5343_v38 = vpop.f32.mrf.mxu0 }
 0xc5d   :  { %v3843_v22 = vadd.f32 %v5343_v38, %v7422_v59 }
 0xc5e   :  { %v3834_v0 = vpop.f32.mrf.mxu0 }
 0xc5f   :  { %v3899_v60 = vmax.f32 %v3843_v22, 0.0  ;;  %v3835_v51 = vadd.f32 %v3834_v0, %v7422_v59 }
 0xc60   :  { %v5344_v35 = vpop.f32.mrf.mxu0 }
 0xc61   :  { %v3897_v10 = vmax.f32 %v3835_v51, 0.0  ;;  %v3846_v57 = vadd.f32 %v5344_v35, %v7422_v59  ;;  %v3919_v44 = vmul.f32 %v7427_v56, %v3899_v60 }
 0xc62   :  { %v3837_v2 = vpop.f32.mrf.mxu0 }
 0xc63   :  { %v3900_v31 = vmax.f32 %v3846_v57, 0.0  ;;  %v3838_v12 = vadd.f32 %v3837_v2, %v7422_v59  ;;  %v3939_v37 = vsel %vm433_vm4, %v3919_v44, 0.0  ;;  %v3917_v20 = vmul.f32 %v7427_v56, %v3897_v10 }
 0xc64   :  { %3940 = vadd.xlane.f32.xlu0 %v3939_v37  ;;  %v5347_v16 = vpop.f32.mrf.mxu0 }
 0xc65   :  { %v3898_v1 = vmax.f32 %v3838_v12, 0.0  ;;  %v3859_v50 = vadd.f32 %v5347_v16, %v7422_v59  ;;  %v3933_v23 = vsel %vm433_vm4, %v3917_v20, 0.0  ;;  %v3920_v28 = vmul.f32 %v7427_v56, %v3900_v31 }
 0xc66   :  { %v3850_v52 = vpop.f32.mrf.mxu0  ;;  %3934 = vadd.xlane.f32.xlu1 %v3933_v23 }
 0xc67   :  { %v3903_v61 = vmax.f32 %v3859_v50, 0.0  ;;  %v3851_v11 = vadd.f32 %v3850_v52, %v7422_v59  ;;  %v3942_v3 = vsel %vm433_vm4, %v3920_v28, 0.0  ;;  %v3918_v45 = vmul.f32 %v7427_v56, %v3898_v1 }
 0xc68   :  { %v5348_v7 = vpop.f32.mrf.mxu0  ;;  %v8004_v52 = vsub.s32 2, %v7980_v19 }
 0xc69   :  { %v3901_v34 = vmax.f32 %v3851_v11, 0.0  ;;  %v3862_v9 = vadd.f32 %v5348_v7, %v7422_v59  ;;  %v3923_v63 = vmul.f32 %v7427_v56, %v3903_v61  ;;  %v3936_v29 = vsel %vm433_vm4, %v3918_v45, 0.0 }
 0xc6a   :  { %v3853_v48 = vpop.f32.mrf.mxu0  ;;  %3943 = vadd.xlane.f32.xlu1 %v3942_v3  ;;  %v7480_v61 = vrot.slane %v7417_v40, %v8004_v52 }
 0xc6b   :  { %v3904_v24 = vmax.f32 %v3862_v9, 0.0  ;;  %v3854_v49 = vadd.f32 %v3853_v48, %v7422_v59  ;;  %v3951_v13 = vsel %vm433_vm4, %v3923_v63, 0.0  ;;  %v3921_v26 = vmul.f32 %v7427_v56, %v3901_v34 }
 0xc6c   :  { %3952 = vadd.xlane.f32.xlu0 %v3951_v13  ;;  %v5351_v42 = vpop.f32.mrf.mxu0 }
 0xc6d   :  { %v3902_v36 = vmax.f32 %v3854_v49, 0.0  ;;  %v3875_v15 = vadd.f32 %v5351_v42, %v7422_v59  ;;  %v3924_v18 = vmul.f32 %v7427_v56, %v3904_v24  ;;  %v3945_v5 = vsel %vm433_vm4, %v3921_v26, 0.0 }
 0xc6e   :  { %v3866_v53 = vpop.f32.mrf.mxu0  ;;  %3937 = vadd.xlane.f32.xlu1 %v3936_v29 }
 0xc6f   :  { %v3907_v6 = vmax.f32 %v3875_v15, 0.0  ;;  %v3867_v58 = vadd.f32 %v3866_v53, %v7422_v59  ;;  %v3954_v33 = vsel %vm433_vm4, %v3924_v18, 0.0  ;;  %v3922_v17 = vmul.f32 %v7427_v56, %v3902_v36 }
 0xc70   :  { %v5352_v43 = vpop.f32.mrf.mxu0  ;;  %3946 = vadd.xlane.f32.xlu0 %v3945_v5 }
 0xc71   :  { %v3905_v4 = vmax.f32 %v3867_v58, 0.0  ;;  %v3878_v14 = vadd.f32 %v5352_v43, %v7422_v59  ;;  %v3927_v27 = vmul.f32 %v7427_v56, %v3907_v6  ;;  %v3948_v21 = vsel %vm433_vm4, %v3922_v17, 0.0 }
 0xc72   :  { %v3869_v62 = vpop.f32.mrf.mxu0  ;;  %3955 = vadd.xlane.f32.xlu1 %v3954_v33 }
 0xc73   :  { %v3908_v8 = vmax.f32 %v3878_v14, 0.0  ;;  %v3870_v46 = vadd.f32 %v3869_v62, %v7422_v59  ;;  %v3963_v30 = vsel %vm433_vm4, %v3927_v27, 0.0  ;;  %v3925_v25 = vmul.f32 %v7427_v56, %v3905_v4 }
 0xc74   :  { %v5355_v32 = vpop.f32.mrf.mxu0  ;;  %3964 = vadd.xlane.f32.xlu0 %v3963_v30 }
 0xc75   :  { %v3906_v55 = vmax.f32 %v3870_v46, 0.0  ;;  %v3891_v47 = vadd.f32 %v5355_v32, %v7422_v59  ;;  %v3928_v39 = vmul.f32 %v7427_v56, %v3908_v8  ;;  %v3957_v54 = vsel %vm433_vm4, %v3925_v25, 0.0 }
 0xc76   :  { %v3882_v41 = vpop.f32.mrf.mxu0  ;;  %3949 = vadd.xlane.f32.xlu1 %v3948_v21 }
 0xc77   :  { %v3883_v38 = vadd.f32 %v3882_v41, %v7422_v59  ;;  %v3926_v0 = vmul.f32 %v7427_v56, %v3906_v55  ;;  %v3911_v60 = vmax.f32 %v3891_v47, 0.0  ;;  %v3966_v10 = vsel %vm433_vm4, %v3928_v39, 0.0 }
 0xc78   :  { %v5356_v22 = vpop.f32.mrf.mxu0  ;;  %3958 = vadd.xlane.f32.xlu0 %v3957_v54 }
 0xc79   :  { %v3909_v51 = vmax.f32 %v3883_v38, 0.0  ;;  %v3894_v35 = vadd.f32 %v5356_v22, %v7422_v59  ;;  %v3960_v31 = vsel %vm433_vm4, %v3926_v0, 0.0  ;;  %v3931_v16 = vmul.f32 %v7427_v56, %v3911_v60 }
 0xc7a   :  { %v3885_v57 = vpop.f32.mrf.mxu0  ;;  %3967 = vadd.xlane.f32.xlu1 %v3966_v10 }
 0xc7b   :  { %v3886_v44 = vadd.f32 %v3885_v57, %v7422_v59  ;;  %v3929_v2 = vmul.f32 %v7427_v56, %v3909_v51  ;;  %v3912_v12 = vmax.f32 %v3894_v35, 0.0  ;;  %v3975_v50 = vsel %vm433_vm4, %v3931_v16, 0.0 }
 0xc7d   :  { %v3910_v37 = vmax.f32 %v3886_v44, 0.0  ;;  %v3969_v20 = vsel %vm433_vm4, %v3929_v2, 0.0  ;;  %v3932_v59 = vmul.f32 %v7427_v56, %v3912_v12 }
 0xc7e   :  { %3970 = vadd.xlane.f32.xlu0 %v3969_v20  ;;  %3961 = vadd.xlane.f32.xlu1 %v3960_v31 }
 0xc7f   :  { %v3930_v1 = vmul.f32 %v7427_v56, %v3910_v37  ;;  %v3978_v28 = vsel %vm433_vm4, %v3932_v59, 0.0 }
 0xc81   :  { %v3972_v23 = vsel %vm433_vm4, %v3930_v1, 0.0 }
 0xc82   :  { %3976 = vadd.xlane.f32.xlu0 %v3975_v50  ;;  %3973 = vadd.xlane.f32.xlu1 %v3972_v23 }
 0xc86   :  { %3979 = vadd.xlane.f32.xlu1 %v3978_v28 }
 0xced   :  { %v3941_v11 = vpop.xlane.xlu0 %3940 }
 0xcee   :  { %v7483_v7 = vadd.f32 %v7480_v61, %v3941_v11 }
 0xcef   :  { %v3935_v3 = vpop.xlane.xlu1 %3934 }
 0xcf0   :  { %v4019_v34 = vand.u32 2147483647, %v7483_v7  ;;  %v7487_v9 = vadd.f32 %v7480_v61, %v3935_v3 }
 0xcf2   :  { %v4035_v56 = vsub.f32 0.0, %v4019_v34  ;;  %v4017_v63 = vand.u32 2147483647, %v7487_v9 }
 0xcf3   :  { %v3944_v45 = vpop.xlane.xlu1 %3943 }
 0xcf4   :  { %v4053_v48 = vmul.f32 1.442695, %v4035_v56  ;;  %v4033_v24 = vsub.f32 0.0, %v4017_v63  ;;  %v7491_v19 = vadd.f32 %v7480_v61, %v3944_v45 }
 0xcf5   :  { %v3953_v40 = vpop.xlane.xlu0 %3952 }
 0xcf6   :  { %5551 = vpow2.f32 %v4053_v48  ;;  %v4049_v49 = vmul.f32 1.442695, %v4033_v24  ;;  %v4020_v13 = vand.u32 2147483647, %v7491_v19  ;;  %v7495_v26 = vadd.f32 %v7480_v61, %v3953_v40 }
 0xcf7   :  { %v3938_v42 = vpop.xlane.xlu1 %3937 }
 0xcf8   :  { %5553 = vpow2.f32 %v4049_v49  ;;  %v4036_v36 = vsub.f32 0.0, %v4020_v13  ;;  %v7498_v15 = vadd.f32 %v7480_v61, %v3938_v42  ;;  %v4023_v29 = vand.u32 2147483647, %v7495_v26 }
 0xcf9   :  { %v3947_v18 = vpop.xlane.xlu0 %3946 }
 0xcfa   :  { %v4055_v53 = vmul.f32 1.442695, %v4036_v36  ;;  %v4018_v6 = vand.u32 2147483647, %v7498_v15  ;;  %v7503_v58 = vadd.f32 %v7480_v61, %v3947_v18  ;;  %v4039_v5 = vsub.f32 0.0, %v4023_v29 }
 0xcfb   :  { %v3956_v43 = vpop.xlane.xlu1 %3955 }
 0xcfc   :  { %5555 = vpow2.f32 %v4055_v53  ;;  %v4034_v33 = vsub.f32 0.0, %v4018_v6  ;;  %v4021_v4 = vand.u32 2147483647, %v7503_v58  ;;  %v4061_v14 = vmul.f32 1.442695, %v4039_v5 }
 0xcfd   :  { %v7507_v27 = vadd.f32 %v7480_v61, %v3956_v43  ;;  %v3965_v17 = vpop.xlane.xlu0 %3964 }
 0xcfe   :  { %v4051_v62 = vmul.f32 1.442695, %v4034_v33  ;;  %v4037_v8 = vsub.f32 0.0, %v4021_v4  ;;  %v7510_v46 = vadd.f32 %v7480_v61, %v3965_v17  ;;  %5557 = vpow2.f32 %v4061_v14 }
 0xcff   :  { %v4024_v30 = vand.u32 2147483647, %v7507_v27  ;;  %v3950_v25 = vpop.xlane.xlu1 %3949 }
 0xd00   :  { %5559 = vpow2.f32 %v4051_v62  ;;  %v4057_v32 = vmul.f32 1.442695, %v4037_v8  ;;  %v4027_v55 = vand.u32 2147483647, %v7510_v46  ;;  %v7515_v21 = vadd.f32 %v7480_v61, %v3950_v25 }
 0xd01   :  { %v4040_v47 = vsub.f32 0.0, %v4024_v30  ;;  %v3959_v39 = vpop.xlane.xlu0 %3958 }
 0xd02   :  { %5561 = vpow2.f32 %v4057_v32  ;;  %v4043_v41 = vsub.f32 0.0, %v4027_v55  ;;  %v7518_v38 = vadd.f32 %v7480_v61, %v3959_v39  ;;  %v4022_v0 = vand.u32 2147483647, %v7515_v21 }
 0xd03   :  { %v5552_v54 = vpop.eup %5551  ;;  %v4063_v22 = vmul.f32 1.442695, %v4040_v47  ;;  %v3968_v60 = vpop.xlane.xlu1 %3967 }
 0xd04   :  { %v4083_v51 = vadd.f32 1.0, %v5552_v54  ;;  %v4069_v35 = vmul.f32 1.442695, %v4043_v41  ;;  %v4025_v10 = vand.u32 2147483647, %v7518_v38  ;;  %v4038_v44 = vsub.f32 0.0, %v4022_v0 }
 0xd05   :  { %v5554_v57 = vpop.eup %5553  ;;  %5563 = vpow2.f32 %v4063_v22  ;;  %v7523_v2 = vadd.f32 %v7480_v61, %v3968_v60  ;;  %v4003_v41 = vmax.f32 %v7483_v7, 0.0 }
 0xd06   :  { %5565 = vlog2.f32 %v4083_v51  ;;  %v4081_v31 = vadd.f32 1.0, %v5554_v57  ;;  %v4041_v12 = vsub.f32 0.0, %v4025_v10  ;;  %v4059_v37 = vmul.f32 1.442695, %v4038_v44 }
 0xd07   :  { %5567 = vpow2.f32 %v4069_v35  ;;  %v4028_v20 = vand.u32 2147483647, %v7523_v2  ;;  %v3971_v16 = vpop.xlane.xlu0 %3970  ;;  %v3962_v1 = vpop.xlane.xlu1 %3961 }
 0xd08   :  { %5569 = vlog2.f32 %v4081_v31  ;;  %v4065_v50 = vmul.f32 1.442695, %v4041_v12  ;;  %v7527_v23 = vadd.f32 %v7480_v61, %v3971_v16  ;;  %v7530_v59 = vadd.f32 %v7480_v61, %v3962_v1 }
 0xd09   :  { %v5556_v28 = vpop.eup %5555  ;;  %5571 = vpow2.f32 %v4059_v37  ;;  %v4044_v52 = vsub.f32 0.0, %v4028_v20 }
 0xd0a   :  { %v4084_v11 = vadd.f32 1.0, %v5556_v28  ;;  %5573 = vpow2.f32 %v4065_v50  ;;  %v4029_v3 = vand.u32 2147483647, %v7527_v23  ;;  %v4026_v56 = vand.u32 2147483647, %v7530_v59 }
 0xd0b   :  { %v4071_v34 = vmul.f32 1.442695, %v4044_v52  ;;  %v3977_v63 = vpop.xlane.xlu0 %3976  ;;  %v3974_v45 = vpop.xlane.xlu1 %3973  ;;  %v4004_v50 = vmax.f32 %v7491_v19, 0.0 }
 0xd0c   :  { %v5558_v48 = vpop.eup %5557  ;;  %5575 = vlog2.f32 %v4084_v11  ;;  %v4045_v24 = vsub.f32 0.0, %v4029_v3  ;;  %v7535_v40 = vadd.f32 %v7480_v61, %v3977_v63  ;;  %v7538_v49 = vadd.f32 %v7480_v61, %v3974_v45 }
 0xd0d   :  { %v5560_v13 = vpop.eup %5559  ;;  %v4087_v42 = vadd.f32 1.0, %v5558_v48  ;;  %5577 = vpow2.f32 %v4071_v34  ;;  %v4042_v36 = vsub.f32 0.0, %v4026_v56  ;;  %v4007_v56 = vmax.f32 %v7495_v26, 0.0 }
 0xd0e   :  { %v4082_v29 = vadd.f32 1.0, %v5560_v13  ;;  %v4073_v18 = vmul.f32 1.442695, %v4045_v24  ;;  %v4031_v53 = vand.u32 2147483647, %v7535_v40  ;;  %v4002_v48 = vmax.f32 %v7498_v15, 0.0 }
 0xd0f   :  { %v5562_v6 = vpop.eup %5561  ;;  %5579 = vlog2.f32 %v4087_v42  ;;  %v4067_v5 = vmul.f32 1.442695, %v4042_v36  ;;  %v4030_v43 = vand.u32 2147483647, %v7538_v49  ;;  %v3980_v33 = vpop.xlane.xlu1 %3979 }
 0xd10   :  { %5581 = vlog2.f32 %v4082_v29  ;;  %v4085_v4 = vadd.f32 1.0, %v5562_v6  ;;  %v4047_v14 = vsub.f32 0.0, %v4031_v53  ;;  %v7543_v17 = vadd.f32 %v7480_v61, %v3980_v33 }
 0xd11   :  { %5583 = vpow2.f32 %v4073_v18  ;;  %v4046_v62 = vsub.f32 0.0, %v4030_v43  ;;  %v4001_v61 = vmax.f32 %v7487_v9, 0.0  ;;  %v4005_v18 = vmax.f32 %v7503_v58, 0.0 }
 0xd12   :  { %v5564_v8 = vpop.eup %5563  ;;  %5585 = vlog2.f32 %v4085_v4  ;;  %v4077_v30 = vmul.f32 1.442695, %v4047_v14  ;;  %v4032_v25 = vand.u32 2147483647, %v7543_v17 }
 0xd13   :  { %v5566_v32 = vpop.eup %5565  ;;  %v4088_v55 = vadd.f32 1.0, %v5564_v8  ;;  %5587 = vpow2.f32 %v4067_v5  ;;  %v4075_v47 = vmul.f32 1.442695, %v4046_v62 }
 0xd14   :  { %v5568_v39 = vpop.eup %5567  ;;  %5589 = vpow2.f32 %v4077_v30  ;;  %v4048_v54 = vsub.f32 0.0, %v4032_v25  ;;  %v4102_v22 = vmul.f32 0.6931472, %v5566_v32  ;;  %v4008_v30 = vmax.f32 %v7507_v27, 0.0 }
 0xd15   :  { %v5570_v0 = vpop.eup %5569  ;;  %5591 = vlog2.f32 %v4088_v55  ;;  %v4091_v60 = vadd.f32 1.0, %v5568_v39 }
 0xd16   :  { %v5572_v51 = vpop.eup %5571  ;;  %5593 = vpow2.f32 %v4075_v47  ;;  %v4079_v35 = vmul.f32 1.442695, %v4048_v54  ;;  %v7548_v10 = vadd.f32 %v4102_v22, %v4003_v41  ;;  %v4098_v57 = vmul.f32 0.6931472, %v5570_v0 }
 0xd17   :  { %v5574_v44 = vpop.eup %5573  ;;  %5595 = vlog2.f32 %v4091_v60  ;;  %v4086_v31 = vadd.f32 1.0, %v5572_v51 }
 0xd18   :  { %v4089_v12 = vadd.f32 1.0, %v5574_v44  ;;  %5597 = vpow2.f32 %v4079_v35  ;;  %v4163_v37 = vsub.f32 %v7483_v7, %v7548_v10  ;;  %v7552_v20 = vadd.f32 %v4098_v57, %v4001_v61 }
 0xd19   :  { %v5576_v16 = vpop.eup %5575  ;;  %5599 = vlog2.f32 %v4086_v31  ;;  %v4006_v61 = vmax.f32 %v7515_v21, 0.0  ;;  %v4009_v35 = vmax.f32 %v7518_v38, 0.0 }
 0xd1a   :  { %v5578_v1 = vpop.eup %5577  ;;  %5601 = vlog2.f32 %v4089_v12  ;;  %4197 = vrot.lane.b32.xlu1 %v4163_v37, %s5740_s8  ;;  %v4161_v28 = vsub.f32 %v7487_v9, %v7552_v20  ;;  %v4104_v52 = vmul.f32 0.6931472, %v5576_v16  ;;  %v4012_v16 = vmax.f32 %v7523_v2, 0.0 }
 0xd1b   :  { %v4092_v11 = vadd.f32 1.0, %v5578_v1 }
 0xd1c   :  { %v5580_v3 = vpop.eup %5579  ;;  %4193 = vrot.lane.b32.xlu0 %v4161_v28, %s5740_s8  ;;  %v7559_v7 = vadd.f32 %v4104_v52, %v4004_v50  ;;  %v4013_v52 = vmax.f32 %v7527_v23, 0.0 }
 0xd1d   :  { %v5582_v34 = vpop.eup %5581  ;;  %5603 = vlog2.f32 %v4092_v11  ;;  %v4110_v63 = vmul.f32 0.6931472, %v5580_v3 }
 0xd1e   :  { %v5584_v45 = vpop.eup %5583  ;;  %v4164_v24 = vsub.f32 %v7491_v19, %v7559_v7  ;;  %v4100_v13 = vmul.f32 0.6931472, %v5582_v34 }
 0xd1f   :  { %v5586_v9 = vpop.eup %5585  ;;  %v4093_v42 = vadd.f32 1.0, %v5584_v45  ;;  %v7565_v36 = vadd.f32 %v4110_v63, %v4007_v56  ;;  %v4015_v45 = vmax.f32 %v7535_v40, 0.0 }
 0xd20   :  { %v5588_v29 = vpop.eup %5587  ;;  %4199 = vrot.lane.b32.xlu1 %v4164_v24, %s5740_s8  ;;  %v7569_v53 = vadd.f32 %v4100_v13, %v4002_v48  ;;  %v4106_v6 = vmul.f32 0.6931472, %v5586_v9 }
 0xd21   :  { %v5590_v5 = vpop.eup %5589  ;;  %5605 = vlog2.f32 %v4093_v42  ;;  %v4090_v43 = vadd.f32 1.0, %v5588_v29  ;;  %v4167_v33 = vsub.f32 %v7495_v26, %v7565_v36 }
 0xd22   :  { %v5592_v19 = vpop.eup %5591  ;;  %v4095_v4 = vadd.f32 1.0, %v5590_v5  ;;  %v4162_v14 = vsub.f32 %v7498_v15, %v7569_v53  ;;  %v7575_v62 = vadd.f32 %v4106_v6, %v4005_v18  ;;  %v4011_v15 = vmax.f32 %v7510_v46, 0.0 }
 0xd23   :  { %v5594_v8 = vpop.eup %5593  ;;  %5607 = vlog2.f32 %v4090_v43  ;;  %4205 = vrot.lane.b32.xlu0 %v4167_v33, %s5740_s8  ;;  %v4112_v25 = vmul.f32 0.6931472, %v5592_v19  ;;  %v4016_v5 = vmax.f32 %v7543_v17, 0.0 }
 0xd24   :  { %v5596_v32 = vpop.eup %5595  ;;  %5609 = vlog2.f32 %v4095_v4  ;;  %v4094_v55 = vadd.f32 1.0, %v5594_v8  ;;  %4195 = vrot.lane.b32.xlu1 %v4162_v14, %s5740_s8  ;;  %v4165_v26 = vsub.f32 %v7503_v58, %v7575_v62 }
 0xd25   :  { %v5598_v47 = vpop.eup %5597  ;;  %v7583_v39 = vadd.f32 %v4112_v25, %v4008_v30  ;;  %v4118_v41 = vmul.f32 0.6931472, %v5596_v32  ;;  %v4145_v30 = vsub.f32 0.0, %v7552_v20  ;;  %v4151_v20 = vsub.f32 0.0, %v7565_v36 }
 0xd26   :  { %v5600_v54 = vpop.eup %5599  ;;  %5611 = vlog2.f32 %v4094_v55  ;;  %v4096_v22 = vadd.f32 1.0, %v5598_v47  ;;  %v4149_v36 = vsub.f32 0.0, %v7575_v62 }
 0xd27   :  { %v5602_v0 = vpop.eup %5601  ;;  %4201 = vrot.lane.b32.xlu0 %v4165_v26, %s5740_s8  ;;  %v4168_v60 = vsub.f32 %v7507_v27, %v7583_v39  ;;  %v7589_v51 = vadd.f32 %v4118_v41, %v4011_v15  ;;  %v4108_v58 = vmul.f32 0.6931472, %v5600_v54  ;;  %v4146_v26 = vsub.f32 0.0, %v7569_v53 }
 0xd28   :  { %5613 = vlog2.f32 %v4096_v22  ;;  %v4114_v57 = vmul.f32 0.6931472, %v5602_v0  ;;  %v4152_v54 = vsub.f32 0.0, %v7583_v39 }
 0xd29   :  { %4207 = vrot.lane.b32.xlu1 %v4168_v60, %s5740_s8  ;;  %v4171_v44 = vsub.f32 %v7510_v46, %v7589_v51  ;;  %v7595_v31 = vadd.f32 %v4108_v58, %v4006_v61  ;;  %v4155_v61 = vsub.f32 0.0, %v7589_v51 }
 0xd2a   :  { %v5604_v12 = vpop.eup %5603  ;;  %v7597_v37 = vadd.f32 %v4114_v57, %v4009_v35 }
 0xd2b   :  { %4213 = vrot.lane.b32.xlu0 %v4171_v44, %s5740_s8  ;;  %v4166_v27 = vsub.f32 %v7515_v21, %v7595_v31  ;;  %v4120_v1 = vmul.f32 0.6931472, %v5604_v12  ;;  %v4010_v21 = vmax.f32 %v7530_v59, 0.0  ;;  %v4150_v39 = vsub.f32 0.0, %v7595_v31 }
 0xd2c   :  { %v4169_v50 = vsub.f32 %v7518_v38, %v7597_v37  ;;  %v4153_v51 = vsub.f32 0.0, %v7597_v37 }
 0xd2d   :  { %4203 = vrot.lane.b32.xlu1 %v4166_v27, %s5740_s8  ;;  %v7606_v28 = vadd.f32 %v4120_v1, %v4012_v16 }
 0xd2e   :  { %v5606_v46 = vpop.eup %5605 }
 0xd2f   :  { %4209 = vrot.lane.b32.xlu0 %v4169_v50, %s5740_s8  ;;  %v4172_v11 = vsub.f32 %v7523_v2, %v7606_v28  ;;  %v4122_v3 = vmul.f32 0.6931472, %v5606_v46  ;;  %v4014_v2 = vmax.f32 %v7538_v49, 0.0  ;;  %v4156_v31 = vsub.f32 0.0, %v7606_v28 }
 0xd30   :  { %v5608_v34 = vpop.eup %5607 }
 0xd31   :  { %v5610_v56 = vpop.eup %5609  ;;  %4215 = vrot.lane.b32.xlu1 %v4172_v11, %s5740_s8  ;;  %v7614_v38 = vadd.f32 %v4122_v3, %v4013_v52  ;;  %v4116_v63 = vmul.f32 0.6931472, %v5608_v34 }
 0xd32   :  { %v4126_v48 = vmul.f32 0.6931472, %v5610_v56 }
 0xd33   :  { %v5612_v24 = vpop.eup %5611  ;;  %v4173_v13 = vsub.f32 %v7527_v23, %v7614_v38  ;;  %v7619_v9 = vadd.f32 %v4116_v63, %v4010_v21  ;;  %v4157_v37 = vsub.f32 0.0, %v7614_v38 }
 0xd34   :  { %v7622_v42 = vadd.f32 %v4126_v48, %v4015_v45  ;;  %v4124_v29 = vmul.f32 0.6931472, %v5612_v24 }
 0xd35   :  { %v5614_v18 = vpop.eup %5613  ;;  %4217 = vrot.lane.b32.xlu0 %v4173_v13, %s5740_s8  ;;  %v4170_v6 = vsub.f32 %v7530_v59, %v7619_v9  ;;  %v4154_v50 = vsub.f32 0.0, %v7619_v9 }
 0xd36   :  { %v4175_v43 = vsub.f32 %v7535_v40, %v7622_v42  ;;  %v7630_v33 = vadd.f32 %v4124_v29, %v4014_v2  ;;  %v4128_v23 = vmul.f32 0.6931472, %v5614_v18  ;;  %v4147_v40 = vsub.f32 0.0, %v7548_v10 }
 0xd37   :  { %4211 = vrot.lane.b32.xlu1 %v4170_v6, %s5740_s8  ;;  %v4159_v52 = vsub.f32 0.0, %v7622_v42 }
 0xd38   :  { %v4174_v19 = vsub.f32 %v7538_v49, %v7630_v33  ;;  %v7635_v4 = vadd.f32 %v4128_v23, %v4016_v5  ;;  %v4158_v34 = vsub.f32 0.0, %v7630_v33 }
 0xd39   :  { %4221 = vrot.lane.b32.xlu0 %v4175_v43, %s5740_s8 }
 0xd3a   :  { %v4176_v59 = vsub.f32 %v7543_v17, %v7635_v4  ;;  %v4148_v17 = vsub.f32 0.0, %v7559_v7  ;;  %v4160_v38 = vsub.f32 0.0, %v7635_v4 }
 0xd3b   :  { %4219 = vrot.lane.b32.xlu1 %v4174_v19, %s5740_s8 }
 0xd3f   :  { %4223 = vrot.lane.b32.xlu1 %v4176_v59, %s5740_s8 }
 0xd8c   :  { %v4198_v14 = vpop.permute.xlu1 %4197 }
 0xd8d   :  { %v4243_v8 = vsel %vm709_vm5, %v4147_v40, %v4198_v14 }
 0xd8e   :  { %4259 = vst.msk [vmem:[%s7747_s9 + $0x10] sm:$0xff] %vm711_vm6, %v4243_v8  ;;  %v4194_v49 = vpop.permute.xlu0 %4193 }
 0xd8f   :  { %v4241_v25 = vsel %vm709_vm5, %v4145_v30, %v4194_v49 }
 0xd90   :  { %4257 = vst.msk [vmem:[%s7747_s9] sm:$0xff] %vm711_vm6, %v4241_v25 }
 0xd92   :  { %v4200_v10 = vpop.permute.xlu1 %4199 }
 0xd93   :  { %v4244_v32 = vsel %vm709_vm5, %v4148_v17, %v4200_v10 }
 0xd94   :  { %4260 = vst.msk [vmem:[%s7747_s9 + $0x18] sm:$0xff] %vm711_vm6, %v4244_v32 }
 0xd95   :  { %v4206_v55 = vpop.permute.xlu0 %4205 }
 0xd96   :  { %v4247_v47 = vsel %vm709_vm5, %v4151_v20, %v4206_v55  ;;  %v4196_v15 = vpop.permute.xlu1 %4195 }
 0xd97   :  { %4263 = vst.msk [vmem:[%s7747_s9 + $0x30] sm:$0xff] %vm711_vm6, %v4247_v47  ;;  %v4242_v7 = vsel %vm709_vm5, %v4146_v26, %v4196_v15 }
 0xd98   :  { %4258 = vst.msk [vmem:[%s7747_s9 + $0x8] sm:$0xff] %vm711_vm6, %v4242_v7 }
 0xd99   :  { %v4202_v41 = vpop.permute.xlu0 %4201 }
 0xd9a   :  { %v4245_v53 = vsel %vm709_vm5, %v4149_v36, %v4202_v41 }
 0xd9b   :  { %4261 = vst.msk [vmem:[%s7747_s9 + $0x20] sm:$0xff] %vm711_vm6, %v4245_v53  ;;  %v4208_v22 = vpop.permute.xlu1 %4207 }
 0xd9c   :  { %v4248_v0 = vsel %vm709_vm5, %v4152_v54, %v4208_v22 }
 0xd9d   :  { %4264 = vst.msk [vmem:[%s7747_s9 + $0x38] sm:$0xff] %vm711_vm6, %v4248_v0  ;;  %v4214_v62 = vpop.permute.xlu0 %4213 }
 0xd9e   :  { %v4251_v60 = vsel %vm709_vm5, %v4155_v61, %v4214_v62 }
 0xd9f   :  { %4267 = vst.msk [vmem:[%s7747_s9 + $0x50] sm:$0xff] %vm711_vm6, %v4251_v60  ;;  %v4204_v58 = vpop.permute.xlu1 %4203 }
 0xda0   :  { %v4246_v35 = vsel %vm709_vm5, %v4150_v39, %v4204_v58 }
 0xda1   :  { %4262 = vst.msk [vmem:[%s7747_s9 + $0x28] sm:$0xff] %vm711_vm6, %v4246_v35  ;;  %v4210_v57 = vpop.permute.xlu0 %4209 }
 0xda2   :  { %v4249_v44 = vsel %vm709_vm5, %v4153_v51, %v4210_v57 }
 0xda3   :  { %4265 = vst.msk [vmem:[%s7747_s9 + $0x40] sm:$0xff] %vm711_vm6, %v4249_v44  ;;  %v4216_v12 = vpop.permute.xlu1 %4215 }
 0xda4   :  { %v4252_v16 = vsel %vm709_vm5, %v4156_v31, %v4216_v12 }
 0xda5   :  { %4268 = vst.msk [vmem:[%s7747_s9 + $0x58] sm:$0xff] %vm711_vm6, %v4252_v16 }
 0xda7   :  { %v4218_v27 = vpop.permute.xlu0 %4217 }
 0xda8   :  { %v4253_v1 = vsel %vm709_vm5, %v4157_v37, %v4218_v27 }
 0xda9   :  { %4269 = vst.msk [vmem:[%s7747_s9 + $0x60] sm:$0xff] %vm711_vm6, %v4253_v1  ;;  %v4212_v28 = vpop.permute.xlu1 %4211 }
 0xdaa   :  { %v4250_v46 = vsel %vm709_vm5, %v4154_v50, %v4212_v28 }
 0xdab   :  { %4266 = vst.msk [vmem:[%s7747_s9 + $0x48] sm:$0xff] %vm711_vm6, %v4250_v46  ;;  %v4222_v11 = vpop.permute.xlu0 %4221 }
 0xdac   :  { %v4255_v3 = vsel %vm709_vm5, %v4159_v52, %v4222_v11 }
 0xdad   :  { %4271 = vst.msk [vmem:[%s7747_s9 + $0x70] sm:$0xff] %vm711_vm6, %v4255_v3  ;;  %v4220_v56 = vpop.permute.xlu1 %4219 }
 0xdae   :  { %v4254_v21 = vsel %vm709_vm5, %v4158_v34, %v4220_v56 }
 0xdaf   :  { %4270 = vst.msk [vmem:[%s7747_s9 + $0x68] sm:$0xff] %vm711_vm6, %v4254_v21 }
 0xdb1   :  { %v4224_v63 = vpop.permute.xlu1 %4223 }
 0xdb2   :  { %v4256_v45 = vsel %vm709_vm5, %v4160_v38, %v4224_v63 }
 0xdb3   :  { %4272 = vst.msk [vmem:[%s7747_s9 + $0x78] sm:$0xff] %vm711_vm6, %v4256_v45 }
 0xdb4   :  { %4281 = vsyncpa [#allocation3], 1 }
 0xdb5   :  { %4282 = vsyncpa [#allocation5], 1 }

</bundles_post_ra>
